<compile_context>
chip_gen: v6e
topology: v6e:2x2x1
jax: 0.10.0
libtpu: 0.0.40
codegen_flags: <defaults>
</compile_context>

<pallas_src>
import functools

import jax
import jax.numpy as jnp
from jax import lax
from jax.experimental import pallas as pl
from jax.experimental.pallas import tpu as pltpu


# ----------------------------------------------------------------------------
# Fused kernel
# ----------------------------------------------------------------------------
def _downstream_kernel(delta_ref,                  # SMEM (L+1,) f32
                       tok_f_ref, tok_b_ref,       # VMEM (T*Bp, 1) i32, time-major rows
                       len_ref,                    # VMEM (Bp, 1) i32
                       table_ref,                  # VMEM (Vp, D) f32
                       wih0_ref,                   # VMEM (2D, 8H) f32  layer-0 input proj, both dirs block-diag
                       bias0_ref,                  # VMEM (1, 8H) f32
                       whh0_ref,                   # VMEM (2H, 8H) f32  layer-0 recurrent, block-diag
                       wihhh_ref,                  # VMEM (L-1, 4H, 8H) layers>=1 [input; recurrent] fused
                       bias_hi_ref,                # VMEM (L-1, 1, 8H)
                       w1_ref, b1_ref, w2_ref, b2_ref,  # VMEM padded MLP head
                       out_ref):                   # VMEM (Bp, OUT_P) f32
    TB = tok_f_ref.shape[0]
    Bp = len_ref.shape[0]
    T = TB // Bp
    Vp, D = table_ref.shape
    H = whh0_ref.shape[0] // 2
    L = wihhh_ref.shape[0] + 1

    table = table_ref[...]

    def embed(tok_ref):
        # one-hot @ table: embedding gather done on the MXU (lane-dense K = Vp).
        tok = tok_ref[...]                                            # (TB, 1) i32
        pos = lax.broadcasted_iota(jnp.int32, (TB, Vp), 1)
        onehot = (pos == tok).astype(jnp.float32)                     # (TB, Vp)
        return jnp.dot(onehot, table, preferred_element_type=jnp.float32)  # (TB, D)

    emb_f = embed(tok_f_ref)
    # torch.mean(input, dim=1) over all T positions; computed immediately so
    # emb_f's live range ends before the recurrence (vreg pressure).
    emb_sum = emb_f[0:Bp, :]
    for t in range(1, T):
        emb_sum = emb_sum + emb_f[t * Bp:(t + 1) * Bp, :]
    emb_mean = emb_sum * (1.0 / T)

    emb_b = embed(tok_b_ref)
    x_cat = jnp.concatenate([emb_f, emb_b], axis=1)                   # (TB, 2D)

    # Hoisted layer-0 input projection + bias for BOTH directions: one matmul
    # covering all T steps, off the recurrence chain.
    gates_x0 = (jnp.dot(x_cat, wih0_ref[...], preferred_element_type=jnp.float32)
                + bias0_ref[...])                                     # (TB, 8H)

    # Hoisted per-step length masks (pack_padded hold), shared by layers & dirs.
    len_b = jnp.broadcast_to(len_ref[...], (Bp, 2 * H))               # i32
    masks = [len_b > t for t in range(T)]                             # bool (Bp, 2H)
    # Lane mask selecting the tanh (g) gate lanes of the fused
    # [i_f,i_b,f_f,f_b,g_f,g_b,o_f,o_b] column layout.
    lane = lax.broadcasted_iota(jnp.int32, (Bp, 8 * H), 1)
    tanh_lanes = (lane >= 4 * H) & (lane < 6 * H)

    whh0 = whh0_ref[...]
    wihhh = [wihhh_ref[l] for l in range(L - 1)]
    bias_hi = [bias_hi_ref[l] for l in range(L - 1)]

    def lstm_cell(gates, h_prev, c_prev, mask):
        # Full-vreg activations: one sigmoid + one tanh over all 8H lanes,
        # lane-mask select between them; single vselect for the length hold.
        act = jnp.where(tanh_lanes, jnp.tanh(gates), jax.nn.sigmoid(gates))
        i_g = act[:, 0:2 * H]
        f_g = act[:, 2 * H:4 * H]
        g_g = act[:, 4 * H:6 * H]
        o_g = act[:, 6 * H:8 * H]
        c_new = f_g * c_prev + i_g * g_g
        h_new = o_g * jnp.tanh(c_new)
        return jnp.where(mask, h_new, h_prev), jnp.where(mask, c_new, c_prev)

    # State layout per layer: (Bp, 2H) = [h_fwd | h_bwd] -> the head's
    # cat([fwd, bwd], dim=2) is free.
    hs = [jnp.zeros((Bp, 2 * H), jnp.float32) for _ in range(L)]
    cs = [jnp.zeros((Bp, 2 * H), jnp.float32) for _ in range(L)]

    # Wavefront schedule: wave w runs layer l at step t = w - l. Cells within a
    # wave are independent (layer l reads layer l-1's h from the PREVIOUS wave),
    # so the dependent chain is T + L - 1 cells instead of L*T, and the
    # scheduler can overlap the per-wave matmuls.
    for w in range(T + L - 1):
        updates = []
        for l in range(L):
            t = w - l
            if not (0 <= t < T):
                continue
            if l == 0:
                gates = gates_x0[t * Bp:(t + 1) * Bp, :] + jnp.dot(
                    hs[0], whh0, preferred_element_type=jnp.float32)
            else:
                # [h_below(t), h_self(t-1)] @ [wih; whh]  -> one fused matmul.
                lhs = jnp.concatenate([hs[l - 1], hs[l]], axis=1)     # (Bp, 4H)
                gates = jnp.dot(lhs, wihhh[l - 1],
                                preferred_element_type=jnp.float32) + bias_hi[l - 1]
            updates.append((l, lstm_cell(gates, hs[l], cs[l], masks[t])))
        for l, (h_new, c_new) in updates:
            hs[l], cs[l] = h_new, c_new

    # delta / sum(delta) weighted mix of per-layer (hidden+cell)/2 and the
    # tiled embedded-input row (cat([emb_mean]*L) with D == H gives width 2H).
    d_sum = delta_ref[0]
    for k in range(1, L + 1):
        d_sum = d_sum + delta_ref[k]
    inv_s = 1.0 / d_sum

    mixed = jnp.zeros((Bp, 2 * H), jnp.float32)
    for l in range(L):
        mixed = mixed + (delta_ref[l] * inv_s) * (0.5 * (hs[l] + cs[l]))
    mixed = mixed + (delta_ref[L] * inv_s) * jnp.concatenate([emb_mean] * L, axis=1)

    # 2-layer MLP head, lane-dense (padded) output tile.
    h1 = jnp.maximum(
        jnp.dot(mixed, w1_ref[...], preferred_element_type=jnp.float32)
        + b1_ref[...], 0.0)
    out_ref[...] = (jnp.dot(h1, w2_ref[...], preferred_element_type=jnp.float32)
                    + b2_ref[...])


# ----------------------------------------------------------------------------
# Parameter construction (pre-fused / pre-padded so the kernel sees clean tiles)
# ----------------------------------------------------------------------------
def init_params(key, vocab, hidden_dim, num_layers, num_classes,
                mlp_hidden=100, lane=128):
    # TODO(synk): original em.ELMO internals / 'best_elmo_model.pth' unavailable;
    # ELMO reimplemented as embedding + stacked unidirectional LSTMs (one
    # parameter set per direction) with random weights; embedding dim must equal
    # hidden_dim per the head's cat shapes.
    assert num_layers >= 2
    D = hidden_dim
    H = hidden_dim
    L = num_layers
    ks = jax.random.split(key, 8)

    vocab_p = ((vocab + lane - 1) // lane) * lane            # lane-dense one-hot K
    table = jnp.zeros((vocab_p, D), jnp.float32).at[:vocab].set(
        0.1 * jax.random.normal(ks[0], (vocab, D), jnp.float32))

    # Raw per (direction, layer) LSTM params, gate order i,f,g,o (D == H so
    # layer-0 and higher layers share the input width).
    wih_raw = 0.1 * jax.random.normal(ks[1], (2, L, D, 4 * H), jnp.float32)
    whh_raw = 0.1 * jax.random.normal(ks[2], (2, L, H, 4 * H), jnp.float32)
    b_raw = 0.1 * jax.random.normal(ks[3], (2, L, 4 * H), jnp.float32)

    def fuse_dirs(w_f, w_b):
        # (K,4H)x2 -> (2K,8H) block-diagonal with column layout
        # [i_f,i_b,f_f,f_b,g_f,g_b,o_f,o_b]: both directions' gates out of one
        # matmul, contiguous per gate type for full-width slicing.
        K = w_f.shape[0]
        out = jnp.zeros((2 * K, 8 * H), jnp.float32)
        for g in range(4):
            out = out.at[:K, (2 * g) * H:(2 * g + 1) * H].set(w_f[:, g * H:(g + 1) * H])
            out = out.at[K:, (2 * g + 1) * H:(2 * g + 2) * H].set(w_b[:, g * H:(g + 1) * H])
        return out

    def fuse_bias(b_f, b_b):
        out = jnp.zeros((1, 8 * H), jnp.float32)
        for g in range(4):
            out = out.at[0, (2 * g) * H:(2 * g + 1) * H].set(b_f[g * H:(g + 1) * H])
            out = out.at[0, (2 * g + 1) * H:(2 * g + 2) * H].set(b_b[g * H:(g + 1) * H])
        return out

    wih0 = fuse_dirs(wih_raw[0, 0], wih_raw[1, 0])           # (2D, 8H)
    whh0 = fuse_dirs(whh_raw[0, 0], whh_raw[1, 0])           # (2H, 8H)
    bias0 = fuse_bias(b_raw[0, 0], b_raw[1, 0])              # (1, 8H)

    wihhh, bias_hi = [], []
    for l in range(1, L):
        wih_blk = fuse_dirs(wih_raw[0, l], wih_raw[1, l])    # (2H, 8H)
        whh_blk = fuse_dirs(whh_raw[0, l], whh_raw[1, l])    # (2H, 8H)
        wihhh.append(jnp.concatenate([wih_blk, whh_blk], axis=0))   # (4H, 8H)
        bias_hi.append(fuse_bias(b_raw[0, l], b_raw[1, l]))
    wihhh = jnp.stack(wihhh)                                 # (L-1, 4H, 8H)
    bias_hi = jnp.stack(bias_hi)                             # (L-1, 1, 8H)

    delta = jax.random.normal(ks[4], (L + 1,), jnp.float32)

    mlp_h_p = ((mlp_hidden + lane - 1) // lane) * lane       # 100 -> 128
    out_p = ((num_classes + lane - 1) // lane) * lane        # 4   -> 128
    w1p = jnp.zeros((2 * H, mlp_h_p), jnp.float32).at[:, :mlp_hidden].set(
        0.1 * jax.random.normal(ks[5], (2 * H, mlp_hidden), jnp.float32))
    b1p = jnp.zeros((1, mlp_h_p), jnp.float32)
    w2p = jnp.zeros((mlp_h_p, out_p), jnp.float32).at[:mlp_hidden, :num_classes].set(
        0.1 * jax.random.normal(ks[6], (mlp_hidden, num_classes), jnp.float32))
    b2p = jnp.zeros((1, out_p), jnp.float32)

    return dict(table=table, wih0=wih0, bias0=bias0, whh0=whh0,
                wihhh=wihhh, bias_hi=bias_hi, delta=delta,
                w1p=w1p, b1p=b1p, w2p=w2p, b2p=b2p)


# ----------------------------------------------------------------------------
# Forward wrapper: single fused pallas_call
# ----------------------------------------------------------------------------
@functools.partial(jax.jit, static_argnames=("num_classes",))
def downstream_forward(params, forward_input, backward_input, lengths, *, num_classes):
    B, T = forward_input.shape
    Bp = max(8, ((B + 7) // 8) * 8)                          # sublane-dense batch pad
    out_p = params["w2p"].shape[1]
    Vp, D = params["table"].shape
    H = params["whh0"].shape[0] // 2
    L = params["wihhh"].shape[0] + 1

    def prep_tokens(tok):
        # time-major (T, Bp), flattened to (T*Bp, 1) so row = t*Bp + b
        t_major = jnp.zeros((T, Bp), jnp.int32).at[:, :B].set(tok.T.astype(jnp.int32))
        return t_major.reshape(T * Bp, 1)

    tok_f = prep_tokens(forward_input)
    tok_b = prep_tokens(backward_input)
    lens = jnp.zeros((Bp, 1), jnp.int32).at[:B, 0].set(lengths.astype(jnp.int32))

    args = (params["delta"], tok_f, tok_b, lens, params["table"],
            params["wih0"], params["bias0"], params["whh0"],
            params["wihhh"], params["bias_hi"],
            params["w1p"], params["b1p"], params["w2p"], params["b2p"])

    vmem = pl.BlockSpec(memory_space=pltpu.MemorySpace.VMEM)
    smem = pl.BlockSpec(memory_space=pltpu.MemorySpace.SMEM)

    TB = T * Bp
    flops = int(
        2 * (2 * TB * Vp * D)                                # embedding one-hot matmuls
        + 2 * TB * (2 * D) * (8 * H)                         # hoisted layer-0 input proj
        + T * 2 * Bp * (2 * H) * (8 * H)                     # layer-0 recurrence
        + (L - 1) * T * 2 * Bp * (4 * H) * (8 * H)           # fused higher-layer cells
        + 2 * Bp * (2 * H) * params["w1p"].shape[1]
        + 2 * Bp * params["w2p"].shape[0] * out_p)
    transcendentals = int(L * T * Bp * (2 * 8 * H + 2 * H))
    bytes_accessed = int(sum(a.size * a.dtype.itemsize for a in args) + Bp * out_p * 4)

    out = pl.pallas_call(
        _downstream_kernel,
        out_shape=jax.ShapeDtypeStruct((Bp, out_p), jnp.float32),
        in_specs=[smem] + [vmem] * 13,
        out_specs=vmem,
        compiler_params=pltpu.CompilerParams(vmem_limit_bytes=16 * 1024 * 1024),
        cost_estimate=pl.CostEstimate(flops=flops, transcendentals=transcendentals,
                                      bytes_accessed=bytes_accessed),
    )(*args)

    # torch: (delta/sum) @ cat -> (B,1,2H); squeeze(0) no-op for B>1; Linear -> (B,1,C)
    return out[:B, :num_classes][:, None, :]


if __name__ == "__main__":
    B, T = 2, 8
    hidden_dim = 32      # embedding dim == hidden_dim (required by the cat shapes)
    num_layers = 2       # delta has 3 mixing weights -> 2 LSTM layers + embedding
    num_classes = 4
    vocab = 50

    key = jax.random.PRNGKey(0)
    k_p, k_tok = jax.random.split(key, 2)

    params = init_params(k_p, vocab, hidden_dim, num_layers, num_classes)

    forward_input = jax.random.randint(k_tok, (B, T), 0, vocab, dtype=jnp.int32)
    lengths = jnp.array([T, T - 3], dtype=jnp.int32)
    # Backward stream: per-sequence reversal within the valid length (padding
    # stays at the tail), so the length-hold masking sees real tokens first.
    pos = jnp.arange(T)[None, :]
    rev_idx = jnp.where(pos < lengths[:, None], lengths[:, None] - 1 - pos, pos)
    backward_input = jnp.take_along_axis(forward_input, rev_idx, axis=1)

    out = downstream_forward(params, forward_input, backward_input, lengths,
                             num_classes=num_classes)
    out = jax.block_until_ready(out)
    assert out.shape == (B, 1, num_classes), out.shape
    print("KERNEL_OK")
</pallas_src>

<mosaic_0001>
module attributes {stable_mosaic.version = 11 : i64} {
  func.func @_downstream_kernel(%arg0: memref<3xf32, #tpu.memory_space<smem>>, %arg1: memref<64x1xi32, #tpu.memory_space<vmem>>, %arg2: memref<64x1xi32, #tpu.memory_space<vmem>>, %arg3: memref<8x1xi32, #tpu.memory_space<vmem>>, %arg4: memref<128x32xf32, #tpu.memory_space<vmem>>, %arg5: memref<64x256xf32, #tpu.memory_space<vmem>>, %arg6: memref<1x256xf32, #tpu.memory_space<vmem>>, %arg7: memref<64x256xf32, #tpu.memory_space<vmem>>, %arg8: memref<1x128x256xf32, #tpu.memory_space<vmem>>, %arg9: memref<1x1x256xf32, #tpu.memory_space<vmem>>, %arg10: memref<64x128xf32, #tpu.memory_space<vmem>>, %arg11: memref<1x128xf32, #tpu.memory_space<vmem>>, %arg12: memref<128x128xf32, #tpu.memory_space<vmem>>, %arg13: memref<1x128xf32, #tpu.memory_space<vmem>>, %arg14: memref<8x128xf32, #tpu.memory_space<vmem>>) attributes {dimension_semantics = [], scalar_prefetch = 0 : i64, scratch_operands = 0 : i64, tpu.core_type = #tpu.core_type<tc>} {
    %c0 = arith.constant 0 : index
    %c0_0 = arith.constant 0 : index
    %0 = vector.load %arg4[%c0, %c0_0] : memref<128x32xf32, #tpu.memory_space<vmem>>, vector<128x32xf32>
    %c0_1 = arith.constant 0 : index
    %c0_2 = arith.constant 0 : index
    %1 = vector.load %arg1[%c0_1, %c0_2] : memref<64x1xi32, #tpu.memory_space<vmem>>, vector<64x1xi32>
    %2 = tpu.iota {dimensions = array<i32: 1>} : vector<64x128xi32>
    %3 = vector.broadcast %1 : vector<64x1xi32> to vector<64x128xi32>
    %4 = arith.cmpi eq, %2, %3 : vector<64x128xi32>
    %5 = arith.extui %4 : vector<64x128xi1> to vector<64x128xi32>
    %6 = arith.sitofp %5 : vector<64x128xi32> to vector<64x128xf32>
    %cst = arith.constant dense<0.000000e+00> : vector<64x32xf32>
    %7 = tpu.matmul %6, %0, %cst {dimension_numbers = #tpu.dot_dimension_numbers<[1], [0], [0], [1], [0, 0, 1, 1], [], []>} : vector<64x128xf32>, vector<128x32xf32>, vector<64x32xf32> -> vector<64x32xf32>
    %8 = vector.extract_strided_slice %7 {offsets = [0, 0], sizes = [8, 32], strides = [1, 1]} : vector<64x32xf32> to vector<8x32xf32>
    %9 = vector.extract_strided_slice %7 {offsets = [8, 0], sizes = [8, 32], strides = [1, 1]} : vector<64x32xf32> to vector<8x32xf32>
    %10 = arith.addf %8, %9 : vector<8x32xf32>
    %11 = vector.extract_strided_slice %7 {offsets = [16, 0], sizes = [8, 32], strides = [1, 1]} : vector<64x32xf32> to vector<8x32xf32>
    %12 = arith.addf %10, %11 : vector<8x32xf32>
    %13 = vector.extract_strided_slice %7 {offsets = [24, 0], sizes = [8, 32], strides = [1, 1]} : vector<64x32xf32> to vector<8x32xf32>
    %14 = arith.addf %12, %13 : vector<8x32xf32>
    %15 = vector.extract_strided_slice %7 {offsets = [32, 0], sizes = [8, 32], strides = [1, 1]} : vector<64x32xf32> to vector<8x32xf32>
    %16 = arith.addf %14, %15 : vector<8x32xf32>
    %17 = vector.extract_strided_slice %7 {offsets = [40, 0], sizes = [8, 32], strides = [1, 1]} : vector<64x32xf32> to vector<8x32xf32>
    %18 = arith.addf %16, %17 : vector<8x32xf32>
    %19 = vector.extract_strided_slice %7 {offsets = [48, 0], sizes = [8, 32], strides = [1, 1]} : vector<64x32xf32> to vector<8x32xf32>
    %20 = arith.addf %18, %19 : vector<8x32xf32>
    %21 = vector.extract_strided_slice %7 {offsets = [56, 0], sizes = [8, 32], strides = [1, 1]} : vector<64x32xf32> to vector<8x32xf32>
    %22 = arith.addf %20, %21 : vector<8x32xf32>
    %cst_3 = arith.constant 1.250000e-01 : f32
    %23 = vector.broadcast %cst_3 : f32 to vector<8x32xf32>
    %24 = arith.mulf %22, %23 : vector<8x32xf32>
    %c0_4 = arith.constant 0 : index
    %c0_5 = arith.constant 0 : index
    %25 = vector.load %arg2[%c0_4, %c0_5] : memref<64x1xi32, #tpu.memory_space<vmem>>, vector<64x1xi32>
    %26 = tpu.iota {dimensions = array<i32: 1>} : vector<64x128xi32>
    %27 = vector.broadcast %25 : vector<64x1xi32> to vector<64x128xi32>
    %28 = arith.cmpi eq, %26, %27 : vector<64x128xi32>
    %29 = arith.extui %28 : vector<64x128xi1> to vector<64x128xi32>
    %30 = arith.sitofp %29 : vector<64x128xi32> to vector<64x128xf32>
    %cst_6 = arith.constant dense<0.000000e+00> : vector<64x32xf32>
    %31 = tpu.matmul %30, %0, %cst_6 {dimension_numbers = #tpu.dot_dimension_numbers<[1], [0], [0], [1], [0, 0, 1, 1], [], []>} : vector<64x128xf32>, vector<128x32xf32>, vector<64x32xf32> -> vector<64x32xf32>
    %32 = tpu.concatenate %7, %31 in 1 : vector<64x32xf32>, vector<64x32xf32> -> vector<64x64xf32>
    %c0_7 = arith.constant 0 : index
    %c0_8 = arith.constant 0 : index
    %33 = vector.load %arg5[%c0_7, %c0_8] : memref<64x256xf32, #tpu.memory_space<vmem>>, vector<64x256xf32>
    %cst_9 = arith.constant dense<0.000000e+00> : vector<64x256xf32>
    %34 = tpu.matmul %32, %33, %cst_9 {dimension_numbers = #tpu.dot_dimension_numbers<[1], [0], [0], [1], [0, 0, 1, 1], [], []>} : vector<64x64xf32>, vector<64x256xf32>, vector<64x256xf32> -> vector<64x256xf32>
    %c0_10 = arith.constant 0 : index
    %c0_11 = arith.constant 0 : index
    %35 = vector.load %arg6[%c0_10, %c0_11] : memref<1x256xf32, #tpu.memory_space<vmem>>, vector<1x256xf32>
    %36 = vector.broadcast %35 : vector<1x256xf32> to vector<64x256xf32>
    %37 = arith.addf %34, %36 : vector<64x256xf32>
    %c0_12 = arith.constant 0 : index
    %c0_13 = arith.constant 0 : index
    %38 = vector.load %arg3[%c0_12, %c0_13] : memref<8x1xi32, #tpu.memory_space<vmem>>, vector<8x1xi32>
    %39 = vector.shape_cast %38 : vector<8x1xi32> to vector<8x1xi32>
    %40 = vector.broadcast %39 : vector<8x1xi32> to vector<8x64xi32>
    %c0_i32 = arith.constant 0 : i32
    %41 = vector.broadcast %c0_i32 : i32 to vector<8x64xi32>
    %42 = arith.cmpi sgt, %40, %41 : vector<8x64xi32>
    %c1_i32 = arith.constant 1 : i32
    %43 = vector.broadcast %c1_i32 : i32 to vector<8x64xi32>
    %44 = arith.cmpi sgt, %40, %43 : vector<8x64xi32>
    %c2_i32 = arith.constant 2 : i32
    %45 = vector.broadcast %c2_i32 : i32 to vector<8x64xi32>
    %46 = arith.cmpi sgt, %40, %45 : vector<8x64xi32>
    %c3_i32 = arith.constant 3 : i32
    %47 = vector.broadcast %c3_i32 : i32 to vector<8x64xi32>
    %48 = arith.cmpi sgt, %40, %47 : vector<8x64xi32>
    %c4_i32 = arith.constant 4 : i32
    %49 = vector.broadcast %c4_i32 : i32 to vector<8x64xi32>
    %50 = arith.cmpi sgt, %40, %49 : vector<8x64xi32>
    %c5_i32 = arith.constant 5 : i32
    %51 = vector.broadcast %c5_i32 : i32 to vector<8x64xi32>
    %52 = arith.cmpi sgt, %40, %51 : vector<8x64xi32>
    %c6_i32 = arith.constant 6 : i32
    %53 = vector.broadcast %c6_i32 : i32 to vector<8x64xi32>
    %54 = arith.cmpi sgt, %40, %53 : vector<8x64xi32>
    %c7_i32 = arith.constant 7 : i32
    %55 = vector.broadcast %c7_i32 : i32 to vector<8x64xi32>
    %56 = arith.cmpi sgt, %40, %55 : vector<8x64xi32>
    %57 = tpu.iota {dimensions = array<i32: 1>} : vector<8x256xi32>
    %c128_i32 = arith.constant 128 : i32
    %58 = vector.broadcast %c128_i32 : i32 to vector<8x256xi32>
    %59 = arith.cmpi sge, %57, %58 : vector<8x256xi32>
    %c192_i32 = arith.constant 192 : i32
    %60 = vector.broadcast %c192_i32 : i32 to vector<8x256xi32>
    %61 = arith.cmpi slt, %57, %60 : vector<8x256xi32>
    %62 = arith.andi %59, %61 : vector<8x256xi1>
    %c0_14 = arith.constant 0 : index
    %c0_15 = arith.constant 0 : index
    %63 = vector.load %arg7[%c0_14, %c0_15] : memref<64x256xf32, #tpu.memory_space<vmem>>, vector<64x256xf32>
    %c0_16 = arith.constant 0 : index
    %c0_17 = arith.constant 0 : index
    %c0_18 = arith.constant 0 : index
    %64 = vector.load %arg8[%c0_16, %c0_17, %c0_18] : memref<1x128x256xf32, #tpu.memory_space<vmem>>, vector<1x128x256xf32>
    %65 = vector.shape_cast %64 : vector<1x128x256xf32> to vector<128x256xf32>
    %c0_19 = arith.constant 0 : index
    %c0_20 = arith.constant 0 : index
    %c0_21 = arith.constant 0 : index
    %66 = vector.load %arg9[%c0_19, %c0_20, %c0_21] : memref<1x1x256xf32, #tpu.memory_space<vmem>>, vector<1x1x256xf32>
    %67 = vector.shape_cast %66 : vector<1x1x256xf32> to vector<1x256xf32>
    %cst_22 = arith.constant 0.000000e+00 : f32
    %68 = vector.broadcast %cst_22 : f32 to vector<8x64xf32>
    %cst_23 = arith.constant 0.000000e+00 : f32
    %69 = vector.broadcast %cst_23 : f32 to vector<8x64xf32>
    %cst_24 = arith.constant 0.000000e+00 : f32
    %70 = vector.broadcast %cst_24 : f32 to vector<8x64xf32>
    %cst_25 = arith.constant 0.000000e+00 : f32
    %71 = vector.broadcast %cst_25 : f32 to vector<8x64xf32>
    %72 = vector.extract_strided_slice %37 {offsets = [0, 0], sizes = [8, 256], strides = [1, 1]} : vector<64x256xf32> to vector<8x256xf32>
    %cst_26 = arith.constant dense<0.000000e+00> : vector<8x256xf32>
    %73 = tpu.matmul %68, %63, %cst_26 {dimension_numbers = #tpu.dot_dimension_numbers<[1], [0], [0], [1], [0, 0, 1, 1], [], []>} : vector<8x64xf32>, vector<64x256xf32>, vector<8x256xf32> -> vector<8x256xf32>
    %74 = arith.addf %72, %73 : vector<8x256xf32>
    %75 = math.tanh %74 : vector<8x256xf32>
    %76 = arith.negf %74 : vector<8x256xf32>
    %77 = math.exp %76 : vector<8x256xf32>
    %cst_27 = arith.constant 1.000000e+00 : f32
    %78 = vector.broadcast %cst_27 : f32 to vector<8x256xf32>
    %79 = arith.addf %78, %77 : vector<8x256xf32>
    %80 = arith.divf %78, %79 : vector<8x256xf32>
    %81 = arith.select %62, %75, %80 : vector<8x256xi1>, vector<8x256xf32>
    %82 = vector.extract_strided_slice %81 {offsets = [0, 0], sizes = [8, 64], strides = [1, 1]} : vector<8x256xf32> to vector<8x64xf32>
    %83 = vector.extract_strided_slice %81 {offsets = [0, 64], sizes = [8, 64], strides = [1, 1]} : vector<8x256xf32> to vector<8x64xf32>
    %84 = vector.extract_strided_slice %81 {offsets = [0, 128], sizes = [8, 64], strides = [1, 1]} : vector<8x256xf32> to vector<8x64xf32>
    %85 = vector.extract_strided_slice %81 {offsets = [0, 192], sizes = [8, 64], strides = [1, 1]} : vector<8x256xf32> to vector<8x64xf32>
    %86 = arith.mulf %83, %70 : vector<8x64xf32>
    %87 = arith.mulf %82, %84 : vector<8x64xf32>
    %88 = arith.addf %86, %87 : vector<8x64xf32>
    %89 = math.tanh %88 : vector<8x64xf32>
    %90 = arith.mulf %85, %89 : vector<8x64xf32>
    %91 = arith.select %42, %90, %68 : vector<8x64xi1>, vector<8x64xf32>
    %92 = arith.select %42, %88, %70 : vector<8x64xi1>, vector<8x64xf32>
    %93 = vector.extract_strided_slice %37 {offsets = [8, 0], sizes = [8, 256], strides = [1, 1]} : vector<64x256xf32> to vector<8x256xf32>
    %cst_28 = arith.constant dense<0.000000e+00> : vector<8x256xf32>
    %94 = tpu.matmul %91, %63, %cst_28 {dimension_numbers = #tpu.dot_dimension_numbers<[1], [0], [0], [1], [0, 0, 1, 1], [], []>} : vector<8x64xf32>, vector<64x256xf32>, vector<8x256xf32> -> vector<8x256xf32>
    %95 = arith.addf %93, %94 : vector<8x256xf32>
    %96 = math.tanh %95 : vector<8x256xf32>
    %97 = arith.negf %95 : vector<8x256xf32>
    %98 = math.exp %97 : vector<8x256xf32>
    %cst_29 = arith.constant 1.000000e+00 : f32
    %99 = vector.broadcast %cst_29 : f32 to vector<8x256xf32>
    %100 = arith.addf %99, %98 : vector<8x256xf32>
    %101 = arith.divf %99, %100 : vector<8x256xf32>
    %102 = arith.select %62, %96, %101 : vector<8x256xi1>, vector<8x256xf32>
    %103 = vector.extract_strided_slice %102 {offsets = [0, 0], sizes = [8, 64], strides = [1, 1]} : vector<8x256xf32> to vector<8x64xf32>
    %104 = vector.extract_strided_slice %102 {offsets = [0, 64], sizes = [8, 64], strides = [1, 1]} : vector<8x256xf32> to vector<8x64xf32>
    %105 = vector.extract_strided_slice %102 {offsets = [0, 128], sizes = [8, 64], strides = [1, 1]} : vector<8x256xf32> to vector<8x64xf32>
    %106 = vector.extract_strided_slice %102 {offsets = [0, 192], sizes = [8, 64], strides = [1, 1]} : vector<8x256xf32> to vector<8x64xf32>
    %107 = arith.mulf %104, %92 : vector<8x64xf32>
    %108 = arith.mulf %103, %105 : vector<8x64xf32>
    %109 = arith.addf %107, %108 : vector<8x64xf32>
    %110 = math.tanh %109 : vector<8x64xf32>
    %111 = arith.mulf %106, %110 : vector<8x64xf32>
    %112 = arith.select %44, %111, %91 : vector<8x64xi1>, vector<8x64xf32>
    %113 = arith.select %44, %109, %92 : vector<8x64xi1>, vector<8x64xf32>
    %114 = tpu.concatenate %91, %69 in 1 : vector<8x64xf32>, vector<8x64xf32> -> vector<8x128xf32>
    %cst_30 = arith.constant dense<0.000000e+00> : vector<8x256xf32>
    %115 = tpu.matmul %114, %65, %cst_30 {dimension_numbers = #tpu.dot_dimension_numbers<[1], [0], [0], [1], [0, 0, 1, 1], [], []>} : vector<8x128xf32>, vector<128x256xf32>, vector<8x256xf32> -> vector<8x256xf32>
    %116 = vector.broadcast %67 : vector<1x256xf32> to vector<8x256xf32>
    %117 = arith.addf %115, %116 : vector<8x256xf32>
    %118 = math.tanh %117 : vector<8x256xf32>
    %119 = arith.negf %117 : vector<8x256xf32>
    %120 = math.exp %119 : vector<8x256xf32>
    %cst_31 = arith.constant 1.000000e+00 : f32
    %121 = vector.broadcast %cst_31 : f32 to vector<8x256xf32>
    %122 = arith.addf %121, %120 : vector<8x256xf32>
    %123 = arith.divf %121, %122 : vector<8x256xf32>
    %124 = arith.select %62, %118, %123 : vector<8x256xi1>, vector<8x256xf32>
    %125 = vector.extract_strided_slice %124 {offsets = [0, 0], sizes = [8, 64], strides = [1, 1]} : vector<8x256xf32> to vector<8x64xf32>
    %126 = vector.extract_strided_slice %124 {offsets = [0, 64], sizes = [8, 64], strides = [1, 1]} : vector<8x256xf32> to vector<8x64xf32>
    %127 = vector.extract_strided_slice %124 {offsets = [0, 128], sizes = [8, 64], strides = [1, 1]} : vector<8x256xf32> to vector<8x64xf32>
    %128 = vector.extract_strided_slice %124 {offsets = [0, 192], sizes = [8, 64], strides = [1, 1]} : vector<8x256xf32> to vector<8x64xf32>
    %129 = arith.mulf %126, %71 : vector<8x64xf32>
    %130 = arith.mulf %125, %127 : vector<8x64xf32>
    %131 = arith.addf %129, %130 : vector<8x64xf32>
    %132 = math.tanh %131 : vector<8x64xf32>
    %133 = arith.mulf %128, %132 : vector<8x64xf32>
    %134 = arith.select %42, %133, %69 : vector<8x64xi1>, vector<8x64xf32>
    %135 = arith.select %42, %131, %71 : vector<8x64xi1>, vector<8x64xf32>
    %136 = vector.extract_strided_slice %37 {offsets = [16, 0], sizes = [8, 256], strides = [1, 1]} : vector<64x256xf32> to vector<8x256xf32>
    %cst_32 = arith.constant dense<0.000000e+00> : vector<8x256xf32>
    %137 = tpu.matmul %112, %63, %cst_32 {dimension_numbers = #tpu.dot_dimension_numbers<[1], [0], [0], [1], [0, 0, 1, 1], [], []>} : vector<8x64xf32>, vector<64x256xf32>, vector<8x256xf32> -> vector<8x256xf32>
    %138 = arith.addf %136, %137 : vector<8x256xf32>
    %139 = math.tanh %138 : vector<8x256xf32>
    %140 = arith.negf %138 : vector<8x256xf32>
    %141 = math.exp %140 : vector<8x256xf32>
    %cst_33 = arith.constant 1.000000e+00 : f32
    %142 = vector.broadcast %cst_33 : f32 to vector<8x256xf32>
    %143 = arith.addf %142, %141 : vector<8x256xf32>
    %144 = arith.divf %142, %143 : vector<8x256xf32>
    %145 = arith.select %62, %139, %144 : vector<8x256xi1>, vector<8x256xf32>
    %146 = vector.extract_strided_slice %145 {offsets = [0, 0], sizes = [8, 64], strides = [1, 1]} : vector<8x256xf32> to vector<8x64xf32>
    %147 = vector.extract_strided_slice %145 {offsets = [0, 64], sizes = [8, 64], strides = [1, 1]} : vector<8x256xf32> to vector<8x64xf32>
    %148 = vector.extract_strided_slice %145 {offsets = [0, 128], sizes = [8, 64], strides = [1, 1]} : vector<8x256xf32> to vector<8x64xf32>
    %149 = vector.extract_strided_slice %145 {offsets = [0, 192], sizes = [8, 64], strides = [1, 1]} : vector<8x256xf32> to vector<8x64xf32>
    %150 = arith.mulf %147, %113 : vector<8x64xf32>
    %151 = arith.mulf %146, %148 : vector<8x64xf32>
    %152 = arith.addf %150, %151 : vector<8x64xf32>
    %153 = math.tanh %152 : vector<8x64xf32>
    %154 = arith.mulf %149, %153 : vector<8x64xf32>
    %155 = arith.select %46, %154, %112 : vector<8x64xi1>, vector<8x64xf32>
    %156 = arith.select %46, %152, %113 : vector<8x64xi1>, vector<8x64xf32>
    %157 = tpu.concatenate %112, %134 in 1 : vector<8x64xf32>, vector<8x64xf32> -> vector<8x128xf32>
    %cst_34 = arith.constant dense<0.000000e+00> : vector<8x256xf32>
    %158 = tpu.matmul %157, %65, %cst_34 {dimension_numbers = #tpu.dot_dimension_numbers<[1], [0], [0], [1], [0, 0, 1, 1], [], []>} : vector<8x128xf32>, vector<128x256xf32>, vector<8x256xf32> -> vector<8x256xf32>
    %159 = vector.broadcast %67 : vector<1x256xf32> to vector<8x256xf32>
    %160 = arith.addf %158, %159 : vector<8x256xf32>
    %161 = math.tanh %160 : vector<8x256xf32>
    %162 = arith.negf %160 : vector<8x256xf32>
    %163 = math.exp %162 : vector<8x256xf32>
    %cst_35 = arith.constant 1.000000e+00 : f32
    %164 = vector.broadcast %cst_35 : f32 to vector<8x256xf32>
    %165 = arith.addf %164, %163 : vector<8x256xf32>
    %166 = arith.divf %164, %165 : vector<8x256xf32>
    %167 = arith.select %62, %161, %166 : vector<8x256xi1>, vector<8x256xf32>
    %168 = vector.extract_strided_slice %167 {offsets = [0, 0], sizes = [8, 64], strides = [1, 1]} : vector<8x256xf32> to vector<8x64xf32>
    %169 = vector.extract_strided_slice %167 {offsets = [0, 64], sizes = [8, 64], strides = [1, 1]} : vector<8x256xf32> to vector<8x64xf32>
    %170 = vector.extract_strided_slice %167 {offsets = [0, 128], sizes = [8, 64], strides = [1, 1]} : vector<8x256xf32> to vector<8x64xf32>
    %171 = vector.extract_strided_slice %167 {offsets = [0, 192], sizes = [8, 64], strides = [1, 1]} : vector<8x256xf32> to vector<8x64xf32>
    %172 = arith.mulf %169, %135 : vector<8x64xf32>
    %173 = arith.mulf %168, %170 : vector<8x64xf32>
    %174 = arith.addf %172, %173 : vector<8x64xf32>
    %175 = math.tanh %174 : vector<8x64xf32>
    %176 = arith.mulf %171, %175 : vector<8x64xf32>
    %177 = arith.select %44, %176, %134 : vector<8x64xi1>, vector<8x64xf32>
    %178 = arith.select %44, %174, %135 : vector<8x64xi1>, vector<8x64xf32>
    %179 = vector.extract_strided_slice %37 {offsets = [24, 0], sizes = [8, 256], strides = [1, 1]} : vector<64x256xf32> to vector<8x256xf32>
    %cst_36 = arith.constant dense<0.000000e+00> : vector<8x256xf32>
    %180 = tpu.matmul %155, %63, %cst_36 {dimension_numbers = #tpu.dot_dimension_numbers<[1], [0], [0], [1], [0, 0, 1, 1], [], []>} : vector<8x64xf32>, vector<64x256xf32>, vector<8x256xf32> -> vector<8x256xf32>
    %181 = arith.addf %179, %180 : vector<8x256xf32>
    %182 = math.tanh %181 : vector<8x256xf32>
    %183 = arith.negf %181 : vector<8x256xf32>
    %184 = math.exp %183 : vector<8x256xf32>
    %cst_37 = arith.constant 1.000000e+00 : f32
    %185 = vector.broadcast %cst_37 : f32 to vector<8x256xf32>
    %186 = arith.addf %185, %184 : vector<8x256xf32>
    %187 = arith.divf %185, %186 : vector<8x256xf32>
    %188 = arith.select %62, %182, %187 : vector<8x256xi1>, vector<8x256xf32>
    %189 = vector.extract_strided_slice %188 {offsets = [0, 0], sizes = [8, 64], strides = [1, 1]} : vector<8x256xf32> to vector<8x64xf32>
    %190 = vector.extract_strided_slice %188 {offsets = [0, 64], sizes = [8, 64], strides = [1, 1]} : vector<8x256xf32> to vector<8x64xf32>
    %191 = vector.extract_strided_slice %188 {offsets = [0, 128], sizes = [8, 64], strides = [1, 1]} : vector<8x256xf32> to vector<8x64xf32>
    %192 = vector.extract_strided_slice %188 {offsets = [0, 192], sizes = [8, 64], strides = [1, 1]} : vector<8x256xf32> to vector<8x64xf32>
    %193 = arith.mulf %190, %156 : vector<8x64xf32>
    %194 = arith.mulf %189, %191 : vector<8x64xf32>
    %195 = arith.addf %193, %194 : vector<8x64xf32>
    %196 = math.tanh %195 : vector<8x64xf32>
    %197 = arith.mulf %192, %196 : vector<8x64xf32>
    %198 = arith.select %48, %197, %155 : vector<8x64xi1>, vector<8x64xf32>
    %199 = arith.select %48, %195, %156 : vector<8x64xi1>, vector<8x64xf32>
    %200 = tpu.concatenate %155, %177 in 1 : vector<8x64xf32>, vector<8x64xf32> -> vector<8x128xf32>
    %cst_38 = arith.constant dense<0.000000e+00> : vector<8x256xf32>
    %201 = tpu.matmul %200, %65, %cst_38 {dimension_numbers = #tpu.dot_dimension_numbers<[1], [0], [0], [1], [0, 0, 1, 1], [], []>} : vector<8x128xf32>, vector<128x256xf32>, vector<8x256xf32> -> vector<8x256xf32>
    %202 = vector.broadcast %67 : vector<1x256xf32> to vector<8x256xf32>
    %203 = arith.addf %201, %202 : vector<8x256xf32>
    %204 = math.tanh %203 : vector<8x256xf32>
    %205 = arith.negf %203 : vector<8x256xf32>
    %206 = math.exp %205 : vector<8x256xf32>
    %cst_39 = arith.constant 1.000000e+00 : f32
    %207 = vector.broadcast %cst_39 : f32 to vector<8x256xf32>
    %208 = arith.addf %207, %206 : vector<8x256xf32>
    %209 = arith.divf %207, %208 : vector<8x256xf32>
    %210 = arith.select %62, %204, %209 : vector<8x256xi1>, vector<8x256xf32>
    %211 = vector.extract_strided_slice %210 {offsets = [0, 0], sizes = [8, 64], strides = [1, 1]} : vector<8x256xf32> to vector<8x64xf32>
    %212 = vector.extract_strided_slice %210 {offsets = [0, 64], sizes = [8, 64], strides = [1, 1]} : vector<8x256xf32> to vector<8x64xf32>
    %213 = vector.extract_strided_slice %210 {offsets = [0, 128], sizes = [8, 64], strides = [1, 1]} : vector<8x256xf32> to vector<8x64xf32>
    %214 = vector.extract_strided_slice %210 {offsets = [0, 192], sizes = [8, 64], strides = [1, 1]} : vector<8x256xf32> to vector<8x64xf32>
    %215 = arith.mulf %212, %178 : vector<8x64xf32>
    %216 = arith.mulf %211, %213 : vector<8x64xf32>
    %217 = arith.addf %215, %216 : vector<8x64xf32>
    %218 = math.tanh %217 : vector<8x64xf32>
    %219 = arith.mulf %214, %218 : vector<8x64xf32>
    %220 = arith.select %46, %219, %177 : vector<8x64xi1>, vector<8x64xf32>
    %221 = arith.select %46, %217, %178 : vector<8x64xi1>, vector<8x64xf32>
    %222 = vector.extract_strided_slice %37 {offsets = [32, 0], sizes = [8, 256], strides = [1, 1]} : vector<64x256xf32> to vector<8x256xf32>
    %cst_40 = arith.constant dense<0.000000e+00> : vector<8x256xf32>
    %223 = tpu.matmul %198, %63, %cst_40 {dimension_numbers = #tpu.dot_dimension_numbers<[1], [0], [0], [1], [0, 0, 1, 1], [], []>} : vector<8x64xf32>, vector<64x256xf32>, vector<8x256xf32> -> vector<8x256xf32>
    %224 = arith.addf %222, %223 : vector<8x256xf32>
    %225 = math.tanh %224 : vector<8x256xf32>
    %226 = arith.negf %224 : vector<8x256xf32>
    %227 = math.exp %226 : vector<8x256xf32>
    %cst_41 = arith.constant 1.000000e+00 : f32
    %228 = vector.broadcast %cst_41 : f32 to vector<8x256xf32>
    %229 = arith.addf %228, %227 : vector<8x256xf32>
    %230 = arith.divf %228, %229 : vector<8x256xf32>
    %231 = arith.select %62, %225, %230 : vector<8x256xi1>, vector<8x256xf32>
    %232 = vector.extract_strided_slice %231 {offsets = [0, 0], sizes = [8, 64], strides = [1, 1]} : vector<8x256xf32> to vector<8x64xf32>
    %233 = vector.extract_strided_slice %231 {offsets = [0, 64], sizes = [8, 64], strides = [1, 1]} : vector<8x256xf32> to vector<8x64xf32>
    %234 = vector.extract_strided_slice %231 {offsets = [0, 128], sizes = [8, 64], strides = [1, 1]} : vector<8x256xf32> to vector<8x64xf32>
    %235 = vector.extract_strided_slice %231 {offsets = [0, 192], sizes = [8, 64], strides = [1, 1]} : vector<8x256xf32> to vector<8x64xf32>
    %236 = arith.mulf %233, %199 : vector<8x64xf32>
    %237 = arith.mulf %232, %234 : vector<8x64xf32>
    %238 = arith.addf %236, %237 : vector<8x64xf32>
    %239 = math.tanh %238 : vector<8x64xf32>
    %240 = arith.mulf %235, %239 : vector<8x64xf32>
    %241 = arith.select %50, %240, %198 : vector<8x64xi1>, vector<8x64xf32>
    %242 = arith.select %50, %238, %199 : vector<8x64xi1>, vector<8x64xf32>
    %243 = tpu.concatenate %198, %220 in 1 : vector<8x64xf32>, vector<8x64xf32> -> vector<8x128xf32>
    %cst_42 = arith.constant dense<0.000000e+00> : vector<8x256xf32>
    %244 = tpu.matmul %243, %65, %cst_42 {dimension_numbers = #tpu.dot_dimension_numbers<[1], [0], [0], [1], [0, 0, 1, 1], [], []>} : vector<8x128xf32>, vector<128x256xf32>, vector<8x256xf32> -> vector<8x256xf32>
    %245 = vector.broadcast %67 : vector<1x256xf32> to vector<8x256xf32>
    %246 = arith.addf %244, %245 : vector<8x256xf32>
    %247 = math.tanh %246 : vector<8x256xf32>
    %248 = arith.negf %246 : vector<8x256xf32>
    %249 = math.exp %248 : vector<8x256xf32>
    %cst_43 = arith.constant 1.000000e+00 : f32
    %250 = vector.broadcast %cst_43 : f32 to vector<8x256xf32>
    %251 = arith.addf %250, %249 : vector<8x256xf32>
    %252 = arith.divf %250, %251 : vector<8x256xf32>
    %253 = arith.select %62, %247, %252 : vector<8x256xi1>, vector<8x256xf32>
    %254 = vector.extract_strided_slice %253 {offsets = [0, 0], sizes = [8, 64], strides = [1, 1]} : vector<8x256xf32> to vector<8x64xf32>
    %255 = vector.extract_strided_slice %253 {offsets = [0, 64], sizes = [8, 64], strides = [1, 1]} : vector<8x256xf32> to vector<8x64xf32>
    %256 = vector.extract_strided_slice %253 {offsets = [0, 128], sizes = [8, 64], strides = [1, 1]} : vector<8x256xf32> to vector<8x64xf32>
    %257 = vector.extract_strided_slice %253 {offsets = [0, 192], sizes = [8, 64], strides = [1, 1]} : vector<8x256xf32> to vector<8x64xf32>
    %258 = arith.mulf %255, %221 : vector<8x64xf32>
    %259 = arith.mulf %254, %256 : vector<8x64xf32>
    %260 = arith.addf %258, %259 : vector<8x64xf32>
    %261 = math.tanh %260 : vector<8x64xf32>
    %262 = arith.mulf %257, %261 : vector<8x64xf32>
    %263 = arith.select %48, %262, %220 : vector<8x64xi1>, vector<8x64xf32>
    %264 = arith.select %48, %260, %221 : vector<8x64xi1>, vector<8x64xf32>
    %265 = vector.extract_strided_slice %37 {offsets = [40, 0], sizes = [8, 256], strides = [1, 1]} : vector<64x256xf32> to vector<8x256xf32>
    %cst_44 = arith.constant dense<0.000000e+00> : vector<8x256xf32>
    %266 = tpu.matmul %241, %63, %cst_44 {dimension_numbers = #tpu.dot_dimension_numbers<[1], [0], [0], [1], [0, 0, 1, 1], [], []>} : vector<8x64xf32>, vector<64x256xf32>, vector<8x256xf32> -> vector<8x256xf32>
    %267 = arith.addf %265, %266 : vector<8x256xf32>
    %268 = math.tanh %267 : vector<8x256xf32>
    %269 = arith.negf %267 : vector<8x256xf32>
    %270 = math.exp %269 : vector<8x256xf32>
    %cst_45 = arith.constant 1.000000e+00 : f32
    %271 = vector.broadcast %cst_45 : f32 to vector<8x256xf32>
    %272 = arith.addf %271, %270 : vector<8x256xf32>
    %273 = arith.divf %271, %272 : vector<8x256xf32>
    %274 = arith.select %62, %268, %273 : vector<8x256xi1>, vector<8x256xf32>
    %275 = vector.extract_strided_slice %274 {offsets = [0, 0], sizes = [8, 64], strides = [1, 1]} : vector<8x256xf32> to vector<8x64xf32>
    %276 = vector.extract_strided_slice %274 {offsets = [0, 64], sizes = [8, 64], strides = [1, 1]} : vector<8x256xf32> to vector<8x64xf32>
    %277 = vector.extract_strided_slice %274 {offsets = [0, 128], sizes = [8, 64], strides = [1, 1]} : vector<8x256xf32> to vector<8x64xf32>
    %278 = vector.extract_strided_slice %274 {offsets = [0, 192], sizes = [8, 64], strides = [1, 1]} : vector<8x256xf32> to vector<8x64xf32>
    %279 = arith.mulf %276, %242 : vector<8x64xf32>
    %280 = arith.mulf %275, %277 : vector<8x64xf32>
    %281 = arith.addf %279, %280 : vector<8x64xf32>
    %282 = math.tanh %281 : vector<8x64xf32>
    %283 = arith.mulf %278, %282 : vector<8x64xf32>
    %284 = arith.select %52, %283, %241 : vector<8x64xi1>, vector<8x64xf32>
    %285 = arith.select %52, %281, %242 : vector<8x64xi1>, vector<8x64xf32>
    %286 = tpu.concatenate %241, %263 in 1 : vector<8x64xf32>, vector<8x64xf32> -> vector<8x128xf32>
    %cst_46 = arith.constant dense<0.000000e+00> : vector<8x256xf32>
    %287 = tpu.matmul %286, %65, %cst_46 {dimension_numbers = #tpu.dot_dimension_numbers<[1], [0], [0], [1], [0, 0, 1, 1], [], []>} : vector<8x128xf32>, vector<128x256xf32>, vector<8x256xf32> -> vector<8x256xf32>
    %288 = vector.broadcast %67 : vector<1x256xf32> to vector<8x256xf32>
    %289 = arith.addf %287, %288 : vector<8x256xf32>
    %290 = math.tanh %289 : vector<8x256xf32>
    %291 = arith.negf %289 : vector<8x256xf32>
    %292 = math.exp %291 : vector<8x256xf32>
    %cst_47 = arith.constant 1.000000e+00 : f32
    %293 = vector.broadcast %cst_47 : f32 to vector<8x256xf32>
    %294 = arith.addf %293, %292 : vector<8x256xf32>
    %295 = arith.divf %293, %294 : vector<8x256xf32>
    %296 = arith.select %62, %290, %295 : vector<8x256xi1>, vector<8x256xf32>
    %297 = vector.extract_strided_slice %296 {offsets = [0, 0], sizes = [8, 64], strides = [1, 1]} : vector<8x256xf32> to vector<8x64xf32>
    %298 = vector.extract_strided_slice %296 {offsets = [0, 64], sizes = [8, 64], strides = [1, 1]} : vector<8x256xf32> to vector<8x64xf32>
    %299 = vector.extract_strided_slice %296 {offsets = [0, 128], sizes = [8, 64], strides = [1, 1]} : vector<8x256xf32> to vector<8x64xf32>
    %300 = vector.extract_strided_slice %296 {offsets = [0, 192], sizes = [8, 64], strides = [1, 1]} : vector<8x256xf32> to vector<8x64xf32>
    %301 = arith.mulf %298, %264 : vector<8x64xf32>
    %302 = arith.mulf %297, %299 : vector<8x64xf32>
    %303 = arith.addf %301, %302 : vector<8x64xf32>
    %304 = math.tanh %303 : vector<8x64xf32>
    %305 = arith.mulf %300, %304 : vector<8x64xf32>
    %306 = arith.select %50, %305, %263 : vector<8x64xi1>, vector<8x64xf32>
    %307 = arith.select %50, %303, %264 : vector<8x64xi1>, vector<8x64xf32>
    %308 = vector.extract_strided_slice %37 {offsets = [48, 0], sizes = [8, 256], strides = [1, 1]} : vector<64x256xf32> to vector<8x256xf32>
    %cst_48 = arith.constant dense<0.000000e+00> : vector<8x256xf32>
    %309 = tpu.matmul %284, %63, %cst_48 {dimension_numbers = #tpu.dot_dimension_numbers<[1], [0], [0], [1], [0, 0, 1, 1], [], []>} : vector<8x64xf32>, vector<64x256xf32>, vector<8x256xf32> -> vector<8x256xf32>
    %310 = arith.addf %308, %309 : vector<8x256xf32>
    %311 = math.tanh %310 : vector<8x256xf32>
    %312 = arith.negf %310 : vector<8x256xf32>
    %313 = math.exp %312 : vector<8x256xf32>
    %cst_49 = arith.constant 1.000000e+00 : f32
    %314 = vector.broadcast %cst_49 : f32 to vector<8x256xf32>
    %315 = arith.addf %314, %313 : vector<8x256xf32>
    %316 = arith.divf %314, %315 : vector<8x256xf32>
    %317 = arith.select %62, %311, %316 : vector<8x256xi1>, vector<8x256xf32>
    %318 = vector.extract_strided_slice %317 {offsets = [0, 0], sizes = [8, 64], strides = [1, 1]} : vector<8x256xf32> to vector<8x64xf32>
    %319 = vector.extract_strided_slice %317 {offsets = [0, 64], sizes = [8, 64], strides = [1, 1]} : vector<8x256xf32> to vector<8x64xf32>
    %320 = vector.extract_strided_slice %317 {offsets = [0, 128], sizes = [8, 64], strides = [1, 1]} : vector<8x256xf32> to vector<8x64xf32>
    %321 = vector.extract_strided_slice %317 {offsets = [0, 192], sizes = [8, 64], strides = [1, 1]} : vector<8x256xf32> to vector<8x64xf32>
    %322 = arith.mulf %319, %285 : vector<8x64xf32>
    %323 = arith.mulf %318, %320 : vector<8x64xf32>
    %324 = arith.addf %322, %323 : vector<8x64xf32>
    %325 = math.tanh %324 : vector<8x64xf32>
    %326 = arith.mulf %321, %325 : vector<8x64xf32>
    %327 = arith.select %54, %326, %284 : vector<8x64xi1>, vector<8x64xf32>
    %328 = arith.select %54, %324, %285 : vector<8x64xi1>, vector<8x64xf32>
    %329 = tpu.concatenate %284, %306 in 1 : vector<8x64xf32>, vector<8x64xf32> -> vector<8x128xf32>
    %cst_50 = arith.constant dense<0.000000e+00> : vector<8x256xf32>
    %330 = tpu.matmul %329, %65, %cst_50 {dimension_numbers = #tpu.dot_dimension_numbers<[1], [0], [0], [1], [0, 0, 1, 1], [], []>} : vector<8x128xf32>, vector<128x256xf32>, vector<8x256xf32> -> vector<8x256xf32>
    %331 = vector.broadcast %67 : vector<1x256xf32> to vector<8x256xf32>
    %332 = arith.addf %330, %331 : vector<8x256xf32>
    %333 = math.tanh %332 : vector<8x256xf32>
    %334 = arith.negf %332 : vector<8x256xf32>
    %335 = math.exp %334 : vector<8x256xf32>
    %cst_51 = arith.constant 1.000000e+00 : f32
    %336 = vector.broadcast %cst_51 : f32 to vector<8x256xf32>
    %337 = arith.addf %336, %335 : vector<8x256xf32>
    %338 = arith.divf %336, %337 : vector<8x256xf32>
    %339 = arith.select %62, %333, %338 : vector<8x256xi1>, vector<8x256xf32>
    %340 = vector.extract_strided_slice %339 {offsets = [0, 0], sizes = [8, 64], strides = [1, 1]} : vector<8x256xf32> to vector<8x64xf32>
    %341 = vector.extract_strided_slice %339 {offsets = [0, 64], sizes = [8, 64], strides = [1, 1]} : vector<8x256xf32> to vector<8x64xf32>
    %342 = vector.extract_strided_slice %339 {offsets = [0, 128], sizes = [8, 64], strides = [1, 1]} : vector<8x256xf32> to vector<8x64xf32>
    %343 = vector.extract_strided_slice %339 {offsets = [0, 192], sizes = [8, 64], strides = [1, 1]} : vector<8x256xf32> to vector<8x64xf32>
    %344 = arith.mulf %341, %307 : vector<8x64xf32>
    %345 = arith.mulf %340, %342 : vector<8x64xf32>
    %346 = arith.addf %344, %345 : vector<8x64xf32>
    %347 = math.tanh %346 : vector<8x64xf32>
    %348 = arith.mulf %343, %347 : vector<8x64xf32>
    %349 = arith.select %52, %348, %306 : vector<8x64xi1>, vector<8x64xf32>
    %350 = arith.select %52, %346, %307 : vector<8x64xi1>, vector<8x64xf32>
    %351 = vector.extract_strided_slice %37 {offsets = [56, 0], sizes = [8, 256], strides = [1, 1]} : vector<64x256xf32> to vector<8x256xf32>
    %cst_52 = arith.constant dense<0.000000e+00> : vector<8x256xf32>
    %352 = tpu.matmul %327, %63, %cst_52 {dimension_numbers = #tpu.dot_dimension_numbers<[1], [0], [0], [1], [0, 0, 1, 1], [], []>} : vector<8x64xf32>, vector<64x256xf32>, vector<8x256xf32> -> vector<8x256xf32>
    %353 = arith.addf %351, %352 : vector<8x256xf32>
    %354 = math.tanh %353 : vector<8x256xf32>
    %355 = arith.negf %353 : vector<8x256xf32>
    %356 = math.exp %355 : vector<8x256xf32>
    %cst_53 = arith.constant 1.000000e+00 : f32
    %357 = vector.broadcast %cst_53 : f32 to vector<8x256xf32>
    %358 = arith.addf %357, %356 : vector<8x256xf32>
    %359 = arith.divf %357, %358 : vector<8x256xf32>
    %360 = arith.select %62, %354, %359 : vector<8x256xi1>, vector<8x256xf32>
    %361 = vector.extract_strided_slice %360 {offsets = [0, 0], sizes = [8, 64], strides = [1, 1]} : vector<8x256xf32> to vector<8x64xf32>
    %362 = vector.extract_strided_slice %360 {offsets = [0, 64], sizes = [8, 64], strides = [1, 1]} : vector<8x256xf32> to vector<8x64xf32>
    %363 = vector.extract_strided_slice %360 {offsets = [0, 128], sizes = [8, 64], strides = [1, 1]} : vector<8x256xf32> to vector<8x64xf32>
    %364 = vector.extract_strided_slice %360 {offsets = [0, 192], sizes = [8, 64], strides = [1, 1]} : vector<8x256xf32> to vector<8x64xf32>
    %365 = arith.mulf %362, %328 : vector<8x64xf32>
    %366 = arith.mulf %361, %363 : vector<8x64xf32>
    %367 = arith.addf %365, %366 : vector<8x64xf32>
    %368 = math.tanh %367 : vector<8x64xf32>
    %369 = arith.mulf %364, %368 : vector<8x64xf32>
    %370 = arith.select %56, %369, %327 : vector<8x64xi1>, vector<8x64xf32>
    %371 = arith.select %56, %367, %328 : vector<8x64xi1>, vector<8x64xf32>
    %372 = tpu.concatenate %327, %349 in 1 : vector<8x64xf32>, vector<8x64xf32> -> vector<8x128xf32>
    %cst_54 = arith.constant dense<0.000000e+00> : vector<8x256xf32>
    %373 = tpu.matmul %372, %65, %cst_54 {dimension_numbers = #tpu.dot_dimension_numbers<[1], [0], [0], [1], [0, 0, 1, 1], [], []>} : vector<8x128xf32>, vector<128x256xf32>, vector<8x256xf32> -> vector<8x256xf32>
    %374 = vector.broadcast %67 : vector<1x256xf32> to vector<8x256xf32>
    %375 = arith.addf %373, %374 : vector<8x256xf32>
    %376 = math.tanh %375 : vector<8x256xf32>
    %377 = arith.negf %375 : vector<8x256xf32>
    %378 = math.exp %377 : vector<8x256xf32>
    %cst_55 = arith.constant 1.000000e+00 : f32
    %379 = vector.broadcast %cst_55 : f32 to vector<8x256xf32>
    %380 = arith.addf %379, %378 : vector<8x256xf32>
    %381 = arith.divf %379, %380 : vector<8x256xf32>
    %382 = arith.select %62, %376, %381 : vector<8x256xi1>, vector<8x256xf32>
    %383 = vector.extract_strided_slice %382 {offsets = [0, 0], sizes = [8, 64], strides = [1, 1]} : vector<8x256xf32> to vector<8x64xf32>
    %384 = vector.extract_strided_slice %382 {offsets = [0, 64], sizes = [8, 64], strides = [1, 1]} : vector<8x256xf32> to vector<8x64xf32>
    %385 = vector.extract_strided_slice %382 {offsets = [0, 128], sizes = [8, 64], strides = [1, 1]} : vector<8x256xf32> to vector<8x64xf32>
    %386 = vector.extract_strided_slice %382 {offsets = [0, 192], sizes = [8, 64], strides = [1, 1]} : vector<8x256xf32> to vector<8x64xf32>
    %387 = arith.mulf %384, %350 : vector<8x64xf32>
    %388 = arith.mulf %383, %385 : vector<8x64xf32>
    %389 = arith.addf %387, %388 : vector<8x64xf32>
    %390 = math.tanh %389 : vector<8x64xf32>
    %391 = arith.mulf %386, %390 : vector<8x64xf32>
    %392 = arith.select %54, %391, %349 : vector<8x64xi1>, vector<8x64xf32>
    %393 = arith.select %54, %389, %350 : vector<8x64xi1>, vector<8x64xf32>
    %394 = tpu.concatenate %370, %392 in 1 : vector<8x64xf32>, vector<8x64xf32> -> vector<8x128xf32>
    %cst_56 = arith.constant dense<0.000000e+00> : vector<8x256xf32>
    %395 = tpu.matmul %394, %65, %cst_56 {dimension_numbers = #tpu.dot_dimension_numbers<[1], [0], [0], [1], [0, 0, 1, 1], [], []>} : vector<8x128xf32>, vector<128x256xf32>, vector<8x256xf32> -> vector<8x256xf32>
    %396 = vector.broadcast %67 : vector<1x256xf32> to vector<8x256xf32>
    %397 = arith.addf %395, %396 : vector<8x256xf32>
    %398 = math.tanh %397 : vector<8x256xf32>
    %399 = arith.negf %397 : vector<8x256xf32>
    %400 = math.exp %399 : vector<8x256xf32>
    %cst_57 = arith.constant 1.000000e+00 : f32
    %401 = vector.broadcast %cst_57 : f32 to vector<8x256xf32>
    %402 = arith.addf %401, %400 : vector<8x256xf32>
    %403 = arith.divf %401, %402 : vector<8x256xf32>
    %404 = arith.select %62, %398, %403 : vector<8x256xi1>, vector<8x256xf32>
    %405 = vector.extract_strided_slice %404 {offsets = [0, 0], sizes = [8, 64], strides = [1, 1]} : vector<8x256xf32> to vector<8x64xf32>
    %406 = vector.extract_strided_slice %404 {offsets = [0, 64], sizes = [8, 64], strides = [1, 1]} : vector<8x256xf32> to vector<8x64xf32>
    %407 = vector.extract_strided_slice %404 {offsets = [0, 128], sizes = [8, 64], strides = [1, 1]} : vector<8x256xf32> to vector<8x64xf32>
    %408 = vector.extract_strided_slice %404 {offsets = [0, 192], sizes = [8, 64], strides = [1, 1]} : vector<8x256xf32> to vector<8x64xf32>
    %409 = arith.mulf %406, %393 : vector<8x64xf32>
    %410 = arith.mulf %405, %407 : vector<8x64xf32>
    %411 = arith.addf %409, %410 : vector<8x64xf32>
    %412 = math.tanh %411 : vector<8x64xf32>
    %413 = arith.mulf %408, %412 : vector<8x64xf32>
    %414 = arith.select %56, %413, %392 : vector<8x64xi1>, vector<8x64xf32>
    %415 = arith.select %56, %411, %393 : vector<8x64xi1>, vector<8x64xf32>
    %c0_58 = arith.constant 0 : index
    %416 = memref.load %arg0[%c0_58] : memref<3xf32, #tpu.memory_space<smem>>
    %c1 = arith.constant 1 : index
    %417 = memref.load %arg0[%c1] : memref<3xf32, #tpu.memory_space<smem>>
    %418 = arith.addf %416, %417 : f32
    %c2 = arith.constant 2 : index
    %419 = memref.load %arg0[%c2] : memref<3xf32, #tpu.memory_space<smem>>
    %420 = arith.addf %418, %419 : f32
    %cst_59 = arith.constant 1.000000e+00 : f32
    %421 = arith.divf %cst_59, %420 : f32
    %cst_60 = arith.constant 0.000000e+00 : f32
    %422 = vector.broadcast %cst_60 : f32 to vector<8x64xf32>
    %c0_61 = arith.constant 0 : index
    %423 = memref.load %arg0[%c0_61] : memref<3xf32, #tpu.memory_space<smem>>
    %424 = arith.mulf %423, %421 : f32
    %425 = arith.addf %370, %371 : vector<8x64xf32>
    %cst_62 = arith.constant 5.000000e-01 : f32
    %426 = vector.broadcast %cst_62 : f32 to vector<8x64xf32>
    %427 = arith.mulf %426, %425 : vector<8x64xf32>
    %428 = vector.broadcast %424 : f32 to vector<8x64xf32>
    %429 = arith.mulf %428, %427 : vector<8x64xf32>
    %430 = arith.addf %422, %429 : vector<8x64xf32>
    %c1_63 = arith.constant 1 : index
    %431 = memref.load %arg0[%c1_63] : memref<3xf32, #tpu.memory_space<smem>>
    %432 = arith.mulf %431, %421 : f32
    %433 = arith.addf %414, %415 : vector<8x64xf32>
    %cst_64 = arith.constant 5.000000e-01 : f32
    %434 = vector.broadcast %cst_64 : f32 to vector<8x64xf32>
    %435 = arith.mulf %434, %433 : vector<8x64xf32>
    %436 = vector.broadcast %432 : f32 to vector<8x64xf32>
    %437 = arith.mulf %436, %435 : vector<8x64xf32>
    %438 = arith.addf %430, %437 : vector<8x64xf32>
    %c2_65 = arith.constant 2 : index
    %439 = memref.load %arg0[%c2_65] : memref<3xf32, #tpu.memory_space<smem>>
    %440 = arith.mulf %439, %421 : f32
    %441 = tpu.concatenate %24, %24 in 1 : vector<8x32xf32>, vector<8x32xf32> -> vector<8x64xf32>
    %442 = vector.broadcast %440 : f32 to vector<8x64xf32>
    %443 = arith.mulf %442, %441 : vector<8x64xf32>
    %444 = arith.addf %438, %443 : vector<8x64xf32>
    %c0_66 = arith.constant 0 : index
    %c0_67 = arith.constant 0 : index
    %445 = vector.load %arg10[%c0_66, %c0_67] : memref<64x128xf32, #tpu.memory_space<vmem>>, vector<64x128xf32>
    %cst_68 = arith.constant dense<0.000000e+00> : vector<8x128xf32>
    %446 = tpu.matmul %444, %445, %cst_68 {dimension_numbers = #tpu.dot_dimension_numbers<[1], [0], [0], [1], [0, 0, 1, 1], [], []>} : vector<8x64xf32>, vector<64x128xf32>, vector<8x128xf32> -> vector<8x128xf32>
    %c0_69 = arith.constant 0 : index
    %c0_70 = arith.constant 0 : index
    %447 = vector.load %arg11[%c0_69, %c0_70] : memref<1x128xf32, #tpu.memory_space<vmem>>, vector<1x128xf32>
    %448 = vector.broadcast %447 : vector<1x128xf32> to vector<8x128xf32>
    %449 = arith.addf %446, %448 : vector<8x128xf32>
    %cst_71 = arith.constant 0.000000e+00 : f32
    %450 = vector.broadcast %cst_71 : f32 to vector<8x128xf32>
    %451 = arith.maximumf %449, %450 : vector<8x128xf32>
    %c0_72 = arith.constant 0 : index
    %c0_73 = arith.constant 0 : index
    %452 = vector.load %arg12[%c0_72, %c0_73] : memref<128x128xf32, #tpu.memory_space<vmem>>, vector<128x128xf32>
    %cst_74 = arith.constant dense<0.000000e+00> : vector<8x128xf32>
    %453 = tpu.matmul %451, %452, %cst_74 {dimension_numbers = #tpu.dot_dimension_numbers<[1], [0], [0], [1], [0, 0, 1, 1], [], []>} : vector<8x128xf32>, vector<128x128xf32>, vector<8x128xf32> -> vector<8x128xf32>
    %c0_75 = arith.constant 0 : index
    %c0_76 = arith.constant 0 : index
    %454 = vector.load %arg13[%c0_75, %c0_76] : memref<1x128xf32, #tpu.memory_space<vmem>>, vector<1x128xf32>
    %455 = vector.broadcast %454 : vector<1x128xf32> to vector<8x128xf32>
    %456 = arith.addf %453, %455 : vector<8x128xf32>
    %c0_77 = arith.constant 0 : index
    %c0_78 = arith.constant 0 : index
    %457 = vector.load %arg14[%c0_77, %c0_78] : memref<8x128xf32, #tpu.memory_space<vmem>>, vector<8x128xf32>
    tpu.vector_store %arg14[%c0_77, %c0_78], %456 {strides = array<i32>} : memref<8x128xf32, #tpu.memory_space<vmem>>, vector<8x128xf32>,
    return
  }
}

</mosaic_0001>

<bundles_post_ra>
// kernel: downstream_forward.1
= control target key start
LH: loop header
LB: loop body
LE: loop exit
PB: predicated region body
PF: predicated region fallthrough
CT: control target
= control target key end

     0   :  { %19 = vsyncpa [#allocation4], 0  ;;  %s4841_s0 = inlined_call_operand.vmem [shape: f32[3], index: 0, kind: input, shape index: {}]   ;;  %s4842_s1 = inlined_call_operand.vmem [shape: s32[64,1], index: 1, kind: input, shape index: {}]   ;;  %s4843_s2 = inlined_call_operand.vmem [shape: s32[64,1], index: 2, kind: input, shape index: {}]   ;;  %s4844_s3 = inlined_call_operand.vmem [shape: s32[8,1], index: 3, kind: input, shape index: {}]   ;;  %s4845_s4 = inlined_call_operand.vmem [shape: f32[128,32], index: 4, kind: input, shape index: {}]   ;;  %s4846_s5 = inlined_call_operand.vmem [shape: f32[64,256], index: 5, kind: input, shape index: {}]   ;;  %s4847_s6 = inlined_call_operand.vmem [shape: f32[1,256], index: 6, kind: input, shape index: {}]   ;;  %s4848_s7 = inlined_call_operand.hbm [shape: f32[64,256], index: 7, kind: input, shape index: {}]   ;;  %s4849_s8 = inlined_call_operand.vmem [shape: f32[1,128,256], index: 8, kind: input, shape index: {}]   ;;  %s4850_s9 = inlined_call_operand.vmem [shape: f32[1,1,256], index: 9, kind: input, shape index: {}]   ;;  %s4851_s10 = inlined_call_operand.hbm [shape: f32[64,128], index: 10, kind: input, shape index: {}]   ;;  %s4852_s11 = inlined_call_operand.vmem [shape: f32[1,128], index: 11, kind: input, shape index: {}]   ;;  %s4853_s12 = inlined_call_operand.hbm [shape: f32[128,128], index: 12, kind: input, shape index: {}]   ;;  %s4854_s13 = inlined_call_operand.vmem [shape: f32[1,128], index: 13, kind: input, shape index: {}]   ;;  %s4855_s14 = inlined_call_operand.vmem [shape: f32[8,128], index: 14, kind: output, shape index: {}]  }
   0x1   :  { %20 = vsyncpa [#allocation3], 0 }
   0x2   :  { %21 = vsyncpa [#allocation7], 0  ;;  %s3240_s29 = smov [#allocation6]   ;;  %s28_s17 = sshll.u32 %s4841_s0, 4  ;;  %s29_s17 = int_to_ptr.vmem [resolvable:$true] %s28_s17 }
   0x3   :  { %s65_s30 = sshll.u32 %s3240_s29, 4  ;;  %s66_s30 = int_to_ptr.vmem [resolvable:$true] %s65_s30 }
   0x4   :  { %s3170_s18 = scalar_lea.vmem %s66_s30, 1024  ;;  %p3175_p1 = scmp.lt.s32.totalorder %s66_s30, %s66_s30 }
   0x5   :  { %p3171_p0 = scmp.ne.s32.totalorder %s66_s30, %s3170_s18  ;;  %p3176_p2 = scmp.lt.s32.totalorder %s3170_s18, %s3170_s18 }
   0x7   :  { %p3177_p3 = por %p3176_p2, %p3175_p1 }
   0x9   :  { %p3178_p4 = pnand %p3177_p3, %p3171_p0 }
   0xb   :  { %3181 = shalt.err (!%p3178_p4)
}
   0xc   :  { %s3241_s19 = smov 128   ;;  %s3242_s20 = smov 8  }
   0xd   :  { %71 = dma.hbm_to_vmem [thread:$0]  %s4851_s10, 1024, %s66_s30, [#allocation7], %s3241_s19, %s3241_s19, %s3242_s20  }
   0xe   :  { %s3182_s23 = scalar_lea.vmem %s29_s17, 16  ;;  %p3187_p6 = scmp.lt.s32.totalorder %s29_s17, %s29_s17 }
   0xf   :  { %p3183_p5 = scmp.ne.s32.totalorder %s29_s17, %s3182_s23  ;;  %p3188_p7 = scmp.lt.s32.totalorder %s3182_s23, %s3182_s23 }
  0x11   :  { %p3189_p8 = por %p3188_p7, %p3187_p6 }
  0x13   :  { %p3190_p9 = pnand %p3189_p8, %p3183_p5 }
  0x15   :  { %3193 = shalt.err (!%p3190_p9)
}
  0x16   :  { %s3243_s0 = smov [#allocation2]   ;;  %s3244_s24 = smov [#allocation5]  }
  0x17   :  { %31 = dma.vmem_to_smem %s29_s17, 16, %s3243_s0, [#allocation4]  }
  0x18   :  { %s49_s25 = sshll.u32 %s3244_s24, 4  ;;  %s50_s25 = int_to_ptr.vmem [resolvable:$true] %s49_s25 }
  0x19   :  { %s3202_s26 = scalar_lea.vmem %s50_s25, 2048  ;;  %p3207_p11 = scmp.lt.s32.totalorder %s50_s25, %s50_s25 }
  0x1a   :  { %p3203_p10 = scmp.ne.s32.totalorder %s50_s25, %s3202_s26  ;;  %p3208_p12 = scmp.lt.s32.totalorder %s3202_s26, %s3202_s26 }
  0x1c   :  { %p3209_p13 = por %p3208_p12, %p3207_p11 }
  0x1e   :  { %p3210_p0 = pnand %p3209_p13, %p3203_p10 }
  0x20   :  { %3213 = shalt.err (!%p3210_p0)
}
  0x21   :  { %s3245_s10 = smov 256   ;;  %s3246_s27 = smov 16  }
  0x22   :  { %55 = dma.hbm_to_vmem [thread:$0]  %s4848_s7, 2048, %s50_s25, [#allocation3], %s3245_s10, %s3245_s10, %s3246_s27  }
  0x23   :  { %s3247_s30 = smov [#allocation8]  }
  0x24   :  { %s79_s15 = sshll.u32 %s3247_s30, 4  ;;  %s80_s15 = int_to_ptr.vmem [resolvable:$true] %s79_s15 }
  0x25   :  { %s3222_s16 = scalar_lea.vmem %s80_s15, 2048  ;;  %p3227_p2 = scmp.lt.s32.totalorder %s80_s15, %s80_s15 }
  0x26   :  { %p3223_p1 = scmp.ne.s32.totalorder %s80_s15, %s3222_s16  ;;  %p3228_p3 = scmp.lt.s32.totalorder %s3222_s16, %s3222_s16 }
  0x28   :  { %p3229_p4 = por %p3228_p3, %p3227_p2 }
  0x2a   :  { %p3230_p5 = pnand %p3229_p4, %p3223_p1 }
  0x2c   :  { %3233 = shalt.err (!%p3230_p5)
}
  0x2d   :  { %85 = dma.hbm_to_vmem [thread:$0]  %s4853_s12, 2048, %s80_s15, [#allocation7], %s3241_s19, %s3241_s19, %s3242_s20  }
  0x2e   :  { %3234 = dma.done.wait [#allocation4], 16  }
  0x2f   :  { %3235 = vsyncadd [#allocation4], 4294967280 }
  0x30   :  { %3236 = dma.done.wait [#allocation3], 2048  }
  0x31   :  { %3237 = vsyncadd [#allocation3], 4294965248 }
  0x32   :  { %3238 = dma.done.wait [#allocation7], 3072  }
  0x33   :  { %3239 = vsyncadd [#allocation7], 4294964224 }
  0x34   :  { %100 = sfence }
  0x35   :  { %v288_v0 = vld [vmem:[%s4843_s2] sm:$0xff]  ;;  %v3248_v2 = vmov 0   ;;  %v289_v3 = vld [vmem:[%s4843_s2 + $0x8] sm:$0xff]  ;;  %v116_v5 = vld [vmem:[%s4845_s4 + $0x78] sm:$0xff]  ;;  %v125_v33 = vlaneseq  ;;  %v3249_v37 = vmov 1.0   ;;  %s4731_s17 = sld [smem:[#allocation2 + $0x1]] }
  0x36   :  { %v117_v1 = vld [vmem:[%s4842_s1] sm:$0xff]  ;;  %2918 = vset.pattern.permute.xlu0 %v3248_v2  ;;  %2919 = vset.pattern.permute.xlu1 %v3248_v2  ;;  %v118_v4 = vld [vmem:[%s4842_s1 + $0x8] sm:$0xff]  ;;  %v115_v6 = vld [vmem:[%s4845_s4 + $0x70] sm:$0xff]  ;;  %s4733_s18 = sld [smem:[#allocation2 + $0x2]] }
  0x37   :  { %297 = vperm.xlu0 %2918, %v288_v0   ;;  %128 = vperm.xlu1 %2919, %v117_v1   ;;  %v119_v7 = vld [vmem:[%s4842_s1 + $0x10] sm:$0xff]  ;;  %v120_v8 = vld [vmem:[%s4842_s1 + $0x18] sm:$0xff]  ;;  %v114_v9 = vld [vmem:[%s4845_s4 + $0x68] sm:$0xff]  ;;  %v3444_v34 = vand.u32 127, %v125_v33 }
  0x38   :  { %2804 = vmatprep.subr.mxu1 %v116_v5  ;;  %2760 = vmatprep.subr.mxu0 %v116_v5  ;;  %v113_v10 = vld [vmem:[%s4845_s4 + $0x60] sm:$0xff]  ;;  %v290_v11 = vld [vmem:[%s4843_s2 + $0x10] sm:$0xff]  ;;  %v291_v12 = vld [vmem:[%s4843_s2 + $0x18] sm:$0xff] }
  0x39   :  { %2805 = vmatpush3.msra.mxu1 %v116_v5  ;;  %2761 = vmatpush3.msra.mxu0 %v116_v5  ;;  %v112_v13 = vld [vmem:[%s4845_s4 + $0x58] sm:$0xff]  ;;  %v121_v14 = vld [vmem:[%s4842_s1 + $0x20] sm:$0xff]  ;;  %v122_v15 = vld [vmem:[%s4842_s1 + $0x28] sm:$0xff] }
  0x3a   :  { %2806 = vmatprep.subr.mxu1 %v115_v6  ;;  %2762 = vmatprep.subr.mxu0 %v115_v6  ;;  %v111_v16 = vld [vmem:[%s4845_s4 + $0x50] sm:$0xff]  ;;  %v110_v17 = vld [vmem:[%s4845_s4 + $0x48] sm:$0xff]  ;;  %v292_v18 = vld [vmem:[%s4843_s2 + $0x20] sm:$0xff] }
  0x3b   :  { %300 = vperm.xlu0 %2918, %v289_v3   ;;  %131 = vperm.xlu1 %2919, %v118_v4   ;;  %v293_v19 = vld [vmem:[%s4843_s2 + $0x28] sm:$0xff]  ;;  %v109_v20 = vld [vmem:[%s4845_s4 + $0x40] sm:$0xff]  ;;  %v123_v21 = vld [vmem:[%s4842_s1 + $0x30] sm:$0xff] }
  0x3c   :  { %2807 = vmatpush3.msra.mxu1 %v115_v6  ;;  %2763 = vmatpush3.msra.mxu0 %v115_v6  ;;  %v124_v22 = vld [vmem:[%s4842_s1 + $0x38] sm:$0xff]  ;;  %v107_v24 = vld [vmem:[%s4845_s4 + $0x30] sm:$0xff]  ;;  %v106_v27 = vld [vmem:[%s4845_s4 + $0x28] sm:$0xff] }
  0x3d   :  { %2808 = vmatprep.subr.mxu1 %v114_v9  ;;  %2764 = vmatprep.subr.mxu0 %v114_v9  ;;  %v108_v23 = vld [vmem:[%s4845_s4 + $0x38] sm:$0xff]  ;;  %v294_v25 = vld [vmem:[%s4843_s2 + $0x30] sm:$0xff]  ;;  %v105_v28 = vld [vmem:[%s4845_s4 + $0x20] sm:$0xff] }
  0x3e   :  { %2809 = vmatpush3.msra.mxu1 %v114_v9  ;;  %2765 = vmatpush3.msra.mxu0 %v114_v9  ;;  %v295_v26 = vld [vmem:[%s4843_s2 + $0x38] sm:$0xff]  ;;  %v103_v30 = vld [vmem:[%s4845_s4 + $0x10] sm:$0xff]  ;;  %v102_v31 = vld [vmem:[%s4845_s4 + $0x8] sm:$0xff] }
  0x3f   :  { %134 = vperm.xlu0 %2918, %v119_v7   ;;  %137 = vperm.xlu1 %2919, %v120_v8   ;;  %v104_v29 = vld [vmem:[%s4845_s4 + $0x18] sm:$0xff]  ;;  %v101_v32 = vld [vmem:[%s4845_s4] sm:$0xff]  ;;  %v504_v53 = vld [vmem:[%s4846_s5 + $0x70] sm:$0xff] }
  0x40   :  { %2810 = vmatprep.subr.mxu1 %v113_v10  ;;  %2766 = vmatprep.subr.mxu0 %v113_v10  ;;  %v505_v52 = vld [vmem:[%s4846_s5 + $0x78] sm:$0xff]  ;;  %v503_v55 = vld [vmem:[%s4846_s5 + $0x68] sm:$0xff]  ;;  %v3474_v56 = vld [vmem:[#allocation5 + $0x70] sm:$0xff] }
  0x41   :  { %2811 = vmatpush3.msra.mxu1 %v113_v10  ;;  %2767 = vmatpush3.msra.mxu0 %v113_v10  ;;  %v3468_v54 = vld [vmem:[#allocation5 + $0x78] sm:$0xff]  ;;  %v502_v57 = vld [vmem:[%s4846_s5 + $0x60] sm:$0xff]  ;;  %v3480_v58 = vld [vmem:[#allocation5 + $0x68] sm:$0xff] }
  0x42   :  { %2812 = vmatprep.subr.mxu1 %v112_v13  ;;  %2768 = vmatprep.subr.mxu0 %v112_v13  ;;  %4884 = vst [vmem:[#allocation12_spill] sm:$0xff] %v3468_v54  ;;  %v501_v59 = vld [vmem:[%s4846_s5 + $0x58] sm:$0xff]  ;;  %v3486_v60 = vld [vmem:[#allocation5 + $0x60] sm:$0xff]  ;;  %v500_v61 = vld [vmem:[%s4846_s5 + $0x50] sm:$0xff] }
  0x43   :  { %303 = vperm.xlu0 %2918, %v290_v11   ;;  %306 = vperm.xlu1 %2919, %v291_v12   ;;  %v3492_v62 = vld [vmem:[#allocation5 + $0x58] sm:$0xff]  ;;  %v499_v63 = vld [vmem:[%s4846_s5 + $0x48] sm:$0xff]  ;;  %v3498_v0 = vld [vmem:[#allocation5 + $0x50] sm:$0xff] }
  0x44   :  { %2813 = vmatpush3.msra.mxu1 %v112_v13  ;;  %2769 = vmatpush3.msra.mxu0 %v112_v13  ;;  %v498_v1 = vld [vmem:[%s4846_s5 + $0x40] sm:$0xff]  ;;  %v3504_v2 = vld [vmem:[#allocation5 + $0x48] sm:$0xff]  ;;  %v497_v3 = vld [vmem:[%s4846_s5 + $0x38] sm:$0xff] }
  0x45   :  { %2814 = vmatprep.subr.mxu1 %v111_v16  ;;  %2770 = vmatprep.subr.mxu0 %v111_v16  ;;  %v3510_v4 = vld [vmem:[#allocation5 + $0x40] sm:$0xff]  ;;  %v496_v5 = vld [vmem:[%s4846_s5 + $0x30] sm:$0xff]  ;;  %v3515_v6 = vld [vmem:[#allocation5 + $0x38] sm:$0xff] }
  0x46   :  { %2815 = vmatpush3.msra.mxu1 %v111_v16  ;;  %2771 = vmatpush3.msra.mxu0 %v111_v16  ;;  %v495_v7 = vld [vmem:[%s4846_s5 + $0x28] sm:$0xff]  ;;  %v3521_v8 = vld [vmem:[#allocation5 + $0x30] sm:$0xff]  ;;  %v494_v9 = vld [vmem:[%s4846_s5 + $0x20] sm:$0xff] }
  0x47   :  { %140 = vperm.xlu0 %2918, %v121_v14   ;;  %143 = vperm.xlu1 %2919, %v122_v15   ;;  %v3527_v10 = vld [vmem:[#allocation5 + $0x28] sm:$0xff]  ;;  %v493_v11 = vld [vmem:[%s4846_s5 + $0x18] sm:$0xff]  ;;  %v3532_v12 = vld [vmem:[#allocation5 + $0x20] sm:$0xff] }
  0x48   :  { %2816 = vmatprep.subr.mxu1 %v110_v17  ;;  %2772 = vmatprep.subr.mxu0 %v110_v17  ;;  %v492_v13 = vld [vmem:[%s4846_s5 + $0x10] sm:$0xff]  ;;  %v3538_v14 = vld [vmem:[#allocation5 + $0x18] sm:$0xff]  ;;  %v491_v15 = vld [vmem:[%s4846_s5 + $0x8] sm:$0xff] }
  0x49   :  { %2817 = vmatpush3.msra.mxu1 %v110_v17  ;;  %2773 = vmatpush3.msra.mxu0 %v110_v17  ;;  %v3544_v16 = vld [vmem:[#allocation5 + $0x10] sm:$0xff]  ;;  %v3547_v17 = vld [vmem:[#allocation5 + $0x8] sm:$0xff] }
  0x4a   :  { %2818 = vmatprep.subr.mxu1 %v109_v20  ;;  %2774 = vmatprep.subr.mxu0 %v109_v20 }
  0x4b   :  { %309 = vperm.xlu0 %2918, %v292_v18   ;;  %312 = vperm.xlu1 %2919, %v293_v19   ;;  %v490_v18 = vld [vmem:[%s4846_s5] sm:$0xff]  ;;  %s3251_s5 = smov 32  }
  0x4c   :  { %2819 = vmatpush3.msra.mxu1 %v109_v20  ;;  %2775 = vmatpush3.msra.mxu0 %v109_v20  ;;  %v3555_v19 = vld [vmem:[#allocation5] sm:$0xff]  ;;  %v4858_v20 = vmov 0.0  }
  0x4d   :  { %2820 = vmatprep.subr.mxu1 %v108_v23  ;;  %2776 = vmatprep.subr.mxu0 %v108_v23 }
  0x4e   :  { %2821 = vmatpush3.msra.mxu1 %v108_v23  ;;  %2777 = vmatpush3.msra.mxu0 %v108_v23  ;;  %v656_v23 = vld [vmem:[%s4844_s3] sm:$0xff] }
  0x4f   :  { %146 = vperm.xlu0 %2918, %v123_v21   ;;  %149 = vperm.xlu1 %2919, %v124_v22  }
  0x50   :  { %2822 = vmatprep.subr.mxu1 %v107_v24  ;;  %2778 = vmatprep.subr.mxu0 %v107_v24 }
  0x51   :  { %2823 = vmatpush3.msra.mxu1 %v107_v24  ;;  %2779 = vmatpush3.msra.mxu0 %v107_v24 }
  0x52   :  { %2824 = vmatprep.subr.mxu1 %v106_v27  ;;  %2780 = vmatprep.subr.mxu0 %v106_v27 }
  0x53   :  { %315 = vperm.xlu0 %2918, %v294_v25   ;;  %318 = vperm.xlu1 %2919, %v295_v26  }
  0x54   :  { %2825 = vmatpush3.msra.mxu1 %v106_v27  ;;  %2781 = vmatpush3.msra.mxu0 %v106_v27 }
  0x55   :  { %2826 = vmatprep.subr.mxu1 %v105_v28  ;;  %2782 = vmatprep.subr.mxu0 %v105_v28 }
  0x56   :  { %2827 = vmatpush3.msra.mxu1 %v105_v28  ;;  %2783 = vmatpush3.msra.mxu0 %v105_v28 }
  0x57   :  { %2828 = vmatprep.subr.mxu1 %v104_v29  ;;  %2784 = vmatprep.subr.mxu0 %v104_v29 }
  0x58   :  { %2829 = vmatpush3.msra.mxu1 %v104_v29  ;;  %2785 = vmatpush3.msra.mxu0 %v104_v29 }
  0x59   :  { %2830 = vmatprep.subr.mxu1 %v103_v30  ;;  %2786 = vmatprep.subr.mxu0 %v103_v30 }
  0x5a   :  { %2831 = vmatpush3.msra.mxu1 %v103_v30  ;;  %2787 = vmatpush3.msra.mxu0 %v103_v30 }
  0x5b   :  { %2832 = vmatprep.subr.mxu1 %v102_v31  ;;  %2788 = vmatprep.subr.mxu0 %v102_v31 }
  0x5c   :  { %2833 = vmatpush3.msra.mxu1 %v102_v31  ;;  %2789 = vmatpush3.msra.mxu0 %v102_v31 }
  0x5d   :  { %2834 = vmatprep.subr.mxu1 %v101_v32  ;;  %2790 = vmatprep.subr.mxu0 %v101_v32 }
  0x5e   :  { %2835 = vmatpush3.msra.mxu1 %v101_v32  ;;  %2791 = vmatpush3.msra.mxu0 %v101_v32 }
  0x5f   :  { %559 = vmatprep.subr.mxu0 %v505_v52  ;;  %743 = vmatprep.subr.mxu1 %v3468_v54 }
  0xb2   :  { %v298_v35 = vpop.permute.xlu0 %297  ;;  %v129_v36 = vpop.permute.xlu1 %128 }
  0xb3   :  { %vm320_vm0 = vcmp.eq.s32.totalorder %v3444_v34, %v298_v35  ;;  %vm151_vm1 = vcmp.eq.s32.totalorder %v3444_v34, %v129_v36  ;;  %v3600_v36 = vshrl.u32 %v125_v33, 7 }
  0xb4   :  { %2836 = vmatprep.mubr.msk.f32.mxu1 %vm320_vm0, %v3249_v37  ;;  %2792 = vmatprep.mubr.msk.f32.mxu0 %vm151_vm1, %v3249_v37  ;;  %vm481_vm0 = vcmask 261120   ;;  %vm518_vm1 = vcmask 523264  }
  0xb6   :  { %v301_v38 = vpop.permute.xlu0 %300  ;;  %v132_v39 = vpop.permute.xlu1 %131 }
  0xb7   :  { %vm321_vm2 = vcmp.eq.s32.totalorder %v3444_v34, %v301_v38  ;;  %vm152_vm3 = vcmp.eq.s32.totalorder %v3444_v34, %v132_v39  ;;  %v4857_v39 = vsub.s32 0, %v3600_v36 }
  0xb8   :  { %2837 = vmatmul.mubr.msk.f32.vlgmr.msra.gmra.mxu1 %vm321_vm2, %v3249_v37  ;;  %2793 = vmatmul.mubr.msk.f32.vlgmr.msra.gmra.mxu0 %vm152_vm3, %v3249_v37 }
  0xb9   :  { %560 = vmatpush1.msra.mxu0 %v504_v53  ;;  %744 = vmatpush1.msra.mxu1 %v3474_v56 }
  0xba   :  { %v135_v40 = vpop.permute.xlu0 %134  ;;  %v138_v41 = vpop.permute.xlu1 %137  ;;  %561 = vmatprep.subr.mxu0 %v503_v55  ;;  %745 = vmatprep.subr.mxu1 %v3480_v58 }
  0xbb   :  { %vm153_vm4 = vcmp.eq.s32.totalorder %v3444_v34, %v135_v40  ;;  %vm154_vm5 = vcmp.eq.s32.totalorder %v3444_v34, %v138_v41  ;;  %562 = vmatpush1.msra.mxu0 %v502_v57  ;;  %746 = vmatpush1.msra.mxu1 %v3486_v60 }
  0xbc   :  { %2795 = vmatprep.mubr.msk.f32.mxu0 %vm153_vm4, %v3249_v37  ;;  %563 = vmatprep.subr.mxu0 %v501_v59 }
  0xbd   :  { %2796 = vmatmul.mubr.msk.f32.gmra.mxu0 %vm154_vm5, %v3249_v37  ;;  %747 = vmatprep.subr.mxu1 %v3492_v62 }
  0xbe   :  { %v304_v42 = vpop.permute.xlu0 %303  ;;  %v307_v43 = vpop.permute.xlu1 %306  ;;  %564 = vmatpush1.msra.mxu0 %v500_v61  ;;  %748 = vmatpush1.msra.mxu1 %v3498_v0 }
  0xbf   :  { %vm322_vm6 = vcmp.eq.s32.totalorder %v3444_v34, %v304_v42  ;;  %vm323_vm7 = vcmp.eq.s32.totalorder %v3444_v34, %v307_v43  ;;  %565 = vmatprep.subr.mxu0 %v499_v63  ;;  %749 = vmatprep.subr.mxu1 %v3504_v2  ;;  %v506_v42 = vld [vmem:[%s4847_s6] sm:$0x3]  ;;  %v4856_v43 = vsub.s32 1, %v3600_v36  ;;  %s3252_s6 = smov 64  }
  0xc0   :  { %2839 = vmatprep.mubr.msk.f32.mxu1 %vm322_vm6, %v3249_v37  ;;  %566 = vmatpush1.msra.mxu0 %v498_v1 }
  0xc1   :  { %2840 = vmatmul.mubr.msk.f32.gmra.mxu1 %vm323_vm7, %v3249_v37  ;;  %567 = vmatprep.subr.mxu0 %v497_v3 }
  0xc2   :  { %v141_v44 = vpop.permute.xlu0 %140  ;;  %v144_v45 = vpop.permute.xlu1 %143  ;;  %750 = vmatpush1.msra.mxu1 %v3510_v4  ;;  %568 = vmatpush1.msra.mxu0 %v496_v5  ;;  %v3628_v5 = vadd.s32 128, %v3444_v34 }
  0xc3   :  { %vm155_vm8 = vcmp.eq.s32.totalorder %v3444_v34, %v141_v44  ;;  %vm156_vm9 = vcmp.eq.s32.totalorder %v3444_v34, %v144_v45  ;;  %751 = vmatprep.subr.mxu1 %v3515_v6  ;;  %569 = vmatprep.subr.mxu0 %v495_v7  ;;  %v3615_v44 = vrot.slane %v506_v42, %v4857_v39 }
  0xc4   :  { %2798 = vmatprep.mubr.msk.f32.mxu0 %vm155_vm8, %v3249_v37  ;;  %752 = vmatpush1.msra.mxu1 %v3521_v8  ;;  %vm672_vm2 = vcmp.lt.s32.totalorder %v3628_v5, 192  ;;  %v2412_v5 = vld [vmem:[#allocation6 + $0x18] sm:$0xff] }
  0xc5   :  { %2799 = vmatmul.mubr.msk.f32.gmra.mxu0 %vm156_vm9, %v3249_v37  ;;  %753 = vmatprep.subr.mxu1 %v3527_v10  ;;  %4892 = vst [vmem:[#allocation20_spill] sm:$0xff] %v3615_v44 }
  0xc6   :  { %v310_v46 = vpop.permute.xlu0 %309  ;;  %v313_v47 = vpop.permute.xlu1 %312  ;;  %570 = vmatpush1.msra.mxu0 %v494_v9  ;;  %754 = vmatpush1.msra.mxu1 %v3532_v12 }
  0xc7   :  { %vm324_vm10 = vcmp.eq.s32.totalorder %v3444_v34, %v310_v46  ;;  %vm325_vm11 = vcmp.eq.s32.totalorder %v3444_v34, %v313_v47  ;;  %571 = vmatprep.subr.mxu0 %v493_v11  ;;  %755 = vmatprep.subr.mxu1 %v3538_v14  ;;  %v3623_v46 = vrot.slane %v506_v42, %v4856_v43  ;;  %v3838_v43 = vld [vmem:[%s4849_s8 + $0x40] sm:$0xff] }
  0xc8   :  { %2842 = vmatprep.mubr.msk.f32.mxu1 %vm324_vm10, %v3249_v37  ;;  %572 = vmatpush1.msra.mxu0 %v492_v13  ;;  %4895 = vst [vmem:[#allocation23_spill] sm:$0xff] %v3838_v43 }
  0xc9   :  { %2843 = vmatmul.mubr.msk.f32.gmra.mxu1 %vm325_vm11, %v3249_v37  ;;  %573 = vmatprep.subr.mxu0 %v491_v15  ;;  %vm3253_vm11 = vmmov 0  }
  0xca   :  { %v147_v48 = vpop.permute.xlu0 %146  ;;  %v150_v49 = vpop.permute.xlu1 %149  ;;  %756 = vmatpush1.msra.mxu1 %v3544_v16  ;;  %574 = vmatpush1.msra.mxu0 %v490_v18 }
  0xcb   :  { %vm157_vm12 = vcmp.eq.s32.totalorder %v3444_v34, %v147_v48  ;;  %vm158_vm13 = vcmp.eq.s32.totalorder %v3444_v34, %v150_v49  ;;  %757 = vmatprep.subr.mxu1 %v3547_v17 }
  0xcc   :  { %2801 = vmatprep.mubr.msk.f32.mxu0 %vm157_vm12, %v3249_v37  ;;  %758 = vmatpush1.msra.mxu1 %v3555_v19 }
  0xcd   :  { %2802 = vmatmul.mubr.msk.f32.gmra.mxu0 %vm158_vm13, %v3249_v37  ;;  %848 = vmatprep.subr.mxu1 %v3468_v54 }
  0xce   :  { %v316_v50 = vpop.permute.xlu0 %315  ;;  %v319_v51 = vpop.permute.xlu1 %318  ;;  %607 = vmatprep.mubr.f32.mxu0 %v4858_v20 }
  0xcf   :  { %vm326_vm14 = vcmp.eq.s32.totalorder %v3444_v34, %v316_v50  ;;  %vm327_vm15 = vcmp.eq.s32.totalorder %v3444_v34, %v319_v51 }
  0xd0   :  { %2845 = vmatprep.mubr.msk.f32.mxu1 %vm326_vm14, %v3249_v37 }
  0xd1   :  { %2846 = vmatmul.mubr.msk.f32.gmra.mxu1 %vm327_vm15, %v3249_v37 }
  0xd2   :  { %791 = vmatprep.mubr.f32.mxu1 %v4858_v20 }
  0xd5   :  { %792 = vmatmul.mubr.f32.vlgmr.msra.gmra.mxu1 %v4858_v20 }
  0xd6   :  { %849 = vmatpush1.msra.mxu1 %v3474_v56  ;;  %896 = vmatprep.mubr.f32.mxu1 %v4858_v20 }
  0xd7   :  { %850 = vmatprep.subr.mxu1 %v3480_v58 }
  0xd8   :  { %851 = vmatpush1.msra.mxu1 %v3486_v60 }
  0xd9   :  { %852 = vmatprep.subr.mxu1 %v3492_v62 }
  0xda   :  { %853 = vmatpush1.msra.mxu1 %v3498_v0 }
  0xdb   :  { %854 = vmatprep.subr.mxu1 %v3504_v2 }
  0xdc   :  { %855 = vmatpush1.msra.mxu1 %v3510_v4 }
  0xdd   :  { %856 = vmatprep.subr.mxu1 %v3515_v6 }
  0xde   :  { %857 = vmatpush1.msra.mxu1 %v3521_v8 }
  0xdf   :  { %858 = vmatprep.subr.mxu1 %v3527_v10 }
  0xe0   :  { %859 = vmatpush1.msra.mxu1 %v3532_v12 }
  0xe1   :  { %860 = vmatprep.subr.mxu1 %v3538_v14 }
  0xe2   :  { %861 = vmatpush1.msra.mxu1 %v3544_v16 }
  0xe3   :  { %862 = vmatprep.subr.mxu1 %v3547_v17 }
  0xe4   :  { %863 = vmatpush1.msra.mxu1 %v3555_v19 }
  0xe5   :  { %1064 = vmatprep.subr.mxu1 %v3468_v54 }
 0x178   :  { %v3570_v21 = vpop.f32.mrf.mxu1  ;;  %v3585_v24 = vpop.f32.mrf.mxu0 }
 0x179   :  { %4885 = vst [vmem:[#allocation13_spill] sm:$0xff] %v3585_v24 }
 0x17a   :  { %v410_v22 = vpop.f32.mrf.mxu1  ;;  %v3587_v25 = vpop.f32.mrf.mxu0 }
 0x17b   :  { %457 = vrot.lane.b32.xlu0 %v410_v22, %s3251_s5  ;;  %4886 = vst [vmem:[#allocation14_spill] sm:$0xff] %v3587_v25 }
 0x17d   :  { %v3593_v28 = vpop.f32.mrf.mxu0 }
 0x17e   :  { %4887 = vst [vmem:[#allocation15_spill] sm:$0xff] %v3593_v28 }
 0x17f   :  { %658 = vperm.xlu0 %2918, %v656_v23   ;;  %v3595_v30 = vpop.f32.mrf.mxu0 }
 0x180   :  { %4888 = vst [vmem:[#allocation16_spill] sm:$0xff] %v3595_v30 }
 0x181   :  { %v2841_v29 = vpop.f32.mrf.mxu1 }
 0x183   :  { %v420_v31 = vpop.f32.mrf.mxu1 }
 0x185   :  { %v3597_v32 = vpop.f32.mrf.mxu0 }
 0x186   :  { %4889 = vst [vmem:[#allocation17_spill] sm:$0xff] %v3597_v32 }
 0x187   :  { %v3602_v37 = vpop.f32.mrf.mxu0 }
 0x188   :  { %4890 = vst [vmem:[#allocation18_spill] sm:$0xff] %v3602_v37 }
 0x189   :  { %v2844_v35 = vpop.f32.mrf.mxu1 }
 0x18b   :  { %v3604_v38 = vpop.f32.mrf.mxu1 }
 0x18d   :  { %v3607_v40 = vpop.f32.mrf.mxu0 }
 0x18e   :  { %4891 = vst [vmem:[#allocation19_spill] sm:$0xff] %v3607_v40 }
 0x18f   :  { %v3617_v33 = vpop.f32.mrf.mxu0 }
 0x190   :  { %4893 = vst [vmem:[#allocation21_spill] sm:$0xff] %v3617_v33 }
 0x191   :  { %v2847_v41 = vpop.f32.mrf.mxu1 }
 0x193   :  { %v3619_v45 = vpop.f32.mrf.mxu1 }
 0x195   :  { %v793_v48 = vpop.f32.mrf.mxu1 }
 0x197   :  { %v795_v53 = vpop.f32.mrf.mxu1 }
 0x1ed   :  { %v458_v26 = vpop.permute.xlu0 %457 }
 0x1ee   :  { %v482_v27 = vsel %vm481_vm0, %v3587_v25, %v458_v26  ;;  %v4905_v25 = vmov 0.0  }
 0x1ef   :  { %2633 = vmatmul.mubr.msk.f32.vlgmr.msra.gmra.mxu0 %vm518_vm1, %v482_v27 }
 0x1f0   :  { %613 = vmatprep.mubr.f32.mxu0 %v4858_v20 }
 0x1fa   :  { %v3643_v27 = vpop.permute.xlu0 %658 }
 0x1fb   :  { %vm660_vm3 = vcmp.gt.s32.totalorder %v3643_v27, 0  ;;  %vm661_vm4 = vcmp.gt.s32.totalorder %v3643_v27, 1  ;;  %vm662_vm5 = vcmp.gt.s32.totalorder %v3643_v27, 2  ;;  %vm663_vm6 = vcmp.gt.s32.totalorder %v3643_v27, 3 }
 0x1fc   :  { %vm664_vm7 = vcmp.gt.s32.totalorder %v3643_v27, 4  ;;  %vm665_vm8 = vcmp.gt.s32.totalorder %v3643_v27, 5  ;;  %vm666_vm9 = vcmp.gt.s32.totalorder %v3643_v27, 6  ;;  %vm667_vm10 = vcmp.gt.s32.totalorder %v3643_v27, 7  ;;  %v2510_v27 = vld [vmem:[#allocation8 + $0x50] sm:$0xff] }
 0x2af   :  { %v609_v47 = vpop.f32.mrf.mxu0 }
 0x2b0   :  { %v610_v49 = vadd.f32 %v609_v47, %v3615_v44 }
 0x2b1   :  { %v611_v50 = vpop.f32.mrf.mxu0 }
 0x2b2   :  { %v798_v51 = vadd.f32 %v793_v48, %v610_v49  ;;  %v612_v52 = vadd.f32 %v611_v50, %v3623_v46 }
 0x2b4   :  { %v2641_v55 = vmul.f32 -1.442695, %v798_v51  ;;  %v799_v57 = vadd.f32 %v795_v53, %v612_v52 }
 0x2b6   :  { %2920 = vpow2.f32 %v2641_v55  ;;  %v2642_v59 = vmul.f32 -1.442695, %v799_v57 }
 0x2b8   :  { %2922 = vpow2.f32 %v2642_v59 }
 0x2b9   :  { %2924 = vtanh.f32 %v799_v57 }
 0x2c3   :  { %v2921_v61 = vpop.eup %2920 }
 0x2c4   :  { %v808_v1 = vadd.f32 1.0, %v2921_v61 }
 0x2c5   :  { %v2923_v63 = vpop.eup %2922 }
 0x2c6   :  { %v809_v3 = vadd.f32 1.0, %v2923_v63  ;;  %v2925_v7 = vpop.eup %2924 }
 0x2c8   :  { %2926 = vrcp.f32 %v809_v3 }
 0x2c9   :  { %2928 = vrcp.f32 %v808_v1 }
 0x2d5   :  { %v2927_v9 = vpop.eup %2926 }
 0x2d6   :  { %v2929_v11 = vpop.eup %2928  ;;  %v815_v13 = vsel %vm672_vm2, %v2925_v7, %v2927_v9 }
 0x2d7   :  { %v817_v15 = vmul.f32 %v2929_v11, %v815_v13  ;;  %v816_v18 = vmul.f32 0.0, %v2929_v11 }
 0x2d9   :  { %819 = vrot.lane.b32.xlu1 %v817_v15, %s3252_s6 }
 0x2dd   :  { %459 = vrot.lane.b32.xlu1 %v3570_v21, %s3251_s5 }
 0x34b   :  { %v820_v22 = vpop.permute.xlu1 %819 }
 0x34c   :  { %v3636_v23 = vadd.f32 %v820_v22, %v816_v18 }
 0x34e   :  { %2930 = vtanh.f32 %v3636_v23 }
 0x34f   :  { %v460_v34 = vpop.permute.xlu1 %459 }
 0x350   :  { %v483_v26 = vsel %vm481_vm0, %v3585_v24, %v460_v34  ;;  %v3693_v34 = vld [vmem:[%s4849_s8 + $0xf8] sm:$0xff] }
 0x351   :  { %2634 = vmatmul.mubr.msk.f32.gmra.mxu0 %vm518_vm1, %v483_v26  ;;  %v3698_v26 = vld [vmem:[%s4849_s8 + $0xf0] sm:$0xff]  ;;  %945 = vmatprep.subr.mxu0 %v3693_v34 }
 0x352   :  { %619 = vmatprep.mubr.f32.mxu0 %v4858_v20  ;;  %946 = vmatpush1.msra.mxu0 %v3698_v26 }
 0x35b   :  { %v2931_v42 = vpop.eup %2930 }
 0x35c   :  { %v824_v47 = vmul.f32 %v2931_v42, %v815_v13  ;;  %v3703_v42 = vld [vmem:[%s4849_s8 + $0xe8] sm:$0xff] }
 0x35d   :  { %947 = vmatprep.subr.mxu0 %v3703_v42 }
 0x35e   :  { %v3648_v21 = vsel %vm660_vm3, %v824_v47, 0.0  ;;  %v3709_v47 = vld [vmem:[%s4849_s8 + $0xe0] sm:$0xff] }
 0x35f   :  { %828 = vrot.lane.b32.xlu0 %v3648_v21, %s3252_s6  ;;  %948 = vmatpush1.msra.mxu0 %v3709_v47 }
 0x363   :  { %461 = vrot.lane.b32.xlu0 %v420_v31, %s3251_s5 }
 0x367   :  { %463 = vrot.lane.b32.xlu0 %v2841_v29, %s3251_s5 }
 0x36b   :  { %467 = vrot.lane.b32.xlu0 %v2844_v35, %s3251_s5 }
 0x36f   :  { %471 = vrot.lane.b32.xlu0 %v2847_v41, %s3251_s5 }
 0x3d1   :  { %v3656_v48 = vpop.permute.xlu0 %828 }
 0x3d2   :  { %2643 = vmatmul.mubr.msk.f32.vlgmr.msra.gmra.mxu1 %vm518_vm1, %v3656_v48 }
 0x3d3   :  { %1065 = vmatpush1.msra.mxu1 %v3474_v56  ;;  %1112 = vmatprep.mubr.f32.mxu1 %v4858_v20 }
 0x3d4   :  { %1066 = vmatprep.subr.mxu1 %v3480_v58 }
 0x3d5   :  { %v462_v49 = vpop.permute.xlu0 %461  ;;  %1067 = vmatpush1.msra.mxu1 %v3486_v60 }
 0x3d6   :  { %v484_v29 = vsel %vm481_vm0, %v3595_v30, %v462_v49  ;;  %1068 = vmatprep.subr.mxu1 %v3492_v62  ;;  %v3715_v49 = vld [vmem:[%s4849_s8 + $0xd8] sm:$0xff]  ;;  %v3890_v30 = vld [vmem:[%s4849_s8 + $0x8] sm:$0xff] }
 0x3d7   :  { %2635 = vmatmul.mubr.msk.f32.gmra.mxu0 %vm518_vm1, %v484_v29  ;;  %1069 = vmatpush1.msra.mxu1 %v3498_v0  ;;  %v3721_v29 = vld [vmem:[%s4849_s8 + $0xd0] sm:$0xff]  ;;  %4903 = vst [vmem:[#allocation31_spill] sm:$0xff] %v3890_v30 }
 0x3d8   :  { %625 = vmatprep.mubr.f32.mxu0 %v4858_v20  ;;  %1070 = vmatprep.subr.mxu1 %v3504_v2 }
 0x3d9   :  { %v464_v31 = vpop.permute.xlu0 %463  ;;  %1071 = vmatpush1.msra.mxu1 %v3510_v4  ;;  %949 = vmatprep.subr.mxu0 %v3715_v49 }
 0x3da   :  { %v485_v35 = vsel %vm481_vm0, %v3593_v28, %v464_v31  ;;  %1072 = vmatprep.subr.mxu1 %v3515_v6  ;;  %v3727_v31 = vld [vmem:[%s4849_s8 + $0xc8] sm:$0xff]  ;;  %950 = vmatpush1.msra.mxu0 %v3721_v29  ;;  %v3885_v28 = vld [vmem:[%s4849_s8 + $0x10] sm:$0xff] }
 0x3db   :  { %2636 = vmatmul.mubr.msk.f32.gmra.mxu0 %vm518_vm1, %v485_v35  ;;  %1073 = vmatpush1.msra.mxu1 %v3521_v8  ;;  %v3733_v35 = vld [vmem:[%s4849_s8 + $0xc0] sm:$0xff]  ;;  %4902 = vst [vmem:[#allocation30_spill] sm:$0xff] %v3885_v28 }
 0x3dc   :  { %1074 = vmatprep.subr.mxu1 %v3527_v10  ;;  %631 = vmatprep.mubr.f32.mxu0 %v4858_v20  ;;  %v3880_v20 = vld [vmem:[%s4849_s8 + $0x18] sm:$0xff] }
 0x3dd   :  { %1075 = vmatpush1.msra.mxu1 %v3532_v12  ;;  %951 = vmatprep.subr.mxu0 %v3727_v31  ;;  %4901 = vst [vmem:[#allocation29_spill] sm:$0xff] %v3880_v20 }
 0x3de   :  { %1076 = vmatprep.subr.mxu1 %v3538_v14  ;;  %952 = vmatpush1.msra.mxu0 %v3733_v35 }
 0x3df   :  { %1077 = vmatpush1.msra.mxu1 %v3544_v16 }
 0x3e0   :  { %1078 = vmatprep.subr.mxu1 %v3547_v17 }
 0x3e1   :  { %1079 = vmatpush1.msra.mxu1 %v3555_v19 }
 0x3e2   :  { %1269 = vmatprep.subr.mxu1 %v3468_v54 }
 0x411   :  { %v615_v41 = vpop.f32.mrf.mxu0 }
 0x412   :  { %v616_v51 = vadd.f32 %v615_v41, %v3615_v44  ;;  %v3739_v41 = vld [vmem:[%s4849_s8 + $0xb8] sm:$0xff] }
 0x413   :  { %v617_v50 = vpop.f32.mrf.mxu0  ;;  %953 = vmatprep.subr.mxu0 %v3739_v41 }
 0x414   :  { %v618_v53 = vadd.f32 %v617_v50, %v3623_v46  ;;  %v3745_v50 = vld [vmem:[%s4849_s8 + $0xb0] sm:$0xff] }
 0x415   :  { %954 = vmatpush1.msra.mxu0 %v3745_v50 }
 0x492   :  { %v898_v52 = vpop.f32.mrf.mxu1 }
 0x493   :  { %v903_v55 = vadd.f32 %v898_v52, %v616_v51  ;;  %v3751_v51 = vld [vmem:[%s4849_s8 + $0xa8] sm:$0xff]  ;;  %v3759_v52 = vsel %vm660_vm3, %v3636_v23, 0.0  ;;  %v3779_v23 = vld [vmem:[%s4849_s8 + $0x90] sm:$0xff] }
 0x494   :  { %v900_v57 = vpop.f32.mrf.mxu1  ;;  %955 = vmatprep.subr.mxu0 %v3751_v51 }
 0x495   :  { %v2644_v59 = vmul.f32 -1.442695, %v903_v55  ;;  %v904_v61 = vadd.f32 %v900_v57, %v618_v53 }
 0x497   :  { %2932 = vpow2.f32 %v2644_v59  ;;  %v2645_v63 = vmul.f32 -1.442695, %v904_v61  ;;  %v3768_v59 = vld [vmem:[%s4849_s8 + $0xa0] sm:$0xff] }
 0x498   :  { %956 = vmatpush1.msra.mxu0 %v3768_v59 }
 0x499   :  { %2934 = vpow2.f32 %v2645_v63  ;;  %v3784_v63 = vld [vmem:[%s4849_s8 + $0x88] sm:$0xff] }
 0x49a   :  { %2936 = vtanh.f32 %v904_v61  ;;  %v3774_v61 = vld [vmem:[%s4849_s8 + $0x98] sm:$0xff] }
 0x49b   :  { %957 = vmatprep.subr.mxu0 %v3774_v61 }
 0x49c   :  { %958 = vmatpush1.msra.mxu0 %v3779_v23 }
 0x49d   :  { %959 = vmatprep.subr.mxu0 %v3784_v63 }
 0x4a4   :  { %v2933_v1 = vpop.eup %2932 }
 0x4a5   :  { %v913_v7 = vadd.f32 1.0, %v2933_v1  ;;  %v3792_v1 = vld [vmem:[%s4849_s8 + $0x80] sm:$0xff] }
 0x4a6   :  { %v2935_v3 = vpop.eup %2934  ;;  %960 = vmatpush1.msra.mxu0 %v3792_v1 }
 0x4a7   :  { %v914_v9 = vadd.f32 1.0, %v2935_v3  ;;  %v2937_v11 = vpop.eup %2936  ;;  %v3798_v3 = vld [vmem:[%s4849_s8 + $0x78] sm:$0xff] }
 0x4a8   :  { %961 = vmatprep.subr.mxu0 %v3798_v3 }
 0x4a9   :  { %2938 = vrcp.f32 %v914_v9  ;;  %v3808_v9 = vld [vmem:[%s4849_s8 + $0x68] sm:$0xff] }
 0x4aa   :  { %2940 = vrcp.f32 %v913_v7  ;;  %v3803_v7 = vld [vmem:[%s4849_s8 + $0x70] sm:$0xff] }
 0x4ab   :  { %962 = vmatpush1.msra.mxu0 %v3803_v7 }
 0x4ac   :  { %963 = vmatprep.subr.mxu0 %v3808_v9 }
 0x4b6   :  { %v2939_v13 = vpop.eup %2938 }
 0x4b7   :  { %v2941_v15 = vpop.eup %2940  ;;  %v920_v18 = vsel %vm672_vm2, %v2937_v11, %v2939_v13  ;;  %v3816_v11 = vld [vmem:[%s4849_s8 + $0x60] sm:$0xff] }
 0x4b8   :  { %v922_v22 = vmul.f32 %v2941_v15, %v920_v18  ;;  %v921_v53 = vmul.f32 %v2941_v15, %v3759_v52  ;;  %964 = vmatpush1.msra.mxu0 %v3816_v11  ;;  %v3822_v15 = vld [vmem:[%s4849_s8 + $0x58] sm:$0xff] }
 0x4b9   :  { %965 = vmatprep.subr.mxu0 %v3822_v15 }
 0x4ba   :  { %924 = vrot.lane.b32.xlu1 %v922_v22, %s3252_s6  ;;  %v3827_v22 = vld [vmem:[%s4849_s8 + $0x50] sm:$0xff] }
 0x4bb   :  { %966 = vmatpush1.msra.mxu0 %v3827_v22 }
 0x52c   :  { %v925_v55 = vpop.permute.xlu1 %924 }
 0x52d   :  { %v3762_v57 = vadd.f32 %v925_v55, %v921_v53  ;;  %v3832_v53 = vld [vmem:[%s4849_s8 + $0x48] sm:$0xff] }
 0x52e   :  { %4894 = vst [vmem:[#allocation22_spill] sm:$0xff] %v3832_v53  ;;  %967 = vmatprep.subr.mxu0 %v3832_v53 }
 0x52f   :  { %2942 = vtanh.f32 %v3762_v57  ;;  %968 = vmatpush1.msra.mxu0 %v3838_v43 }
 0x53c   :  { %v2943_v13 = vpop.eup %2942 }
 0x53d   :  { %v929_v55 = vmul.f32 %v2943_v13, %v920_v18  ;;  %v3854_v18 = vld [vmem:[%s4849_s8 + $0x38] sm:$0xff]  ;;  %v3859_v13 = vld [vmem:[%s4849_s8 + $0x30] sm:$0xff] }
 0x53e   :  { %4897 = vst [vmem:[#allocation25_spill] sm:$0xff] %v3854_v18  ;;  %4898 = vst [vmem:[#allocation26_spill] sm:$0xff] %v3859_v13  ;;  %969 = vmatprep.subr.mxu0 %v3854_v18 }
 0x53f   :  { %v3845_v39 = vsel %vm661_vm4, %v929_v55, %v3648_v21  ;;  %v3864_v21 = vld [vmem:[%s4849_s8 + $0x28] sm:$0xff]  ;;  %v3870_v55 = vld [vmem:[%s4849_s8 + $0x20] sm:$0xff]  ;;  %970 = vmatpush1.msra.mxu0 %v3859_v13 }
 0x540   :  { %4896 = vst [vmem:[#allocation24_spill] sm:$0xff] %v3845_v39  ;;  %1044 = vrot.lane.b32.xlu1 %v3845_v39, %s3252_s6  ;;  %4899 = vst [vmem:[#allocation27_spill] sm:$0xff] %v3864_v21  ;;  %971 = vmatprep.subr.mxu0 %v3864_v21  ;;  %v468_v39 = vpop.permute.xlu0 %467 }
 0x541   :  { %4900 = vst [vmem:[#allocation28_spill] sm:$0xff] %v3870_v55  ;;  %972 = vmatpush1.msra.mxu0 %v3870_v55 }
 0x542   :  { %973 = vmatprep.subr.mxu0 %v3880_v20 }
 0x543   :  { %974 = vmatpush1.msra.mxu0 %v3885_v28 }
 0x544   :  { %465 = vrot.lane.b32.xlu1 %v3604_v38, %s3251_s5  ;;  %v3896_v38 = vld [vmem:[%s4849_s8] sm:$0xff]  ;;  %975 = vmatprep.subr.mxu0 %v3890_v30 }
 0x545   :  { %4904 = vst [vmem:[#allocation32_spill] sm:$0xff] %v3896_v38  ;;  %976 = vmatpush1.msra.mxu0 %v3896_v38 }
 0x546   :  { %1150 = vmatprep.subr.mxu0 %v3693_v34 }
 0x548   :  { %469 = vrot.lane.b32.xlu1 %v3619_v45, %s3251_s5 }
 0x5b2   :  { %v3904_v24 = vpop.permute.xlu1 %1044 }
 0x5b3   :  { %2649 = vmatmul.mubr.msk.f32.vlgmr.msra.gmra.mxu1 %vm518_vm1, %v3904_v24 }
 0x5b4   :  { %1270 = vmatpush1.msra.mxu1 %v3474_v56  ;;  %1317 = vmatprep.mubr.f32.mxu1 %v4905_v25  ;;  %v487_v56 = vsel %vm481_vm0, %v3597_v32, %v468_v39 }
 0x5b5   :  { %1271 = vmatprep.subr.mxu1 %v3480_v58 }
 0x5b6   :  { %v466_v54 = vpop.permute.xlu1 %465  ;;  %1272 = vmatpush1.msra.mxu1 %v3486_v60  ;;  %v472_v60 = vpop.permute.xlu0 %471 }
 0x5b7   :  { %v486_v45 = vsel %vm481_vm0, %v3602_v37, %v466_v54  ;;  %1273 = vmatprep.subr.mxu1 %v3492_v62  ;;  %v489_v62 = vsel %vm481_vm0, %v3607_v40, %v472_v60 }
 0x5b8   :  { %2637 = vmatmul.mubr.msk.f32.gmra.mxu0 %vm518_vm1, %v486_v45  ;;  %1274 = vmatpush1.msra.mxu1 %v3498_v0  ;;  %v621_v0 = vpop.f32.mrf.mxu0 }
 0x5b9   :  { %637 = vmatprep.mubr.f32.mxu0 %v4905_v25  ;;  %1275 = vmatprep.subr.mxu1 %v3504_v2 }
 0x5ba   :  { %1276 = vmatpush1.msra.mxu1 %v3510_v4  ;;  %v470_v58 = vpop.permute.xlu1 %469  ;;  %v623_v2 = vpop.f32.mrf.mxu0  ;;  %v622_v4 = vadd.f32 %v621_v0, %v3615_v44 }
 0x5bb   :  { %1277 = vmatprep.subr.mxu1 %v3515_v6  ;;  %v488_v54 = vsel %vm481_vm0, %v3617_v33, %v470_v58 }
 0x5bc   :  { %2638 = vmatmul.mubr.msk.f32.gmra.mxu0 %vm518_vm1, %v487_v56  ;;  %1278 = vmatpush1.msra.mxu1 %v3521_v8  ;;  %v3977_v6 = vpop.f32.mrf.mxu0 }
 0x5bd   :  { %643 = vmatprep.mubr.f32.mxu0 %v4905_v25  ;;  %1279 = vmatprep.subr.mxu1 %v3527_v10  ;;  %v624_v10 = vadd.f32 %v623_v2, %v3623_v46 }
 0x5be   :  { %1280 = vmatpush1.msra.mxu1 %v3532_v12 }
 0x5bf   :  { %1281 = vmatprep.subr.mxu1 %v3538_v14 }
 0x5c0   :  { %2639 = vmatmul.mubr.msk.f32.gmra.mxu0 %vm518_vm1, %v488_v54  ;;  %1282 = vmatpush1.msra.mxu1 %v3544_v16  ;;  %v3980_v16 = vpop.f32.mrf.mxu0 }
 0x5c1   :  { %649 = vmatprep.mubr.f32.mxu0 %v4905_v25  ;;  %1283 = vmatprep.subr.mxu1 %v3547_v17 }
 0x5c2   :  { %1284 = vmatpush1.msra.mxu1 %v3555_v19 }
 0x5c3   :  { %1355 = vmatprep.subr.mxu1 %v3693_v34 }
 0x5c4   :  { %2640 = vmatmul.mubr.msk.f32.gmra.mxu0 %vm518_vm1, %v489_v62  ;;  %v723_v62 = vld [vmem:[%s4850_s9] sm:$0x3] }
 0x5c5   :  { %1009 = vmatprep.mubr.f32.mxu0 %v4905_v25 }
 0x5c8   :  { %2646 = vmatmul.mubr.msk.f32.vlgmr.msra.gmra.mxu0 %vm518_vm1, %v3656_v48 }
 0x5c9   :  { %1151 = vmatpush1.msra.mxu0 %v3698_v26  ;;  %1214 = vmatprep.mubr.f32.mxu0 %v4905_v25 }
 0x5ca   :  { %1152 = vmatprep.subr.mxu0 %v3703_v42 }
 0x5cb   :  { %1153 = vmatpush1.msra.mxu0 %v3709_v47 }
 0x5cc   :  { %1154 = vmatprep.subr.mxu0 %v3715_v49 }
 0x5cd   :  { %1155 = vmatpush1.msra.mxu0 %v3721_v29 }
 0x5ce   :  { %1156 = vmatprep.subr.mxu0 %v3727_v31 }
 0x5cf   :  { %1157 = vmatpush1.msra.mxu0 %v3733_v35 }
 0x5d0   :  { %1158 = vmatprep.subr.mxu0 %v3739_v41 }
 0x5d1   :  { %1159 = vmatpush1.msra.mxu0 %v3745_v50 }
 0x5d2   :  { %1160 = vmatprep.subr.mxu0 %v3751_v51 }
 0x5d3   :  { %1161 = vmatpush1.msra.mxu0 %v3768_v59 }
 0x5d4   :  { %1162 = vmatprep.subr.mxu0 %v3774_v61 }
 0x5d5   :  { %1163 = vmatpush1.msra.mxu0 %v3779_v23 }
 0x5d6   :  { %1164 = vmatprep.subr.mxu0 %v3784_v63 }
 0x5d7   :  { %1165 = vmatpush1.msra.mxu0 %v3792_v1 }
 0x5d8   :  { %1166 = vmatprep.subr.mxu0 %v3798_v3 }
 0x5d9   :  { %1167 = vmatpush1.msra.mxu0 %v3803_v7 }
 0x5da   :  { %1168 = vmatprep.subr.mxu0 %v3808_v9 }
 0x5db   :  { %1169 = vmatpush1.msra.mxu0 %v3816_v11 }
 0x5dc   :  { %1170 = vmatprep.subr.mxu0 %v3822_v15 }
 0x5dd   :  { %1171 = vmatpush1.msra.mxu0 %v3827_v22 }
 0x5de   :  { %1172 = vmatprep.subr.mxu0 %v3832_v53 }
 0x5df   :  { %1173 = vmatpush1.msra.mxu0 %v3838_v43 }
 0x5e0   :  { %1174 = vmatprep.subr.mxu0 %v3854_v18 }
 0x5e1   :  { %1175 = vmatpush1.msra.mxu0 %v3859_v13 }
 0x5e2   :  { %1176 = vmatprep.subr.mxu0 %v3864_v21 }
 0x5e3   :  { %1177 = vmatpush1.msra.mxu0 %v3870_v55 }
 0x5e4   :  { %1178 = vmatprep.subr.mxu0 %v3880_v20 }
 0x5e5   :  { %1179 = vmatpush1.msra.mxu0 %v3885_v28 }
 0x5e6   :  { %1180 = vmatprep.subr.mxu0 %v3890_v30 }
 0x5e7   :  { %1181 = vmatpush1.msra.mxu0 %v3896_v38 }
 0x5e8   :  { %1560 = vmatprep.subr.mxu0 %v3693_v34 }
 0x673   :  { %v1114_v8 = vpop.f32.mrf.mxu1 }
 0x674   :  { %v1119_v12 = vadd.f32 %v1114_v8, %v622_v4  ;;  %v4911_v4 = vsub.s32 0, %v3600_v36 }
 0x675   :  { %v1116_v14 = vpop.f32.mrf.mxu1 }
 0x676   :  { %v2650_v17 = vmul.f32 -1.442695, %v1119_v12  ;;  %v1120_v19 = vadd.f32 %v1116_v14, %v624_v10  ;;  %v4001_v8 = vrot.slane %v723_v62, %v4911_v4 }
 0x678   :  { %2944 = vpow2.f32 %v2650_v17  ;;  %v2651_v39 = vmul.f32 -1.442695, %v1120_v19  ;;  %v3982_v48 = vpop.f32.mrf.mxu0  ;;  %v4913_v17 = vsub.s32 1, %v3600_v36 }
 0x67a   :  { %2946 = vpow2.f32 %v2651_v39  ;;  %v3984_v45 = vpop.f32.mrf.mxu0  ;;  %v4007_v39 = vrot.slane %v723_v62, %v4913_v17 }
 0x67b   :  { %2948 = vtanh.f32 %v1120_v19 }
 0x67c   :  { %v3986_v56 = vpop.f32.mrf.mxu0 }
 0x67d   :  { %4906 = vst [vmem:[#allocation33_spill] sm:$0xff] %v3986_v56 }
 0x67e   :  { %v3988_v58 = vpop.f32.mrf.mxu0 }
 0x67f   :  { %4907 = vst [vmem:[#allocation34_spill] sm:$0xff] %v3988_v58 }
 0x680   :  { %v3990_v54 = vpop.f32.mrf.mxu0 }
 0x681   :  { %4908 = vst [vmem:[#allocation35_spill] sm:$0xff] %v3990_v54 }
 0x682   :  { %v3992_v60 = vpop.f32.mrf.mxu0 }
 0x683   :  { %4909 = vst [vmem:[#allocation36_spill] sm:$0xff] %v3992_v60 }
 0x684   :  { %v3997_v0 = vpop.f32.mrf.mxu0 }
 0x685   :  { %4910 = vst [vmem:[#allocation37_spill] sm:$0xff] %v3997_v0  ;;  %v2945_v2 = vpop.eup %2944 }
 0x686   :  { %v4003_v10 = vpop.f32.mrf.mxu0  ;;  %v1129_v14 = vadd.f32 1.0, %v2945_v2 }
 0x687   :  { %4912 = vst [vmem:[#allocation38_spill] sm:$0xff] %v4003_v10  ;;  %v2947_v12 = vpop.eup %2946 }
 0x688   :  { %v1130_v40 = vadd.f32 1.0, %v2947_v12  ;;  %v1011_v33 = vpop.f32.mrf.mxu0  ;;  %v2949_v10 = vpop.eup %2948 }
 0x689   :  { %v1012_v32 = vadd.f32 %v1011_v33, %v4001_v8 }
 0x68a   :  { %2950 = vrcp.f32 %v1130_v40  ;;  %v1013_v37 = vpop.f32.mrf.mxu0 }
 0x68b   :  { %2952 = vrcp.f32 %v1129_v14  ;;  %v2647_v0 = vmul.f32 -1.442695, %v1012_v32  ;;  %v1014_v4 = vadd.f32 %v1013_v37, %v4007_v39 }
 0x68d   :  { %2954 = vpow2.f32 %v2647_v0  ;;  %v2648_v60 = vmul.f32 -1.442695, %v1014_v4 }
 0x68f   :  { %2956 = vpow2.f32 %v2648_v60 }
 0x690   :  { %2958 = vtanh.f32 %v1014_v4 }
 0x697   :  { %v2951_v2 = vpop.eup %2950 }
 0x698   :  { %v2953_v54 = vpop.eup %2952  ;;  %v1136_v36 = vsel %vm672_vm2, %v2949_v10, %v2951_v2  ;;  %v4021_v10 = vsel %vm661_vm4, %v3762_v57, %v3759_v52 }
 0x699   :  { %v1138_v62 = vmul.f32 %v2953_v54, %v1136_v36  ;;  %v1137_v17 = vmul.f32 %v2953_v54, %v4021_v10 }
 0x69a   :  { %v2955_v12 = vpop.eup %2954 }
 0x69b   :  { %1140 = vrot.lane.b32.xlu1 %v1138_v62, %s3252_s6  ;;  %v1024_v40 = vadd.f32 1.0, %v2955_v12 }
 0x69c   :  { %v2957_v33 = vpop.eup %2956 }
 0x69d   :  { %v1025_v19 = vadd.f32 1.0, %v2957_v33  ;;  %v2959_v32 = vpop.eup %2958  ;;  %v4914_v33 = vld [vmem:[#allocation24_spill] sm:$0xff] }
 0x69f   :  { %2960 = vrcp.f32 %v1025_v19 }
 0x6a0   :  { %2962 = vrcp.f32 %v1024_v40 }
 0x6ac   :  { %v2961_v37 = vpop.eup %2960 }
 0x6ad   :  { %v2963_v0 = vpop.eup %2962  ;;  %v1031_v60 = vsel %vm672_vm2, %v2959_v32, %v2961_v37 }
 0x6ae   :  { %v1033_v14 = vmul.f32 %v2963_v0, %v1031_v60  ;;  %v1032_v52 = vmul.f32 0.0, %v2963_v0 }
 0x6b0   :  { %1035 = vrot.lane.b32.xlu0 %v1033_v14, %s3252_s6 }
 0x70d   :  { %v1141_v4 = vpop.permute.xlu1 %1140 }
 0x70e   :  { %v4024_v2 = vadd.f32 %v1141_v4, %v1137_v17 }
 0x710   :  { %2964 = vtanh.f32 %v4024_v2 }
 0x71d   :  { %v2965_v62 = vpop.eup %2964 }
 0x71e   :  { %v1145_v12 = vmul.f32 %v2965_v62, %v1136_v36 }
 0x720   :  { %v4031_v40 = vsel %vm662_vm5, %v1145_v12, %v4914_v33 }
 0x721   :  { %1249 = vrot.lane.b32.xlu1 %v4031_v40, %s3252_s6 }
 0x722   :  { %v1036_v57 = vpop.permute.xlu0 %1035 }
 0x723   :  { %v4035_v54 = vadd.f32 %v1036_v57, %v1032_v52 }
 0x725   :  { %2966 = vtanh.f32 %v4035_v54 }
 0x732   :  { %v2967_v19 = vpop.eup %2966 }
 0x733   :  { %v1040_v32 = vmul.f32 %v2967_v19, %v1031_v60 }
 0x735   :  { %v4040_v36 = vsel %vm660_vm3, %v1040_v32, 0.0 }
 0x736   :  { %v1149_v37 = vsel %vm518_vm1, %v3904_v24, %v4040_v36  ;;  %v4915_v24 = vld [vmem:[#allocation12_spill] sm:$0xff] }
 0x737   :  { %1215 = vmatmul.mubr.f32.vlgmr.msra.gmra.mxu0 %v1149_v37 }
 0x738   :  { %1561 = vmatpush1.msra.mxu0 %v3698_v26  ;;  %1624 = vmatprep.mubr.f32.mxu0 %v4905_v25 }
 0x739   :  { %1562 = vmatprep.subr.mxu0 %v3703_v42 }
 0x73a   :  { %1563 = vmatpush1.msra.mxu0 %v3709_v47 }
 0x73b   :  { %1564 = vmatprep.subr.mxu0 %v3715_v49 }
 0x73c   :  { %1565 = vmatpush1.msra.mxu0 %v3721_v29 }
 0x73d   :  { %1566 = vmatprep.subr.mxu0 %v3727_v31 }
 0x73e   :  { %1567 = vmatpush1.msra.mxu0 %v3733_v35 }
 0x73f   :  { %1568 = vmatprep.subr.mxu0 %v3739_v41 }
 0x740   :  { %1569 = vmatpush1.msra.mxu0 %v3745_v50 }
 0x741   :  { %1570 = vmatprep.subr.mxu0 %v3751_v51 }
 0x742   :  { %1571 = vmatpush1.msra.mxu0 %v3768_v59 }
 0x743   :  { %1572 = vmatprep.subr.mxu0 %v3774_v61 }
 0x744   :  { %1573 = vmatpush1.msra.mxu0 %v3779_v23 }
 0x745   :  { %1574 = vmatprep.subr.mxu0 %v3784_v63 }
 0x746   :  { %1575 = vmatpush1.msra.mxu0 %v3792_v1 }
 0x747   :  { %1576 = vmatprep.subr.mxu0 %v3798_v3 }
 0x748   :  { %1577 = vmatpush1.msra.mxu0 %v3803_v7 }
 0x749   :  { %1578 = vmatprep.subr.mxu0 %v3808_v9 }
 0x74a   :  { %1579 = vmatpush1.msra.mxu0 %v3816_v11 }
 0x74b   :  { %1580 = vmatprep.subr.mxu0 %v3822_v15 }
 0x74c   :  { %1581 = vmatpush1.msra.mxu0 %v3827_v22 }
 0x74d   :  { %1582 = vmatprep.subr.mxu0 %v3832_v53 }
 0x74e   :  { %1583 = vmatpush1.msra.mxu0 %v3838_v43 }
 0x74f   :  { %1584 = vmatprep.subr.mxu0 %v3854_v18 }
 0x750   :  { %1585 = vmatpush1.msra.mxu0 %v3859_v13 }
 0x751   :  { %1586 = vmatprep.subr.mxu0 %v3864_v21 }
 0x752   :  { %1587 = vmatpush1.msra.mxu0 %v3870_v55 }
 0x753   :  { %1588 = vmatprep.subr.mxu0 %v3880_v20 }
 0x754   :  { %1589 = vmatpush1.msra.mxu0 %v3885_v28 }
 0x755   :  { %1590 = vmatprep.subr.mxu0 %v3890_v30 }
 0x756   :  { %1591 = vmatpush1.msra.mxu0 %v3896_v38 }
 0x757   :  { %1884 = vmatprep.subr.mxu0 %v4915_v24 }
 0x793   :  { %v4078_v0 = vpop.permute.xlu1 %1249 }
 0x794   :  { %2654 = vmatmul.mubr.msk.f32.vlgmr.msra.gmra.mxu1 %vm518_vm1, %v4078_v0 }
 0x795   :  { %1356 = vmatpush1.msra.mxu1 %v3698_v26  ;;  %1419 = vmatprep.mubr.f32.mxu1 %v4905_v25 }
 0x796   :  { %1357 = vmatprep.subr.mxu1 %v3703_v42 }
 0x797   :  { %1358 = vmatpush1.msra.mxu1 %v3709_v47 }
 0x798   :  { %1359 = vmatprep.subr.mxu1 %v3715_v49 }
 0x799   :  { %1360 = vmatpush1.msra.mxu1 %v3721_v29 }
 0x79a   :  { %1361 = vmatprep.subr.mxu1 %v3727_v31 }
 0x79b   :  { %1362 = vmatpush1.msra.mxu1 %v3733_v35 }
 0x79c   :  { %1363 = vmatprep.subr.mxu1 %v3739_v41 }
 0x79d   :  { %1364 = vmatpush1.msra.mxu1 %v3745_v50 }
 0x79e   :  { %1365 = vmatprep.subr.mxu1 %v3751_v51 }
 0x79f   :  { %1366 = vmatpush1.msra.mxu1 %v3768_v59 }
 0x7a0   :  { %1367 = vmatprep.subr.mxu1 %v3774_v61 }
 0x7a1   :  { %1368 = vmatpush1.msra.mxu1 %v3779_v23 }
 0x7a2   :  { %1369 = vmatprep.subr.mxu1 %v3784_v63 }
 0x7a3   :  { %1370 = vmatpush1.msra.mxu1 %v3792_v1 }
 0x7a4   :  { %1371 = vmatprep.subr.mxu1 %v3798_v3 }
 0x7a5   :  { %1372 = vmatpush1.msra.mxu1 %v3803_v7 }
 0x7a6   :  { %1373 = vmatprep.subr.mxu1 %v3808_v9 }
 0x7a7   :  { %1374 = vmatpush1.msra.mxu1 %v3816_v11 }
 0x7a8   :  { %1375 = vmatprep.subr.mxu1 %v3822_v15 }
 0x7a9   :  { %1376 = vmatpush1.msra.mxu1 %v3827_v22 }
 0x7aa   :  { %1377 = vmatprep.subr.mxu1 %v3832_v53 }
 0x7ab   :  { %1378 = vmatpush1.msra.mxu1 %v3838_v43 }
 0x7ac   :  { %1379 = vmatprep.subr.mxu1 %v3854_v18 }
 0x7ad   :  { %1380 = vmatpush1.msra.mxu1 %v3859_v13 }
 0x7ae   :  { %1381 = vmatprep.subr.mxu1 %v3864_v21 }
 0x7af   :  { %1382 = vmatpush1.msra.mxu1 %v3870_v55 }
 0x7b0   :  { %1383 = vmatprep.subr.mxu1 %v3880_v20 }
 0x7b1   :  { %1384 = vmatpush1.msra.mxu1 %v3885_v28 }
 0x7b2   :  { %1385 = vmatprep.subr.mxu1 %v3890_v30  ;;  %v4197_v30 = vsel %vm662_vm5, %v4024_v2, %v4021_v10 }
 0x7b3   :  { %1386 = vmatpush1.msra.mxu1 %v3896_v38 }
 0x7b4   :  { %1474 = vmatprep.subr.mxu1 %v4915_v24 }
 0x7f7   :  { %v1216_v60 = vpop.f32.mrf.mxu0 }
 0x7f8   :  { %v1217_v14 = vadd.f32 %v1216_v60, %v4001_v8 }
 0x7f9   :  { %v1218_v17 = vpop.f32.mrf.mxu0 }
 0x7fa   :  { %v2652_v4 = vmul.f32 -1.442695, %v1217_v14  ;;  %v1219_v62 = vadd.f32 %v1218_v17, %v4007_v39  ;;  %v628_v14 = vadd.f32 %v3977_v6, %v3615_v44 }
 0x7fc   :  { %2968 = vpow2.f32 %v2652_v4  ;;  %v2653_v12 = vmul.f32 -1.442695, %v1219_v62  ;;  %v630_v4 = vadd.f32 %v3980_v16, %v3623_v46 }
 0x7fe   :  { %2970 = vpow2.f32 %v2653_v12 }
 0x7ff   :  { %2972 = vtanh.f32 %v1219_v62 }
 0x809   :  { %v2969_v33 = vpop.eup %2968 }
 0x80a   :  { %v1229_v57 = vadd.f32 1.0, %v2969_v33 }
 0x80b   :  { %v2971_v52 = vpop.eup %2970 }
 0x80c   :  { %v1230_v19 = vadd.f32 1.0, %v2971_v52  ;;  %v2973_v32 = vpop.eup %2972 }
 0x80e   :  { %2974 = vrcp.f32 %v1230_v19 }
 0x80f   :  { %2976 = vrcp.f32 %v1229_v57 }
 0x81b   :  { %v2975_v37 = vpop.eup %2974 }
 0x81c   :  { %v2977_v24 = vpop.eup %2976  ;;  %v1236_v60 = vsel %vm672_vm2, %v2973_v32, %v2975_v37 }
 0x81d   :  { %v1238_v58 = vmul.f32 %v2977_v24, %v1236_v60 }
 0x81f   :  { %1240 = vrot.lane.b32.xlu0 %v1238_v58, %s3252_s6 }
 0x854   :  { %v1319_v17 = vpop.f32.mrf.mxu1 }
 0x855   :  { %v1324_v12 = vadd.f32 %v1319_v17, %v628_v14  ;;  %v4130_v17 = vsel %vm660_vm3, %v4035_v54, 0.0  ;;  %v4144_v54 = vld [vmem:[#allocation5 + $0x70] sm:$0xff] }
 0x856   :  { %v1321_v62 = vpop.f32.mrf.mxu1 }
 0x857   :  { %v2655_v33 = vmul.f32 -1.442695, %v1324_v12  ;;  %v1325_v52 = vadd.f32 %v1321_v62, %v630_v4  ;;  %v1237_v4 = vmul.f32 %v2977_v24, %v4130_v17  ;;  %v4148_v24 = vld [vmem:[#allocation5 + $0x68] sm:$0xff] }
 0x859   :  { %2978 = vpow2.f32 %v2655_v33  ;;  %v2656_v57 = vmul.f32 -1.442695, %v1325_v52 }
 0x85b   :  { %2980 = vpow2.f32 %v2656_v57 }
 0x85c   :  { %2982 = vtanh.f32 %v1325_v52 }
 0x866   :  { %v2979_v19 = vpop.eup %2978 }
 0x867   :  { %v1334_v32 = vadd.f32 1.0, %v2979_v19  ;;  %v4160_v19 = vld [vmem:[#allocation5 + $0x48] sm:$0xff] }
 0x868   :  { %v2981_v56 = vpop.eup %2980 }
 0x869   :  { %v1335_v37 = vadd.f32 1.0, %v2981_v56  ;;  %v2983_v58 = vpop.eup %2982 }
 0x86b   :  { %2984 = vrcp.f32 %v1335_v37  ;;  %v4166_v37 = vld [vmem:[#allocation5 + $0x38] sm:$0xff] }
 0x86c   :  { %2986 = vrcp.f32 %v1334_v32  ;;  %v4163_v32 = vld [vmem:[#allocation5 + $0x40] sm:$0xff] }
 0x878   :  { %v2985_v6 = vpop.eup %2984 }
 0x879   :  { %v2987_v38 = vpop.eup %2986  ;;  %v1341_v16 = vsel %vm672_vm2, %v2983_v58, %v2985_v6  ;;  %v4169_v58 = vld [vmem:[#allocation5 + $0x30] sm:$0xff]  ;;  %v4172_v6 = vld [vmem:[#allocation5 + $0x28] sm:$0xff] }
 0x87a   :  { %v1343_v14 = vmul.f32 %v2987_v38, %v1341_v16  ;;  %v1342_v28 = vmul.f32 %v2987_v38, %v4197_v30 }
 0x87c   :  { %1345 = vrot.lane.b32.xlu1 %v1343_v14, %s3252_s6  ;;  %v4175_v14 = vld [vmem:[#allocation5 + $0x20] sm:$0xff] }
 0x891   :  { %v1241_v56 = vpop.permute.xlu0 %1240 }
 0x892   :  { %v4133_v12 = vadd.f32 %v1241_v56, %v1237_v4  ;;  %v4178_v4 = vld [vmem:[#allocation5 + $0x18] sm:$0xff]  ;;  %v4181_v56 = vld [vmem:[#allocation5 + $0x10] sm:$0xff] }
 0x894   :  { %2988 = vtanh.f32 %v4133_v12 }
 0x8a1   :  { %v2989_v62 = vpop.eup %2988 }
 0x8a2   :  { %v1245_v33 = vmul.f32 %v2989_v62, %v1236_v60  ;;  %v4151_v60 = vld [vmem:[#allocation5 + $0x60] sm:$0xff]  ;;  %v4184_v62 = vld [vmem:[#allocation5 + $0x8] sm:$0xff] }
 0x8a4   :  { %v4139_v52 = vsel %vm661_vm4, %v1245_v33, %v4040_v36  ;;  %v4154_v36 = vld [vmem:[#allocation5 + $0x58] sm:$0xff]  ;;  %v4187_v33 = vld [vmem:[#allocation5] sm:$0xff] }
 0x8a5   :  { %v1354_v57 = vsel %vm518_vm1, %v4078_v0, %v4139_v52  ;;  %v4157_v0 = vld [vmem:[#allocation5 + $0x50] sm:$0xff] }
 0x8a6   :  { %1420 = vmatmul.mubr.f32.vlgmr.msra.gmra.mxu1 %v1354_v57  ;;  %v4190_v57 = vld [vmem:[#allocation5 + $0x78] sm:$0xff] }
 0x8a7   :  { %1475 = vmatpush1.msra.mxu1 %v4144_v54  ;;  %1522 = vmatprep.mubr.f32.mxu1 %v4905_v25  ;;  %4916 = vst [vmem:[#allocation24_spill] sm:$0xff] %v4190_v57 }
 0x8a8   :  { %1476 = vmatprep.subr.mxu1 %v4148_v24 }
 0x8a9   :  { %1477 = vmatpush1.msra.mxu1 %v4151_v60 }
 0x8aa   :  { %1478 = vmatprep.subr.mxu1 %v4154_v36 }
 0x8ab   :  { %1479 = vmatpush1.msra.mxu1 %v4157_v0 }
 0x8ac   :  { %1480 = vmatprep.subr.mxu1 %v4160_v19 }
 0x8ad   :  { %1481 = vmatpush1.msra.mxu1 %v4163_v32 }
 0x8ae   :  { %1482 = vmatprep.subr.mxu1 %v4166_v37 }
 0x8af   :  { %1483 = vmatpush1.msra.mxu1 %v4169_v58 }
 0x8b0   :  { %1484 = vmatprep.subr.mxu1 %v4172_v6 }
 0x8b1   :  { %1485 = vmatpush1.msra.mxu1 %v4175_v14 }
 0x8b2   :  { %1486 = vmatprep.subr.mxu1 %v4178_v4 }
 0x8b3   :  { %1487 = vmatpush1.msra.mxu1 %v4181_v56 }
 0x8b4   :  { %1488 = vmatprep.subr.mxu1 %v4184_v62 }
 0x8b5   :  { %1489 = vmatpush1.msra.mxu1 %v4187_v33 }
 0x8b6   :  { %1679 = vmatprep.subr.mxu1 %v4190_v57 }
 0x8ee   :  { %v1346_v20 = vpop.permute.xlu1 %1345 }
 0x8ef   :  { %v4200_v55 = vadd.f32 %v1346_v20, %v1342_v28 }
 0x8f1   :  { %2990 = vtanh.f32 %v4200_v55 }
 0x8fe   :  { %v2991_v21 = vpop.eup %2990 }
 0x8ff   :  { %v1350_v13 = vmul.f32 %v2991_v21, %v1341_v16 }
 0x901   :  { %v4207_v57 = vsel %vm663_vm6, %v1350_v13, %v4031_v40 }
 0x902   :  { %1454 = vrot.lane.b32.xlu0 %v4207_v57, %s3252_s6 }
 0x966   :  { %v1421_v10 = vpop.f32.mrf.mxu1 }
 0x967   :  { %v1422_v38 = vadd.f32 %v1421_v10, %v4001_v8 }
 0x968   :  { %v1423_v2 = vpop.f32.mrf.mxu1 }
 0x969   :  { %v2657_v20 = vmul.f32 -1.442695, %v1422_v38  ;;  %v1424_v28 = vadd.f32 %v1423_v2, %v4007_v39 }
 0x96b   :  { %2992 = vpow2.f32 %v2657_v20  ;;  %v2658_v18 = vmul.f32 -1.442695, %v1424_v28 }
 0x96d   :  { %2994 = vpow2.f32 %v2658_v18 }
 0x96e   :  { %2996 = vtanh.f32 %v1424_v28 }
 0x974   :  { %v1455_v21 = vpop.permute.xlu0 %1454 }
 0x975   :  { %2659 = vmatmul.mubr.msk.f32.vlgmr.msra.gmra.mxu1 %vm518_vm1, %v1455_v21 }
 0x976   :  { %1680 = vmatpush1.msra.mxu1 %v4144_v54  ;;  %1727 = vmatprep.mubr.f32.mxu1 %v4905_v25 }
 0x977   :  { %1681 = vmatprep.subr.mxu1 %v4148_v24 }
 0x978   :  { %v2993_v13 = vpop.eup %2992  ;;  %1682 = vmatpush1.msra.mxu1 %v4151_v60 }
 0x979   :  { %1683 = vmatprep.subr.mxu1 %v4154_v36  ;;  %v1434_v16 = vadd.f32 1.0, %v2993_v13  ;;  %v4238_v13 = vsel %vm661_vm4, %v4133_v12, %v4130_v17  ;;  %v636_v17 = vadd.f32 %v3984_v45, %v3623_v46 }
 0x97a   :  { %v2995_v40 = vpop.eup %2994  ;;  %1684 = vmatpush1.msra.mxu1 %v4157_v0 }
 0x97b   :  { %v1435_v10 = vadd.f32 1.0, %v2995_v40  ;;  %1685 = vmatprep.subr.mxu1 %v4160_v19  ;;  %v2997_v18 = vpop.eup %2996 }
 0x97c   :  { %1686 = vmatpush1.msra.mxu1 %v4163_v32 }
 0x97d   :  { %2998 = vrcp.f32 %v1435_v10  ;;  %1687 = vmatprep.subr.mxu1 %v4166_v37 }
 0x97e   :  { %3000 = vrcp.f32 %v1434_v16  ;;  %1688 = vmatpush1.msra.mxu1 %v4169_v58 }
 0x97f   :  { %1689 = vmatprep.subr.mxu1 %v4172_v6 }
 0x980   :  { %1690 = vmatpush1.msra.mxu1 %v4175_v14 }
 0x981   :  { %1691 = vmatprep.subr.mxu1 %v4178_v4 }
 0x982   :  { %1692 = vmatpush1.msra.mxu1 %v4181_v56 }
 0x983   :  { %1693 = vmatprep.subr.mxu1 %v4184_v62 }
 0x984   :  { %1694 = vmatpush1.msra.mxu1 %v4187_v33 }
 0x985   :  { %1765 = vmatprep.subr.mxu1 %v3693_v34 }
 0x98a   :  { %v2999_v38 = vpop.eup %2998 }
 0x98b   :  { %v3001_v2 = vpop.eup %3000  ;;  %v1441_v20 = vsel %vm672_vm2, %v2997_v18, %v2999_v38 }
 0x98c   :  { %v1443_v28 = vmul.f32 %v3001_v2, %v1441_v20  ;;  %v1442_v40 = vmul.f32 %v3001_v2, %v4238_v13 }
 0x98e   :  { %1445 = vrot.lane.b32.xlu1 %v1443_v28, %s3252_s6 }
 0xa00   :  { %v1446_v16 = vpop.permute.xlu1 %1445 }
 0xa01   :  { %v4241_v10 = vadd.f32 %v1446_v16, %v1442_v40 }
 0xa03   :  { %3002 = vtanh.f32 %v4241_v10 }
 0xa10   :  { %v3003_v43 = vpop.eup %3002 }
 0xa11   :  { %v1450_v53 = vmul.f32 %v3003_v43, %v1441_v20  ;;  %v634_v43 = vadd.f32 %v3982_v48, %v3615_v44 }
 0xa13   :  { %v4247_v18 = vsel %vm662_vm5, %v1450_v53, %v4139_v52 }
 0xa14   :  { %v1559_v38 = vsel %vm518_vm1, %v1455_v21, %v4247_v18 }
 0xa15   :  { %1625 = vmatmul.mubr.f32.vlgmr.msra.gmra.mxu0 %v1559_v38 }
 0xa16   :  { %1885 = vmatpush1.msra.mxu0 %v4144_v54  ;;  %1932 = vmatprep.mubr.f32.mxu0 %v4905_v25 }
 0xa17   :  { %1886 = vmatprep.subr.mxu0 %v4148_v24 }
 0xa18   :  { %1887 = vmatpush1.msra.mxu0 %v4151_v60 }
 0xa19   :  { %1888 = vmatprep.subr.mxu0 %v4154_v36 }
 0xa1a   :  { %1889 = vmatpush1.msra.mxu0 %v4157_v0 }
 0xa1b   :  { %1890 = vmatprep.subr.mxu0 %v4160_v19 }
 0xa1c   :  { %1891 = vmatpush1.msra.mxu0 %v4163_v32 }
 0xa1d   :  { %1892 = vmatprep.subr.mxu0 %v4166_v37 }
 0xa1e   :  { %1893 = vmatpush1.msra.mxu0 %v4169_v58 }
 0xa1f   :  { %1894 = vmatprep.subr.mxu0 %v4172_v6 }
 0xa20   :  { %1895 = vmatpush1.msra.mxu0 %v4175_v14 }
 0xa21   :  { %1896 = vmatprep.subr.mxu0 %v4178_v4 }
 0xa22   :  { %1897 = vmatpush1.msra.mxu0 %v4181_v56 }
 0xa23   :  { %1898 = vmatprep.subr.mxu0 %v4184_v62 }
 0xa24   :  { %1899 = vmatpush1.msra.mxu0 %v4187_v33 }
 0xa25   :  { %1970 = vmatprep.subr.mxu0 %v3693_v34 }
 0xa35   :  { %v1524_v53 = vpop.f32.mrf.mxu1 }
 0xa36   :  { %v1529_v12 = vadd.f32 %v1524_v53, %v634_v43  ;;  %v4279_v53 = vsel %vm663_vm6, %v4200_v55, %v4197_v30 }
 0xa37   :  { %v1526_v52 = vpop.f32.mrf.mxu1 }
 0xa38   :  { %v2660_v21 = vmul.f32 -1.442695, %v1529_v12  ;;  %v1530_v2 = vadd.f32 %v1526_v52, %v636_v17 }
 0xa3a   :  { %3004 = vpow2.f32 %v2660_v21  ;;  %v2661_v20 = vmul.f32 -1.442695, %v1530_v2 }
 0xa3c   :  { %3006 = vpow2.f32 %v2661_v20 }
 0xa3d   :  { %3008 = vtanh.f32 %v1530_v2 }
 0xa47   :  { %v3005_v28 = vpop.eup %3004 }
 0xa48   :  { %v1539_v16 = vadd.f32 1.0, %v3005_v28 }
 0xa49   :  { %v3007_v40 = vpop.eup %3006 }
 0xa4a   :  { %v1540_v38 = vadd.f32 1.0, %v3007_v40  ;;  %v3009_v34 = vpop.eup %3008 }
 0xa4c   :  { %3010 = vrcp.f32 %v1540_v38 }
 0xa4d   :  { %3012 = vrcp.f32 %v1539_v16 }
 0xa59   :  { %v3011_v48 = vpop.eup %3010 }
 0xa5a   :  { %v3013_v44 = vpop.eup %3012  ;;  %v1546_v45 = vsel %vm672_vm2, %v3009_v34, %v3011_v48 }
 0xa5b   :  { %v1548_v43 = vmul.f32 %v3013_v44, %v1546_v45  ;;  %v1547_v17 = vmul.f32 %v3013_v44, %v4279_v53 }
 0xa5d   :  { %1550 = vrot.lane.b32.xlu0 %v1548_v43, %s3252_s6 }
 0xacf   :  { %v1551_v12 = vpop.permute.xlu0 %1550 }
 0xad0   :  { %v4282_v52 = vadd.f32 %v1551_v12, %v1547_v17 }
 0xad2   :  { %3014 = vtanh.f32 %v4282_v52 }
 0xad5   :  { %v1626_v21 = vpop.f32.mrf.mxu0 }
 0xad6   :  { %v1627_v2 = vadd.f32 %v1626_v21, %v4001_v8 }
 0xad7   :  { %v1628_v20 = vpop.f32.mrf.mxu0 }
 0xad8   :  { %v2662_v28 = vmul.f32 -1.442695, %v1627_v2  ;;  %v1629_v40 = vadd.f32 %v1628_v20, %v4007_v39 }
 0xada   :  { %3016 = vpow2.f32 %v2662_v28  ;;  %v2663_v16 = vmul.f32 -1.442695, %v1629_v40 }
 0xadc   :  { %3018 = vpow2.f32 %v2663_v16 }
 0xadd   :  { %3020 = vtanh.f32 %v1629_v40 }
 0xadf   :  { %v3015_v38 = vpop.eup %3014 }
 0xae0   :  { %v1555_v30 = vmul.f32 %v3015_v38, %v1546_v45 }
 0xae2   :  { %v4291_v44 = vsel %vm664_vm7, %v1555_v30, %v4207_v57 }
 0xae3   :  { %1659 = vrot.lane.b32.xlu1 %v4291_v44, %s3252_s6 }
 0xae7   :  { %v3017_v55 = vpop.eup %3016 }
 0xae8   :  { %v1639_v48 = vadd.f32 1.0, %v3017_v55 }
 0xae9   :  { %v3019_v34 = vpop.eup %3018 }
 0xaea   :  { %v1640_v43 = vadd.f32 1.0, %v3019_v34  ;;  %v3021_v17 = vpop.eup %3020 }
 0xaec   :  { %3022 = vrcp.f32 %v1640_v43 }
 0xaed   :  { %3024 = vrcp.f32 %v1639_v48 }
 0xaf9   :  { %v3023_v12 = vpop.eup %3022 }
 0xafa   :  { %v3025_v45 = vpop.eup %3024  ;;  %v1646_v21 = vsel %vm672_vm2, %v3021_v17, %v3023_v12 }
 0xafb   :  { %v1648_v2 = vmul.f32 %v3025_v45, %v1646_v21 }
 0xafd   :  { %1650 = vrot.lane.b32.xlu0 %v1648_v2, %s3252_s6 }
 0xb55   :  { %v1660_v57 = vpop.permute.xlu1 %1659 }
 0xb56   :  { %2664 = vmatmul.mubr.msk.f32.vlgmr.msra.gmra.mxu1 %vm518_vm1, %v1660_v57 }
 0xb57   :  { %1766 = vmatpush1.msra.mxu1 %v3698_v26  ;;  %1829 = vmatprep.mubr.f32.mxu1 %v4905_v25  ;;  %v4917_v26 = vld [vmem:[#allocation22_spill] sm:$0xff] }
 0xb58   :  { %1767 = vmatprep.subr.mxu1 %v3703_v42  ;;  %v4326_v42 = vsel %vm662_vm5, %v4241_v10, %v4238_v13 }
 0xb59   :  { %1768 = vmatpush1.msra.mxu1 %v3709_v47  ;;  %v4918_v47 = vld [vmem:[#allocation23_spill] sm:$0xff] }
 0xb5a   :  { %1769 = vmatprep.subr.mxu1 %v3715_v49  ;;  %v1647_v49 = vmul.f32 %v3025_v45, %v4326_v42 }
 0xb5b   :  { %1770 = vmatpush1.msra.mxu1 %v3721_v29  ;;  %v4919_v29 = vld [vmem:[#allocation25_spill] sm:$0xff] }
 0xb5c   :  { %1771 = vmatprep.subr.mxu1 %v3727_v31 }
 0xb5d   :  { %1772 = vmatpush1.msra.mxu1 %v3733_v35  ;;  %v4920_v35 = vld [vmem:[#allocation26_spill] sm:$0xff] }
 0xb5e   :  { %1773 = vmatprep.subr.mxu1 %v3739_v41 }
 0xb5f   :  { %1774 = vmatpush1.msra.mxu1 %v3745_v50  ;;  %v4921_v50 = vld [vmem:[#allocation27_spill] sm:$0xff] }
 0xb60   :  { %1775 = vmatprep.subr.mxu1 %v3751_v51  ;;  %v4922_v51 = vld [vmem:[#allocation28_spill] sm:$0xff] }
 0xb61   :  { %1776 = vmatpush1.msra.mxu1 %v3768_v59  ;;  %v4923_v59 = vld [vmem:[#allocation29_spill] sm:$0xff] }
 0xb62   :  { %1777 = vmatprep.subr.mxu1 %v3774_v61  ;;  %v4924_v61 = vld [vmem:[#allocation30_spill] sm:$0xff] }
 0xb63   :  { %1778 = vmatpush1.msra.mxu1 %v3779_v23  ;;  %v4925_v23 = vld [vmem:[#allocation31_spill] sm:$0xff] }
 0xb64   :  { %1779 = vmatprep.subr.mxu1 %v3784_v63  ;;  %v4926_v63 = vld [vmem:[#allocation32_spill] sm:$0xff] }
 0xb65   :  { %1780 = vmatpush1.msra.mxu1 %v3792_v1  ;;  %v4927_v1 = vld [vmem:[#allocation24_spill] sm:$0xff] }
 0xb66   :  { %1781 = vmatprep.subr.mxu1 %v3798_v3 }
 0xb67   :  { %1782 = vmatpush1.msra.mxu1 %v3803_v7 }
 0xb68   :  { %1783 = vmatprep.subr.mxu1 %v3808_v9 }
 0xb69   :  { %1784 = vmatpush1.msra.mxu1 %v3816_v11 }
 0xb6a   :  { %1785 = vmatprep.subr.mxu1 %v3822_v15  ;;  %v4368_v15 = vld [vmem:[%s4849_s8 + $0xf8] sm:$0xff] }
 0xb6b   :  { %1786 = vmatpush1.msra.mxu1 %v3827_v22  ;;  %v4928_v22 = vld [vmem:[#allocation20_spill] sm:$0xff] }
 0xb6c   :  { %1787 = vmatprep.subr.mxu1 %v4917_v26  ;;  %v4390_v26 = vsel %vm664_vm7, %v4282_v52, %v4279_v53  ;;  %v4411_v52 = vld [vmem:[%s4849_s8 + $0xf0] sm:$0xff] }
 0xb6d   :  { %1788 = vmatpush1.msra.mxu1 %v4918_v47 }
 0xb6e   :  { %1789 = vmatprep.subr.mxu1 %v4919_v29 }
 0xb6f   :  { %v1651_v31 = vpop.permute.xlu0 %1650  ;;  %1790 = vmatpush1.msra.mxu1 %v4920_v35 }
 0xb70   :  { %v4332_v41 = vadd.f32 %v1651_v31, %v1647_v49  ;;  %1791 = vmatprep.subr.mxu1 %v4921_v50 }
 0xb71   :  { %1792 = vmatpush1.msra.mxu1 %v4922_v51 }
 0xb72   :  { %3026 = vtanh.f32 %v4332_v41  ;;  %1793 = vmatprep.subr.mxu1 %v4923_v59  ;;  %v4425_v51 = vsel %vm663_vm6, %v4332_v41, %v4326_v42  ;;  %v4443_v42 = vld [vmem:[%s4849_s8 + $0xd0] sm:$0xff] }
 0xb73   :  { %1794 = vmatpush1.msra.mxu1 %v4924_v61  ;;  %v4430_v61 = vld [vmem:[%s4849_s8 + $0xe0] sm:$0xff] }
 0xb74   :  { %1795 = vmatprep.subr.mxu1 %v4925_v23 }
 0xb75   :  { %1796 = vmatpush1.msra.mxu1 %v4926_v63  ;;  %v4437_v63 = vld [vmem:[%s4849_s8 + $0xd8] sm:$0xff] }
 0xb76   :  { %2089 = vmatprep.subr.mxu1 %v4927_v1  ;;  %v4451_v1 = vld [vmem:[%s4849_s8 + $0xc8] sm:$0xff] }
 0xb7f   :  { %v3027_v3 = vpop.eup %3026 }
 0xb80   :  { %v1655_v7 = vmul.f32 %v3027_v3, %v1646_v21  ;;  %v4457_v3 = vld [vmem:[%s4849_s8 + $0xc0] sm:$0xff] }
 0xb82   :  { %v4345_v9 = vsel %vm663_vm6, %v1655_v7, %v4247_v18  ;;  %v4463_v7 = vld [vmem:[%s4849_s8 + $0xb8] sm:$0xff] }
 0xb83   :  { %v1764_v11 = vsel %vm518_vm1, %v1660_v57, %v4345_v9 }
 0xb84   :  { %1830 = vmatmul.mubr.f32.vlgmr.msra.gmra.mxu1 %v1764_v11  ;;  %v4469_v11 = vld [vmem:[%s4849_s8 + $0xb0] sm:$0xff] }
 0xb85   :  { %2090 = vmatpush1.msra.mxu1 %v4144_v54  ;;  %2137 = vmatprep.mubr.f32.mxu1 %v4905_v25  ;;  %v4929_v54 = vld [vmem:[#allocation33_spill] sm:$0xff] }
 0xb86   :  { %2091 = vmatprep.subr.mxu1 %v4148_v24  ;;  %v640_v24 = vadd.f32 %v4929_v54, %v4928_v22  ;;  %v4476_v54 = vld [vmem:[%s4849_s8 + $0xa8] sm:$0xff] }
 0xb87   :  { %2092 = vmatpush1.msra.mxu1 %v4151_v60 }
 0xb88   :  { %2093 = vmatprep.subr.mxu1 %v4154_v36  ;;  %v4930_v36 = vld [vmem:[#allocation34_spill] sm:$0xff] }
 0xb89   :  { %2094 = vmatpush1.msra.mxu1 %v4157_v0  ;;  %v642_v0 = vadd.f32 %v4930_v36, %v3623_v46  ;;  %v4494_v36 = vld [vmem:[%s4849_s8 + $0x90] sm:$0xff] }
 0xb8a   :  { %2095 = vmatprep.subr.mxu1 %v4160_v19 }
 0xb8b   :  { %2096 = vmatpush1.msra.mxu1 %v4163_v32 }
 0xb8c   :  { %2097 = vmatprep.subr.mxu1 %v4166_v37 }
 0xb8d   :  { %2098 = vmatpush1.msra.mxu1 %v4169_v58 }
 0xb8e   :  { %2099 = vmatprep.subr.mxu1 %v4172_v6 }
 0xb8f   :  { %2100 = vmatpush1.msra.mxu1 %v4175_v14 }
 0xb90   :  { %2101 = vmatprep.subr.mxu1 %v4178_v4 }
 0xb91   :  { %2102 = vmatpush1.msra.mxu1 %v4181_v56 }
 0xb92   :  { %2103 = vmatprep.subr.mxu1 %v4184_v62 }
 0xb93   :  { %2104 = vmatpush1.msra.mxu1 %v4187_v33 }
 0xb94   :  { %2175 = vmatprep.subr.mxu1 %v4368_v15 }
 0xc16   :  { %v1729_v60 = vpop.f32.mrf.mxu1 }
 0xc17   :  { %v1734_v19 = vadd.f32 %v1729_v60, %v640_v24  ;;  %v4482_v24 = vld [vmem:[%s4849_s8 + $0xa0] sm:$0xff]  ;;  %v4488_v60 = vld [vmem:[%s4849_s8 + $0x98] sm:$0xff] }
 0xc18   :  { %v1731_v32 = vpop.f32.mrf.mxu1 }
 0xc19   :  { %v2665_v37 = vmul.f32 -1.442695, %v1734_v19  ;;  %v1735_v58 = vadd.f32 %v1731_v32, %v642_v0  ;;  %v4500_v0 = vld [vmem:[%s4849_s8 + $0x88] sm:$0xff]  ;;  %v4506_v19 = vld [vmem:[%s4849_s8 + $0x80] sm:$0xff]  ;;  %v4512_v32 = vld [vmem:[%s4849_s8 + $0x78] sm:$0xff] }
 0xc1b   :  { %3028 = vpow2.f32 %v2665_v37  ;;  %v2666_v6 = vmul.f32 -1.442695, %v1735_v58  ;;  %v4518_v37 = vld [vmem:[%s4849_s8 + $0x70] sm:$0xff] }
 0xc1d   :  { %3030 = vpow2.f32 %v2666_v6  ;;  %v4530_v6 = vld [vmem:[%s4849_s8 + $0x60] sm:$0xff] }
 0xc1e   :  { %3032 = vtanh.f32 %v1735_v58  ;;  %v4524_v58 = vld [vmem:[%s4849_s8 + $0x68] sm:$0xff] }
 0xc28   :  { %v3029_v14 = vpop.eup %3028 }
 0xc29   :  { %v1744_v56 = vadd.f32 1.0, %v3029_v14  ;;  %v4536_v14 = vld [vmem:[%s4849_s8 + $0x58] sm:$0xff] }
 0xc2a   :  { %v3031_v4 = vpop.eup %3030 }
 0xc2b   :  { %v1745_v62 = vadd.f32 1.0, %v3031_v4  ;;  %v3033_v33 = vpop.eup %3032  ;;  %v4542_v4 = vld [vmem:[%s4849_s8 + $0x50] sm:$0xff] }
 0xc2d   :  { %3034 = vrcp.f32 %v1745_v62 }
 0xc2e   :  { %3036 = vrcp.f32 %v1744_v56  ;;  %v4548_v56 = vld [vmem:[%s4849_s8 + $0x48] sm:$0xff] }
 0xc3a   :  { %v3035_v13 = vpop.eup %3034 }
 0xc3b   :  { %v3037_v10 = vpop.eup %3036  ;;  %v1751_v18 = vsel %vm672_vm2, %v3033_v33, %v3035_v13  ;;  %v4554_v33 = vld [vmem:[%s4849_s8 + $0x40] sm:$0xff]  ;;  %v4560_v13 = vld [vmem:[%s4849_s8 + $0x38] sm:$0xff] }
 0xc3c   :  { %v1753_v20 = vmul.f32 %v3037_v10, %v1751_v18  ;;  %v1752_v47 = vmul.f32 %v3037_v10, %v4390_v26  ;;  %v4566_v10 = vld [vmem:[%s4849_s8 + $0x30] sm:$0xff] }
 0xc3e   :  { %1755 = vrot.lane.b32.xlu1 %v1753_v20, %s3252_s6  ;;  %v4573_v20 = vld [vmem:[%s4849_s8 + $0x28] sm:$0xff] }
 0xc44   :  { %v1831_v28 = vpop.f32.mrf.mxu1 }
 0xc45   :  { %v1832_v40 = vadd.f32 %v1831_v28, %v4001_v8  ;;  %v4579_v28 = vld [vmem:[%s4849_s8 + $0x20] sm:$0xff] }
 0xc46   :  { %v1833_v16 = vpop.f32.mrf.mxu1 }
 0xc47   :  { %v2667_v38 = vmul.f32 -1.442695, %v1832_v40  ;;  %v1834_v30 = vadd.f32 %v1833_v16, %v4007_v39  ;;  %v4585_v40 = vld [vmem:[%s4849_s8 + $0x18] sm:$0xff]  ;;  %v4591_v16 = vld [vmem:[%s4849_s8 + $0x10] sm:$0xff] }
 0xc49   :  { %3038 = vpow2.f32 %v2667_v38  ;;  %v2668_v55 = vmul.f32 -1.442695, %v1834_v30 }
 0xc4b   :  { %3040 = vpow2.f32 %v2668_v55 }
 0xc4c   :  { %3042 = vtanh.f32 %v1834_v30  ;;  %v4602_v30 = vld [vmem:[%s4849_s8 + $0x8] sm:$0xff] }
 0xc56   :  { %v3039_v34 = vpop.eup %3038 }
 0xc57   :  { %v1844_v43 = vadd.f32 1.0, %v3039_v34  ;;  %v4611_v34 = vld [vmem:[%s4849_s8] sm:$0xff] }
 0xc58   :  { %v3041_v48 = vpop.eup %3040 }
 0xc59   :  { %v1845_v17 = vadd.f32 1.0, %v3041_v48  ;;  %v3043_v12 = vpop.eup %3042 }
 0xc5b   :  { %3044 = vrcp.f32 %v1845_v17 }
 0xc5c   :  { %3046 = vrcp.f32 %v1844_v43  ;;  %v4932_v43 = vld [vmem:[#allocation36_spill] sm:$0xff] }
 0xc5d   :  { %v648_v17 = vadd.f32 %v4932_v43, %v3623_v46 }
 0xc68   :  { %v3045_v45 = vpop.eup %3044 }
 0xc69   :  { %v3047_v21 = vpop.eup %3046  ;;  %v4382_v2 = vsel %vm672_vm2, %v3043_v12, %v3045_v45 }
 0xc6a   :  { %v1853_v57 = vmul.f32 %v3047_v21, %v4382_v2  ;;  %v1852_v23 = vmul.f32 %v3047_v21, %v4425_v51 }
 0xc6c   :  { %1855 = vrot.lane.b32.xlu1 %v1853_v57, %s3252_s6 }
 0xcb0   :  { %v1756_v49 = vpop.permute.xlu1 %1755 }
 0xcb1   :  { %v4393_v29 = vadd.f32 %v1756_v49, %v1752_v47 }
 0xcb3   :  { %3048 = vtanh.f32 %v4393_v29 }
 0xcc0   :  { %v3049_v31 = vpop.eup %3048 }
 0xcc1   :  { %v1760_v35 = vmul.f32 %v3049_v31, %v1751_v18 }
 0xcc3   :  { %v4400_v50 = vsel %vm665_vm8, %v1760_v35, %v4291_v44  ;;  %v4418_v44 = vld [vmem:[%s4849_s8 + $0xe8] sm:$0xff]  ;;  %s4729_s8 = sld [smem:[#allocation2]] }
 0xcc4   :  { %1864 = vrot.lane.b32.xlu0 %v4400_v50, %s3252_s6 }
 0xcc9   :  { %s2378_s7 = sadd.f32 %s4731_s17, %s4729_s8 }
 0xccb   :  { %s2380_s21 = sadd.f32 %s4733_s18, %s2378_s7 }
 0xcde   :  { %v1856_v59 = vpop.permute.xlu1 %1855 }
 0xcdf   :  { %v4446_v41 = vadd.f32 %v1856_v59, %v1852_v23 }
 0xce1   :  { %3050 = vtanh.f32 %v4446_v41 }
 0xcee   :  { %v3051_v62 = vpop.eup %3050 }
 0xcef   :  { %v1860_v18 = vmul.f32 %v3051_v62, %v4382_v2 }
 0xcf1   :  { %v4597_v38 = vsel %vm664_vm7, %v1860_v18, %v4345_v9  ;;  %v4931_v9 = vld [vmem:[#allocation35_spill] sm:$0xff] }
 0xd36   :  { %v4404_v53 = vpop.permute.xlu0 %1864 }
 0xd37   :  { %2669 = vmatmul.mubr.msk.f32.vlgmr.msra.gmra.mxu0 %vm518_vm1, %v4404_v53  ;;  %v1969_v55 = vsel %vm518_vm1, %v4404_v53, %v4597_v38 }
 0xd38   :  { %1971 = vmatpush1.msra.mxu0 %v4411_v52  ;;  %2034 = vmatprep.mubr.f32.mxu0 %v4905_v25 }
 0xd39   :  { %1972 = vmatprep.subr.mxu0 %v4418_v44 }
 0xd3a   :  { %1973 = vmatpush1.msra.mxu0 %v4430_v61 }
 0xd3b   :  { %1974 = vmatprep.subr.mxu0 %v4437_v63 }
 0xd3c   :  { %1975 = vmatpush1.msra.mxu0 %v4443_v42 }
 0xd3d   :  { %1976 = vmatprep.subr.mxu0 %v4451_v1 }
 0xd3e   :  { %1977 = vmatpush1.msra.mxu0 %v4457_v3 }
 0xd3f   :  { %1978 = vmatprep.subr.mxu0 %v4463_v7 }
 0xd40   :  { %1979 = vmatpush1.msra.mxu0 %v4469_v11 }
 0xd41   :  { %1980 = vmatprep.subr.mxu0 %v4476_v54 }
 0xd42   :  { %1981 = vmatpush1.msra.mxu0 %v4482_v24 }
 0xd43   :  { %1982 = vmatprep.subr.mxu0 %v4488_v60 }
 0xd44   :  { %1983 = vmatpush1.msra.mxu0 %v4494_v36 }
 0xd45   :  { %1984 = vmatprep.subr.mxu0 %v4500_v0 }
 0xd46   :  { %1985 = vmatpush1.msra.mxu0 %v4506_v19 }
 0xd47   :  { %1986 = vmatprep.subr.mxu0 %v4512_v32 }
 0xd48   :  { %1987 = vmatpush1.msra.mxu0 %v4518_v37 }
 0xd49   :  { %1988 = vmatprep.subr.mxu0 %v4524_v58 }
 0xd4a   :  { %1989 = vmatpush1.msra.mxu0 %v4530_v6 }
 0xd4b   :  { %1990 = vmatprep.subr.mxu0 %v4536_v14 }
 0xd4c   :  { %1991 = vmatpush1.msra.mxu0 %v4542_v4 }
 0xd4d   :  { %1992 = vmatprep.subr.mxu0 %v4548_v56 }
 0xd4e   :  { %1993 = vmatpush1.msra.mxu0 %v4554_v33 }
 0xd4f   :  { %1994 = vmatprep.subr.mxu0 %v4560_v13 }
 0xd50   :  { %1995 = vmatpush1.msra.mxu0 %v4566_v10 }
 0xd51   :  { %1996 = vmatprep.subr.mxu0 %v4573_v20 }
 0xd52   :  { %1997 = vmatpush1.msra.mxu0 %v4579_v28 }
 0xd53   :  { %1998 = vmatprep.subr.mxu0 %v4585_v40 }
 0xd54   :  { %1999 = vmatpush1.msra.mxu0 %v4591_v16 }
 0xd55   :  { %2000 = vmatprep.subr.mxu0 %v4602_v30 }
 0xd56   :  { %2001 = vmatpush1.msra.mxu0 %v4611_v34 }
 0xd57   :  { %2035 = vmatmul.mubr.f32.vlgmr.msra.gmra.mxu0 %v1969_v55  ;;  %2278 = vmatprep.subr.mxu0 %v4368_v15  ;;  %v646_v15 = vadd.f32 %v4931_v9, %v4928_v22 }
 0xd58   :  { %2279 = vmatpush1.msra.mxu0 %v4411_v52  ;;  %2342 = vmatprep.mubr.f32.mxu0 %v4905_v25 }
 0xd59   :  { %2280 = vmatprep.subr.mxu0 %v4418_v44 }
 0xd5a   :  { %2281 = vmatpush1.msra.mxu0 %v4430_v61 }
 0xd5b   :  { %2282 = vmatprep.subr.mxu0 %v4437_v63 }
 0xd5c   :  { %2283 = vmatpush1.msra.mxu0 %v4443_v42 }
 0xd5d   :  { %2284 = vmatprep.subr.mxu0 %v4451_v1 }
 0xd5e   :  { %2285 = vmatpush1.msra.mxu0 %v4457_v3 }
 0xd5f   :  { %2286 = vmatprep.subr.mxu0 %v4463_v7 }
 0xd60   :  { %2287 = vmatpush1.msra.mxu0 %v4469_v11 }
 0xd61   :  { %2288 = vmatprep.subr.mxu0 %v4476_v54 }
 0xd62   :  { %2289 = vmatpush1.msra.mxu0 %v4482_v24 }
 0xd63   :  { %2290 = vmatprep.subr.mxu0 %v4488_v60 }
 0xd64   :  { %2291 = vmatpush1.msra.mxu0 %v4494_v36 }
 0xd65   :  { %2292 = vmatprep.subr.mxu0 %v4500_v0 }
 0xd66   :  { %2293 = vmatpush1.msra.mxu0 %v4506_v19 }
 0xd67   :  { %2294 = vmatprep.subr.mxu0 %v4512_v32 }
 0xd68   :  { %2295 = vmatpush1.msra.mxu0 %v4518_v37 }
 0xd69   :  { %2296 = vmatprep.subr.mxu0 %v4524_v58 }
 0xd6a   :  { %2297 = vmatpush1.msra.mxu0 %v4530_v6 }
 0xd6b   :  { %2298 = vmatprep.subr.mxu0 %v4536_v14 }
 0xd6c   :  { %2299 = vmatpush1.msra.mxu0 %v4542_v4 }
 0xd6d   :  { %2300 = vmatprep.subr.mxu0 %v4548_v56 }
 0xd6e   :  { %2301 = vmatpush1.msra.mxu0 %v4554_v33 }
 0xd6f   :  { %2302 = vmatprep.subr.mxu0 %v4560_v13 }
 0xd70   :  { %2303 = vmatpush1.msra.mxu0 %v4566_v10 }
 0xd71   :  { %2304 = vmatprep.subr.mxu0 %v4573_v20 }
 0xd72   :  { %2305 = vmatpush1.msra.mxu0 %v4579_v28 }
 0xd73   :  { %2306 = vmatprep.subr.mxu0 %v4585_v40 }
 0xd74   :  { %2307 = vmatpush1.msra.mxu0 %v4591_v16 }
 0xd75   :  { %2308 = vmatprep.subr.mxu0 %v4602_v30 }
 0xd76   :  { %2309 = vmatpush1.msra.mxu0 %v4611_v34 }
 0xd77   :  { %2867 = vmatprep.subr.mxu0 %v4905_v25 }
 0xdf7   :  { %v1934_v48 = vpop.f32.mrf.mxu0 }
 0xdf8   :  { %v1939_v12 = vadd.f32 %v1934_v48, %v646_v15 }
 0xdf9   :  { %v1936_v45 = vpop.f32.mrf.mxu0 }
 0xdfa   :  { %v2670_v21 = vmul.f32 -1.442695, %v1939_v12  ;;  %v1940_v2 = vadd.f32 %v1936_v45, %v648_v17 }
 0xdfc   :  { %3052 = vpow2.f32 %v2670_v21  ;;  %v2671_v57 = vmul.f32 -1.442695, %v1940_v2 }
 0xdfe   :  { %3054 = vpow2.f32 %v2671_v57 }
 0xdff   :  { %3056 = vtanh.f32 %v1940_v2 }
 0xe09   :  { %v3053_v47 = vpop.eup %3052 }
 0xe0a   :  { %v1949_v31 = vadd.f32 1.0, %v3053_v47 }
 0xe0b   :  { %v3055_v49 = vpop.eup %3054 }
 0xe0c   :  { %v1950_v35 = vadd.f32 1.0, %v3055_v49  ;;  %v3057_v62 = vpop.eup %3056 }
 0xe0e   :  { %3058 = vrcp.f32 %v1950_v35 }
 0xe0f   :  { %3060 = vrcp.f32 %v1949_v31 }
 0xe17   :  { %v2036_v53 = vpop.f32.mrf.mxu0 }
 0xe18   :  { %v2037_v59 = vadd.f32 %v2036_v53, %v4001_v8  ;;  %v4664_v53 = vsel %vm665_vm8, %v4393_v29, %v4390_v26  ;;  %v4686_v29 = vsel %vm664_vm7, %v4446_v41, %v4425_v51 }
 0xe19   :  { %v2038_v23 = vpop.f32.mrf.mxu0 }
 0xe1a   :  { %v2672_v18 = vmul.f32 -1.442695, %v2037_v59  ;;  %v2039_v55 = vadd.f32 %v2038_v23, %v4007_v39 }
 0xe1b   :  { %v3059_v9 = vpop.eup %3058 }
 0xe1c   :  { %v3061_v15 = vpop.eup %3060  ;;  %3062 = vpow2.f32 %v2672_v18  ;;  %v2673_v48 = vmul.f32 -1.442695, %v2039_v55  ;;  %v1956_v43 = vsel %vm672_vm2, %v3057_v62, %v3059_v9 }
 0xe1d   :  { %v1958_v17 = vmul.f32 %v3061_v15, %v1956_v43  ;;  %v1957_v59 = vmul.f32 %v3061_v15, %v4664_v53 }
 0xe1e   :  { %3064 = vpow2.f32 %v2673_v48  ;;  %v4937_v48 = vld [vmem:[#allocation16_spill] sm:$0xff] }
 0xe1f   :  { %1960 = vrot.lane.b32.xlu0 %v1958_v17, %s3252_s6  ;;  %3066 = vtanh.f32 %v2039_v55 }
 0xe29   :  { %v3063_v12 = vpop.eup %3062 }
 0xe2a   :  { %v2049_v21 = vadd.f32 1.0, %v3063_v12 }
 0xe2b   :  { %v3065_v45 = vpop.eup %3064 }
 0xe2c   :  { %v2050_v2 = vadd.f32 1.0, %v3065_v45  ;;  %v3067_v57 = vpop.eup %3066 }
 0xe2e   :  { %3068 = vrcp.f32 %v2050_v2 }
 0xe2f   :  { %3070 = vrcp.f32 %v2049_v21  ;;  %v4938_v21 = vld [vmem:[#allocation15_spill] sm:$0xff] }
 0xe3b   :  { %v3069_v47 = vpop.eup %3068 }
 0xe3c   :  { %v3071_v49 = vpop.eup %3070  ;;  %v2056_v31 = vsel %vm672_vm2, %v3067_v57, %v3069_v47  ;;  %v4939_v57 = vld [vmem:[#allocation18_spill] sm:$0xff] }
 0xe3d   :  { %v2058_v35 = vmul.f32 %v3071_v49, %v2056_v31  ;;  %v2057_v15 = vmul.f32 %v3071_v49, %v4686_v29  ;;  %v4940_v49 = vld [vmem:[#allocation17_spill] sm:$0xff] }
 0xe3f   :  { %2060 = vrot.lane.b32.xlu0 %v2058_v35, %s3252_s6  ;;  %v4941_v35 = vld [vmem:[#allocation21_spill] sm:$0xff] }
 0xe91   :  { %v1961_v23 = vpop.permute.xlu0 %1960 }
 0xe92   :  { %v4667_v62 = vadd.f32 %v1961_v23, %v1957_v59 }
 0xe94   :  { %3072 = vtanh.f32 %v4667_v62 }
 0xea1   :  { %v3073_v18 = vpop.eup %3072 }
 0xea2   :  { %v1965_v55 = vmul.f32 %v3073_v18, %v1956_v43 }
 0xea4   :  { %v4674_v9 = vsel %vm666_vm9, %v1965_v55, %v4400_v50 }
 0xea5   :  { %2069 = vrot.lane.b32.xlu1 %v4674_v9, %s3252_s6 }
 0xeb1   :  { %v2061_v50 = vpop.permute.xlu0 %2060 }
 0xf17   :  { %v2070_v26 = vpop.permute.xlu1 %2069 }
 0xf18   :  { %2674 = vmatmul.mubr.msk.f32.vlgmr.msra.gmra.mxu1 %vm518_vm1, %v2070_v26 }
 0xf19   :  { %2176 = vmatpush1.msra.mxu1 %v4411_v52  ;;  %2239 = vmatprep.mubr.f32.mxu1 %v4905_v25  ;;  %v4692_v52 = vadd.f32 %v2061_v50, %v2057_v15  ;;  %v4942_v50 = vld [vmem:[#allocation19_spill] sm:$0xff] }
 0xf1a   :  { %2177 = vmatprep.subr.mxu1 %v4418_v44 }
 0xf1b   :  { %2178 = vmatpush1.msra.mxu1 %v4430_v61  ;;  %3074 = vtanh.f32 %v4692_v52 }
 0xf1c   :  { %2179 = vmatprep.subr.mxu1 %v4437_v63 }
 0xf1d   :  { %2180 = vmatpush1.msra.mxu1 %v4443_v42  ;;  %v2381_v42 = vstv %s2380_s21 }
 0xf1e   :  { %2181 = vmatprep.subr.mxu1 %v4451_v1  ;;  %3076 = vrcp.f32 %v2381_v42  ;;  %v4933_v1 = vld [vmem:[#allocation37_spill] sm:$0xff] }
 0xf1f   :  { %2182 = vmatpush1.msra.mxu1 %v4457_v3  ;;  %v652_v3 = vadd.f32 %v4933_v1, %v4928_v22 }
 0xf20   :  { %2183 = vmatprep.subr.mxu1 %v4463_v7 }
 0xf21   :  { %2184 = vmatpush1.msra.mxu1 %v4469_v11  ;;  %v4934_v11 = vld [vmem:[#allocation38_spill] sm:$0xff] }
 0xf22   :  { %2185 = vmatprep.subr.mxu1 %v4476_v54  ;;  %v654_v54 = vadd.f32 %v4934_v11, %v3623_v46 }
 0xf23   :  { %2186 = vmatpush1.msra.mxu1 %v4482_v24 }
 0xf24   :  { %2187 = vmatprep.subr.mxu1 %v4488_v60 }
 0xf25   :  { %2188 = vmatpush1.msra.mxu1 %v4494_v36 }
 0xf26   :  { %2189 = vmatprep.subr.mxu1 %v4500_v0 }
 0xf27   :  { %2190 = vmatpush1.msra.mxu1 %v4506_v19 }
 0xf28   :  { %2191 = vmatprep.subr.mxu1 %v4512_v32  ;;  %v3075_v44 = vpop.eup %3074 }
 0xf29   :  { %2192 = vmatpush1.msra.mxu1 %v4518_v37  ;;  %v2065_v51 = vmul.f32 %v3075_v44, %v2056_v31 }
 0xf2a   :  { %2193 = vmatprep.subr.mxu1 %v4524_v58 }
 0xf2b   :  { %2194 = vmatpush1.msra.mxu1 %v4530_v6  ;;  %v4722_v61 = vsel %vm665_vm8, %v2065_v51, %v4597_v38  ;;  %v3077_v41 = vpop.eup %3076  ;;  %v4936_v38 = vld [vmem:[#allocation13_spill] sm:$0xff] }
 0xf2c   :  { %2195 = vmatprep.subr.mxu1 %v4536_v14  ;;  %v2174_v63 = vsel %vm518_vm1, %v2070_v26, %v4722_v61  ;;  %2902 = vpush %v3077_v41 }
 0xf2d   :  { %2196 = vmatpush1.msra.mxu1 %v4542_v4 }
 0xf2e   :  { %2197 = vmatprep.subr.mxu1 %v4548_v56 }
 0xf2f   :  { %2198 = vmatpush1.msra.mxu1 %v4554_v33 }
 0xf30   :  { %2199 = vmatprep.subr.mxu1 %v4560_v13 }
 0xf31   :  { %2200 = vmatpush1.msra.mxu1 %v4566_v10 }
 0xf32   :  { %2201 = vmatprep.subr.mxu1 %v4573_v20 }
 0xf33   :  { %2202 = vmatpush1.msra.mxu1 %v4579_v28 }
 0xf34   :  { %2203 = vmatprep.subr.mxu1 %v4585_v40 }
 0xf35   :  { %2204 = vmatpush1.msra.mxu1 %v4591_v16  ;;  %v4935_v16 = vld [vmem:[#allocation14_spill] sm:$0xff] }
 0xf36   :  { %2205 = vmatprep.subr.mxu1 %v4602_v30  ;;  %v280_v30 = vadd.f32 %v4936_v38, %v4935_v16 }
 0xf37   :  { %2206 = vmatpush1.msra.mxu1 %v4611_v34 }
 0xf38   :  { %2240 = vmatmul.mubr.f32.vlgmr.msra.gmra.mxu1 %v2174_v63  ;;  %2848 = vmatprep.subr.mxu1 %v4905_v25  ;;  %v281_v43 = vadd.f32 %v280_v30, %v4937_v48  ;;  %v1967_v63 = vsel %vm666_vm9, %v4667_v62, %v4664_v53 }
 0xf39   :  { %2864 = vmatprep.mubr.msk.f32.mxu1 %vm3253_vm11, %v4905_v25 }
 0xf3a   :  { %v282_v2 = vadd.f32 %v4938_v21, %v281_v43  ;;  %v2413_v21 = vld [vmem:[#allocation6 + $0x20] sm:$0xff] }
 0xf3c   :  { %v283_v47 = vadd.f32 %v282_v2, %v4939_v57  ;;  %v2411_v2 = vld [vmem:[#allocation6 + $0x10] sm:$0xff]  ;;  %v2410_v57 = vld [vmem:[#allocation6 + $0x8] sm:$0xff] }
 0xf3e   :  { %v284_v31 = vadd.f32 %v4940_v49, %v283_v47  ;;  %v2409_v47 = vld [vmem:[#allocation6] sm:$0xff] }
 0xf40   :  { %v285_v59 = vadd.f32 %v284_v31, %v4941_v35 }
 0xf42   :  { %v286_v15 = vadd.f32 %v4942_v50, %v285_v59  ;;  %v2513_v50 = vld [vmem:[#allocation8 + $0x68] sm:$0xff] }
 0xf44   :  { %v287_v51 = vmul.f32 0.125, %v286_v15 }
 0xf5d   :  { %s4763_s4 = spop %2902 }
 0xf5e   :  { %s2384_s22 = smul.f32 %s4763_s4, %s4729_s8 }
 0xf5f   :  { %s2390_s23 = smul.f32 %s4763_s4, %s4731_s17 }
 0xfd8   :  { %v2139_v7 = vpop.f32.mrf.mxu1 }
 0xfd9   :  { %v2144_v24 = vadd.f32 %v2139_v7, %v652_v3 }
 0xfda   :  { %v2141_v60 = vpop.f32.mrf.mxu1 }
 0xfdb   :  { %v2675_v36 = vmul.f32 -1.442695, %v2144_v24  ;;  %v2145_v0 = vadd.f32 %v2141_v60, %v654_v54  ;;  %v2387_v54 = vstv %s2384_s22 }
 0xfdd   :  { %3078 = vpow2.f32 %v2675_v36  ;;  %v2676_v19 = vmul.f32 -1.442695, %v2145_v0  ;;  %v2067_v36 = vsel %vm665_vm8, %v4692_v52, %v4686_v29 }
 0xfdf   :  { %3080 = vpow2.f32 %v2676_v19 }
 0xfe0   :  { %3082 = vtanh.f32 %v2145_v0 }
 0xfea   :  { %v3079_v32 = vpop.eup %3078 }
 0xfeb   :  { %v2154_v58 = vadd.f32 1.0, %v3079_v32 }
 0xfec   :  { %v3081_v37 = vpop.eup %3080 }
 0xfed   :  { %v2155_v6 = vadd.f32 1.0, %v3081_v37  ;;  %v3083_v56 = vpop.eup %3082 }
 0xfef   :  { %3084 = vrcp.f32 %v2155_v6 }
 0xff0   :  { %3086 = vrcp.f32 %v2154_v58 }
 0xff8   :  { %v2241_v14 = vpop.f32.mrf.mxu1 }
 0xff9   :  { %v2242_v22 = vadd.f32 %v2241_v14, %v4001_v8 }
 0xffa   :  { %v2243_v4 = vpop.f32.mrf.mxu1 }
 0xffb   :  { %v2677_v46 = vmul.f32 -1.442695, %v2242_v22  ;;  %v2244_v33 = vadd.f32 %v2243_v4, %v4007_v39 }
 0xffc   :  { %v3085_v13 = vpop.eup %3084 }
 0xffd   :  { %v3087_v10 = vpop.eup %3086  ;;  %3088 = vpow2.f32 %v2677_v46  ;;  %v2678_v20 = vmul.f32 -1.442695, %v2244_v33  ;;  %v2161_v28 = vsel %vm672_vm2, %v3083_v56, %v3085_v13 }
 0xffe   :  { %v2163_v40 = vmul.f32 %v3087_v10, %v2161_v28  ;;  %v2162_v42 = vmul.f32 %v3087_v10, %v1967_v63 }
 0xfff   :  { %3090 = vpow2.f32 %v2678_v20 }
0x1000   :  { %2165 = vrot.lane.b32.xlu1 %v2163_v40, %s3252_s6  ;;  %3092 = vtanh.f32 %v2244_v33 }
0x100a   :  { %v3089_v34 = vpop.eup %3088 }
0x100b   :  { %v2254_v12 = vadd.f32 1.0, %v3089_v34 }
0x100c   :  { %v3091_v17 = vpop.eup %3090 }
0x100d   :  { %v2255_v45 = vadd.f32 1.0, %v3091_v17  ;;  %v3093_v23 = vpop.eup %3092  ;;  %v2416_v17 = vld [vmem:[#allocation6 + $0x38] sm:$0xff] }
0x100e   :  { %2849 = vmatpush3.msra.mxu1 %v2416_v17 }
0x100f   :  { %3094 = vrcp.f32 %v2255_v45  ;;  %2850 = vmatprep.subr.mxu1 %v4905_v25  ;;  %v2414_v45 = vld [vmem:[#allocation6 + $0x28] sm:$0xff] }
0x1010   :  { %3096 = vrcp.f32 %v2254_v12  ;;  %v2415_v12 = vld [vmem:[#allocation6 + $0x30] sm:$0xff] }
0x1011   :  { %2851 = vmatpush3.msra.mxu1 %v2415_v12 }
0x1012   :  { %2852 = vmatprep.subr.mxu1 %v4905_v25 }
0x1013   :  { %2853 = vmatpush3.msra.mxu1 %v2414_v45 }
0x1014   :  { %2854 = vmatprep.subr.mxu1 %v4905_v25 }
0x1015   :  { %2855 = vmatpush3.msra.mxu1 %v2413_v21 }
0x1016   :  { %2856 = vmatprep.subr.mxu1 %v4905_v25 }
0x1017   :  { %2857 = vmatpush3.msra.mxu1 %v2412_v5 }
0x1018   :  { %2858 = vmatprep.subr.mxu1 %v4905_v25 }
0x1019   :  { %2859 = vmatpush3.msra.mxu1 %v2411_v2 }
0x101a   :  { %2860 = vmatprep.subr.mxu1 %v4905_v25 }
0x101b   :  { %2861 = vmatpush3.msra.mxu1 %v2410_v57 }
0x101c   :  { %v3095_v18 = vpop.eup %3094  ;;  %2862 = vmatprep.subr.mxu1 %v4905_v25 }
0x101d   :  { %v3097_v55 = vpop.eup %3096  ;;  %v2261_v26 = vsel %vm672_vm2, %v3093_v23, %v3095_v18  ;;  %2863 = vmatpush3.msra.mxu1 %v2409_v47  ;;  %v2515_v18 = vld [vmem:[#allocation8 + $0x78] sm:$0xff] }
0x101e   :  { %v2263_v44 = vmul.f32 %v3097_v55, %v2261_v26  ;;  %v2262_v0 = vmul.f32 %v3097_v55, %v2067_v36  ;;  %v2514_v55 = vld [vmem:[#allocation8 + $0x70] sm:$0xff] }
0x1020   :  { %2265 = vrot.lane.b32.xlu0 %v2263_v44, %s3252_s6  ;;  %v2512_v44 = vld [vmem:[#allocation8 + $0x60] sm:$0xff] }
0x1024   :  { %2398 = vrot.lane.b32.xlu0 %v287_v51, %s3251_s5  ;;  %s2396_s5 = smul.f32 %s4763_s4, %s4733_s18 }
0x1072   :  { %v2166_v41 = vpop.permute.xlu1 %2165 }
0x1073   :  { %v2168_v1 = vadd.f32 %v2166_v41, %v2162_v42  ;;  %v2511_v42 = vld [vmem:[#allocation8 + $0x58] sm:$0xff] }
0x1075   :  { %3098 = vtanh.f32 %v2168_v1  ;;  %v2172_v53 = vsel %vm667_vm10, %v2168_v1, %v1967_v63  ;;  %v2393_v63 = vstv %s2390_s23 }
0x1082   :  { %v3099_v3 = vpop.eup %3098 }
0x1083   :  { %v2170_v7 = vmul.f32 %v3099_v3, %v2161_v28 }
0x1085   :  { %v2171_v11 = vsel %vm667_vm10, %v2170_v7, %v4674_v9  ;;  %v2402_v9 = vstv %s2396_s5  ;;  %v2509_v7 = vld [vmem:[#allocation8 + $0x48] sm:$0xff] }
0x1086   :  { %2274 = vrot.lane.b32.xlu1 %v2171_v11, %s3252_s6  ;;  %v2385_v62 = vadd.f32 %v2172_v53, %v2171_v11  ;;  %v2508_v53 = vld [vmem:[#allocation8 + $0x40] sm:$0xff] }
0x1088   :  { %v2386_v24 = vmul.f32 0.5, %v2385_v62  ;;  %v2507_v62 = vld [vmem:[#allocation8 + $0x38] sm:$0xff] }
0x108a   :  { %v4774_v60 = vmul.f32 %v2387_v54, %v2386_v24  ;;  %v2506_v54 = vld [vmem:[#allocation8 + $0x30] sm:$0xff]  ;;  %v2505_v24 = vld [vmem:[#allocation8 + $0x28] sm:$0xff] }
0x1092   :  { %v2266_v19 = vpop.permute.xlu0 %2265 }
0x1093   :  { %v2268_v32 = vadd.f32 %v2266_v19, %v2262_v0  ;;  %v2502_v19 = vld [vmem:[#allocation8 + $0x10] sm:$0xff] }
0x1095   :  { %3100 = vtanh.f32 %v2268_v32  ;;  %v2272_v30 = vsel %vm666_vm9, %v2268_v32, %v2067_v36  ;;  %v2503_v36 = vld [vmem:[#allocation8 + $0x18] sm:$0xff]  ;;  %v2501_v32 = vld [vmem:[#allocation8 + $0x8] sm:$0xff] }
0x1096   :  { %v2399_v37 = vpop.permute.xlu0 %2398 }
0x1097   :  { %v2401_v58 = vsel %vm481_vm0, %v287_v51, %v2399_v37  ;;  %v2683_v37 = vld [vmem:[%s4852_s11] ss:$0 sm:$0xff] }
0x1098   :  { %v2403_v6 = vmul.f32 %v2402_v9, %v2401_v58  ;;  %v2500_v9 = vld [vmem:[#allocation8] sm:$0xff] }
0x109a   :  { %2405 = vrot.lane.b32.xlu0 %v2403_v6, %s3252_s6 }
0x10a2   :  { %v3101_v14 = vpop.eup %3100 }
0x10a3   :  { %v2270_v22 = vmul.f32 %v3101_v14, %v2261_v26 }
0x10a5   :  { %v4787_v4 = vsel %vm666_vm9, %v2270_v22, %v4722_v61 }
0x10f8   :  { %v2275_v29 = vpop.permute.xlu1 %2274 }
0x10f9   :  { %v2277_v52 = vsel %vm518_vm1, %v2275_v29, %v4787_v4 }
0x10fa   :  { %2343 = vmatmul.mubr.f32.vlgmr.msra.gmra.mxu0 %v2277_v52 }
0x10fb   :  { %2899 = vmatprep.mubr.msk.f32.mxu0 %vm3253_vm11, %v4905_v25  ;;  %2868 = vmatpush3.msra.mxu0 %v2515_v18 }
0x10fc   :  { %2869 = vmatprep.subr.mxu0 %v4905_v25 }
0x10fd   :  { %2870 = vmatpush3.msra.mxu0 %v2514_v55 }
0x10fe   :  { %2871 = vmatprep.subr.mxu0 %v4905_v25 }
0x10ff   :  { %2872 = vmatpush3.msra.mxu0 %v2513_v50 }
0x1100   :  { %2873 = vmatprep.subr.mxu0 %v4905_v25 }
0x1101   :  { %2874 = vmatpush3.msra.mxu0 %v2512_v44 }
0x1102   :  { %2875 = vmatprep.subr.mxu0 %v4905_v25 }
0x1103   :  { %2876 = vmatpush3.msra.mxu0 %v2511_v42 }
0x1104   :  { %2877 = vmatprep.subr.mxu0 %v4905_v25 }
0x1105   :  { %2878 = vmatpush3.msra.mxu0 %v2510_v27 }
0x1106   :  { %2879 = vmatprep.subr.mxu0 %v4905_v25 }
0x1107   :  { %2880 = vmatpush3.msra.mxu0 %v2509_v7 }
0x1108   :  { %2881 = vmatprep.subr.mxu0 %v4905_v25 }
0x1109   :  { %2882 = vmatpush3.msra.mxu0 %v2508_v53 }
0x110a   :  { %2883 = vmatprep.subr.mxu0 %v4905_v25 }
0x110b   :  { %2884 = vmatpush3.msra.mxu0 %v2507_v62 }
0x110c   :  { %v2406_v3 = vpop.permute.xlu0 %2405  ;;  %2885 = vmatprep.subr.mxu0 %v4905_v25 }
0x110d   :  { %2886 = vmatpush3.msra.mxu0 %v2506_v54 }
0x110e   :  { %2887 = vmatprep.subr.mxu0 %v4905_v25 }
0x110f   :  { %2888 = vmatpush3.msra.mxu0 %v2505_v24 }
0x1110   :  { %2889 = vmatprep.subr.mxu0 %v4905_v25 }
0x11ba   :  { %v2344_v56 = vpop.f32.mrf.mxu0 }
0x11bb   :  { %v2345_v46 = vadd.f32 %v2344_v56, %v4001_v8 }
0x11bc   :  { %v2346_v33 = vpop.f32.mrf.mxu0 }
0x11bd   :  { %v2679_v13 = vmul.f32 -1.442695, %v2345_v46  ;;  %v2347_v10 = vadd.f32 %v2346_v33, %v4007_v39 }
0x11bf   :  { %3102 = vpow2.f32 %v2679_v13  ;;  %v2680_v20 = vmul.f32 -1.442695, %v2347_v10 }
0x11c1   :  { %3104 = vpow2.f32 %v2680_v20 }
0x11cc   :  { %v3103_v28 = vpop.eup %3102 }
0x11cd   :  { %v2357_v40 = vadd.f32 1.0, %v3103_v28 }
0x11ce   :  { %v3105_v16 = vpop.eup %3104 }
0x11cf   :  { %3106 = vrcp.f32 %v2357_v40  ;;  %v2358_v61 = vadd.f32 1.0, %v3105_v16 }
0x11d0   :  { %3108 = vtanh.f32 %v2347_v10 }
0x11d1   :  { %3110 = vrcp.f32 %v2358_v61 }
0x11dc   :  { %v3107_v38 = vpop.eup %3106 }
0x11dd   :  { %v3109_v34 = vpop.eup %3108  ;;  %v2365_v8 = vmul.f32 %v3107_v38, %v2272_v30 }
0x11de   :  { %v3111_v48 = vpop.eup %3110 }
0x11df   :  { %v2364_v39 = vsel %vm672_vm2, %v3109_v34, %v3111_v48 }
0x11e0   :  { %v2366_v43 = vmul.f32 %v3107_v38, %v2364_v39 }
0x11e2   :  { %2368 = vrot.lane.b32.xlu1 %v2366_v43, %s3252_s6 }
0x1254   :  { %v2369_v49 = vpop.permute.xlu1 %2368 }
0x1255   :  { %v2371_v31 = vadd.f32 %v2369_v49, %v2365_v8 }
0x1257   :  { %3112 = vtanh.f32 %v2371_v31  ;;  %v2375_v35 = vsel %vm667_vm10, %v2371_v31, %v2272_v30 }
0x1264   :  { %v3113_v59 = vpop.eup %3112 }
0x1265   :  { %v2373_v23 = vmul.f32 %v3113_v59, %v2364_v39 }
0x1267   :  { %v2374_v26 = vsel %vm667_vm10, %v2373_v23, %v4787_v4  ;;  %v2685_v4 = vld [vmem:[%s4854_s13] ss:$0 sm:$0xff] }
0x1268   :  { %v2391_v15 = vadd.f32 %v2375_v35, %v2374_v26 }
0x126a   :  { %v2392_v51 = vmul.f32 0.5, %v2391_v15 }
0x126c   :  { %v2394_v41 = vmul.f32 %v2393_v63, %v2392_v51 }
0x126e   :  { %v2395_v1 = vadd.f32 %v2394_v41, %v4774_v60  ;;  %v2504_v60 = vld [vmem:[#allocation8 + $0x20] sm:$0xff] }
0x126f   :  { %2890 = vmatpush3.msra.mxu0 %v2504_v60 }
0x1270   :  { %v2408_v11 = vadd.f32 %v2406_v3, %v2395_v1  ;;  %2891 = vmatprep.subr.mxu0 %v4905_v25 }
0x1271   :  { %2892 = vmatpush3.msra.mxu0 %v2503_v36 }
0x1272   :  { %2425 = vrot.lane.b32.xlu1 %v2408_v11, %s3252_s6  ;;  %2893 = vmatprep.subr.mxu0 %v4905_v25 }
0x1273   :  { %2894 = vmatpush3.msra.mxu0 %v2502_v19 }
0x1274   :  { %2895 = vmatprep.subr.mxu0 %v4905_v25 }
0x1275   :  { %2896 = vmatpush3.msra.mxu0 %v2501_v32 }
0x1276   :  { %2897 = vmatprep.subr.mxu0 %v4905_v25 }
0x1277   :  { %2898 = vmatpush3.msra.mxu0 %v2500_v9 }
0x12e4   :  { %v2426_v0 = vpop.permute.xlu1 %2425 }
0x12e5   :  { %2865 = vmatmul.mubr.msk.f32.vlgmr.msra.gmra.mxu1 %vm518_vm1, %v2426_v0 }
0x13a5   :  { %v2495_v58 = vpop.f32.mrf.mxu1 }
0x13a6   :  { %v2496_v6 = vadd.f32 %v2683_v37, %v2495_v58 }
0x13a7   :  { %v2866_v14 = vpop.f32.mrf.mxu1 }
0x13a8   :  { %v2499_v22 = vmax.f32 %v2496_v6, 0.0 }
0x13aa   :  { %2900 = vmatmul.mubr.f32.vlgmr.msra.gmra.mxu0 %v2499_v22 }
0x146a   :  { %v2589_v29 = vpop.f32.mrf.mxu0 }
0x146b   :  { %v2590_v52 = vadd.f32 %v2685_v4, %v2589_v29 }
0x146c   :  { %v2901_v56 = vpop.f32.mrf.mxu0 }
0x146d   :  { %2593 = vst [vmem:[%s4855_s14] sm:$0xff] %v2590_v52 }
0x146e   :  { %2598 = vsyncpa [#allocation3], 1 }
0x146f   :  { %2599 = vsyncpa [#allocation7], 1 }
0x1470   :  { %2600 = vsyncpa [#allocation4], 1 }

</bundles_post_ra>
